<compile_context>
chip_gen: v7x
topology: tpu7x:2x2x1
jax: 0.10.0
libtpu: 0.0.40
codegen_flags: <defaults>
</compile_context>

<pallas_src>
import functools

import jax
import jax.numpy as jnp
from jax.experimental import pallas as pl
from jax.experimental.pallas import tpu as pltpu


# ----------------------------- Pallas kernel --------------------------------
def _window_attn_kernel(x_ref, wq_ref, bq_ref, wk_ref, bk_ref, wv_ref, bv_ref,
                        rpb_ref, wproj_ref, bproj_ref, o_ref, *, num_heads):
    Bw, N, C = x_ref.shape                      # block of Bw windows
    hd = C // num_heads

    # Flattened token slab for the projections (leading-dim collapse is free).
    xf = x_ref[...].reshape(Bw * N, C)          # (Bw*N, C) bf16

    acc = None
    for h in range(num_heads):                  # num_heads is small & static
        # Per-head projections; qk scale already folded into wq/bq.
        q = jnp.dot(xf, wq_ref[h], preferred_element_type=jnp.float32) + bq_ref[h]
        k = jnp.dot(xf, wk_ref[h], preferred_element_type=jnp.float32) + bk_ref[h]
        v = jnp.dot(xf, wv_ref[h], preferred_element_type=jnp.float32) + bv_ref[h]
        q = q.reshape(Bw, N, hd).astype(jnp.bfloat16)
        k = k.reshape(Bw, N, hd).astype(jnp.bfloat16)
        v = v.reshape(Bw, N, hd).astype(jnp.bfloat16)

        # Window-batched attention for this head.
        s = jnp.einsum("bnd,bmd->bnm", q, k,
                       preferred_element_type=jnp.float32)       # (Bw, N, N)
        s = s + rpb_ref[h][None]                                  # rel. pos. bias
        s = s - jnp.max(s, axis=-1, keepdims=True)
        p = jnp.exp(s)
        p = p * pl.reciprocal(jnp.sum(p, axis=-1, keepdims=True), approx=True)

        oh = jnp.einsum("bnm,bmd->bnd", p.astype(jnp.bfloat16), v,
                        preferred_element_type=jnp.float32)       # (Bw, N, hd)

        # Output projection, head-sliced: concat_h(o_h) @ Wp == sum_h o_h @ Wp[h].
        contrib = jnp.dot(oh.reshape(Bw * N, hd).astype(jnp.bfloat16),
                          wproj_ref[h], preferred_element_type=jnp.float32)
        acc = contrib if acc is None else acc + contrib

    out = acc + bproj_ref[...]                                    # (Bw*N, C) f32
    o_ref[...] = out.reshape(Bw, N, C).astype(o_ref.dtype)


# ------------------------------- Wrapper -------------------------------------
def _pick_block_windows(B_, N, target_rows=512):
    """Largest divisor Bw of B_ with Bw*N <= target_rows; keep >= 2 grid steps."""
    best = 1
    for d in range(1, B_ + 1):
        if B_ % d == 0 and d * N <= target_rows:
            best = d
    if B_ // best < 2:              # keep >=2 parallel steps (v7x: 2 TensorCores)
        for d in range(best, 0, -1):
            if B_ % d == 0 and B_ // d >= 2:
                best = d
                break
    return best


def prepare_window_attention_params(wq, bq, wkv, bkv, rpb, wproj, bproj, *,
                                    num_heads, scale,
                                    param_dtype=jnp.bfloat16):
    """One-time parameter prep: split kv & heads, fold qk scale, cast weights."""
    C = wq.shape[0]
    hd = C // num_heads
    wk, wv = wkv[:, :C], wkv[:, C:]
    bk, bv = bkv[:, :C], bkv[:, C:]
    wq_s, bq_s = wq * scale, bq * scale          # fold scale into the q projection

    def split_w(w):                              # (C, C) -> (H, C, hd)
        return jnp.transpose(w.reshape(C, num_heads, hd), (1, 0, 2))

    def split_b(b):                              # (1, C) -> (H, 1, hd)
        return jnp.transpose(b.reshape(1, num_heads, hd), (1, 0, 2))

    return (split_w(wq_s).astype(param_dtype),
            split_b(bq_s).astype(jnp.float32),
            split_w(wk).astype(param_dtype),
            split_b(bk).astype(jnp.float32),
            split_w(wv).astype(param_dtype),
            split_b(bv).astype(jnp.float32),
            rpb.astype(jnp.float32),                           # (H, N, N)
            wproj.reshape(num_heads, hd, C).astype(param_dtype),
            bproj.astype(jnp.float32))                         # (1, C)


def window_attention_pallas(x, prepared_params, *, num_heads, block_windows=None):
    B_, N, C = x.shape
    (wq_h, bq_h, wk_h, bk_h, wv_h, bv_h, rpb, wproj_h, bproj) = prepared_params
    H = num_heads
    hd = C // H

    Bw = block_windows or _pick_block_windows(B_, N)
    assert B_ % Bw == 0, "block_windows must divide the number of windows"

    # bf16 activations halve the kernel's x HBM traffic (no-op if already bf16).
    x_bf = x.astype(jnp.bfloat16)

    kernel = functools.partial(_window_attn_kernel, num_heads=H)
    const3 = lambda b: (0, 0, 0)

    out = pl.pallas_call(
        kernel,
        out_shape=jax.ShapeDtypeStruct((B_, N, C), jnp.float32),
        grid_spec=pltpu.PrefetchScalarGridSpec(
            num_scalar_prefetch=0,
            grid=(B_ // Bw,),
            in_specs=[
                pl.BlockSpec((Bw, N, C), lambda b: (b, 0, 0)),     # x (window batch)
                pl.BlockSpec((H, C, hd), const3),                  # wq per head
                pl.BlockSpec((H, 1, hd), const3),                  # bq per head
                pl.BlockSpec((H, C, hd), const3),                  # wk per head
                pl.BlockSpec((H, 1, hd), const3),                  # bk per head
                pl.BlockSpec((H, C, hd), const3),                  # wv per head
                pl.BlockSpec((H, 1, hd), const3),                  # bv per head
                pl.BlockSpec((H, N, N), const3),                   # rel. pos. bias
                pl.BlockSpec((H, hd, C), const3),                  # wproj per head
                pl.BlockSpec((1, C), lambda b: (0, 0)),            # bproj
            ],
            out_specs=pl.BlockSpec((Bw, N, C), lambda b: (b, 0, 0)),
        ),
        compiler_params=pltpu.CompilerParams(
            dimension_semantics=("parallel",)),
    )(x_bf, wq_h, bq_h, wk_h, bk_h, wv_h, bv_h, rpb, wproj_h, bproj)
    return out.astype(x.dtype)


# ------------------- Relative position bias (glue, plain JAX) ----------------
def make_relative_position_bias(table, win_size, num_heads):
    # Mirrors the PyTorch index construction exactly.
    wh, ww = win_size
    coords_h = jnp.arange(wh)
    coords_w = jnp.arange(ww)
    coords = jnp.stack(jnp.meshgrid(coords_h, coords_w, indexing="ij"))   # (2, wh, ww)
    coords_flatten = coords.reshape(2, -1)                                # (2, N)
    rel = coords_flatten[:, :, None] - coords_flatten[:, None, :]         # (2, N, N)
    rel = rel.transpose(1, 2, 0)                                          # (N, N, 2)
    rel = rel.at[:, :, 0].add(wh - 1)
    rel = rel.at[:, :, 1].add(ww - 1)
    rel = rel.at[:, :, 0].multiply(2 * ww - 1)
    rel_pos_index = rel.sum(-1)                                           # (N, N)
    N = wh * ww
    bias = table[rel_pos_index.reshape(-1)].reshape(N, N, num_heads)      # gather
    return bias.transpose(2, 0, 1)                                        # (nH, N, N)


# --------------------------- Pure-JAX reference -------------------------------
def window_attention_ref(x, params, *, num_heads, scale):
    wq, bq, wkv, bkv, rpb, wproj, bproj = params
    B_, N, C = x.shape
    hd = C // num_heads
    q = x @ wq + bq[0]
    kv = x @ wkv + bkv[0]
    k, v = kv[..., :C], kv[..., C:]
    qh = q.reshape(B_, N, num_heads, hd).transpose(0, 2, 1, 3) * scale
    kh = k.reshape(B_, N, num_heads, hd).transpose(0, 2, 1, 3)
    vh = v.reshape(B_, N, num_heads, hd).transpose(0, 2, 1, 3)
    attn = jnp.einsum("bhnd,bhmd->bhnm", qh, kh) + rpb[None]
    attn = jax.nn.softmax(attn, axis=-1)
    out = jnp.einsum("bhnm,bhmd->bhnd", attn, vh)
    out = out.transpose(0, 2, 1, 3).reshape(B_, N, C)
    return out @ wproj + bproj[0]


# --------------------------------- Main ---------------------------------------
if __name__ == "__main__":
    # Small, module-consistent shapes: dim=32, heads=4, win_size=(4,4) -> N=16,
    # B_ = 16 windows (e.g. a 16x16 image, batch 1, partitioned into 4x4 windows).
    dim = 32
    num_heads = 4
    win_size = (4, 4)
    N = win_size[0] * win_size[1]
    B_ = 16                             # num_windows * batch
    head_dim = dim // num_heads
    scale = head_dim ** (-0.5)

    key = jax.random.PRNGKey(0)
    ks = jax.random.split(key, 8)

    # Deterministic synthetic parameters (shapes match the nn.Module __init__).
    wq = jax.random.normal(ks[0], (dim, dim), jnp.float32) * 0.05
    bq = jax.random.normal(ks[1], (1, dim), jnp.float32) * 0.05
    wkv = jax.random.normal(ks[2], (dim, 2 * dim), jnp.float32) * 0.05
    bkv = jax.random.normal(ks[3], (1, 2 * dim), jnp.float32) * 0.05
    rpb_table = jax.random.normal(
        ks[4], ((2 * win_size[0] - 1) * (2 * win_size[1] - 1), num_heads),
        jnp.float32) * 0.02             # trunc_normal(std=0.02) stand-in
    wproj = jax.random.normal(ks[5], (dim, dim), jnp.float32) * 0.05
    bproj = jax.random.normal(ks[6], (1, dim), jnp.float32) * 0.05

    rpb = make_relative_position_bias(rpb_table, win_size, num_heads)  # (nH, N, N)

    # One-time kernel parameter prep (head split, kv split, scale fold, bf16 cast).
    prepared = prepare_window_attention_params(
        wq, bq, wkv, bkv, rpb, wproj, bproj, num_heads=num_heads, scale=scale)

    x = jax.random.normal(ks[7], (B_, N, dim), jnp.float32)

    out = window_attention_pallas(x, prepared, num_heads=num_heads)
    out = jax.block_until_ready(out)

    ref = window_attention_ref(x, (wq, bq, wkv, bkv, rpb, wproj, bproj),
                               num_heads=num_heads, scale=scale)
    assert out.shape == (B_, N, dim)
    # bf16 operands with f32 accumulation -> loosened tolerance vs the f32 reference.
    assert jnp.allclose(out, ref, atol=2e-2, rtol=2e-2), "mismatch vs reference"

    # TODO(synk): mask branch / attn_drop / proj_drop / SELayer are inert in the
    # stated eval config (mask=None, drop=0, Identity) and are not implemented
    # in-kernel.
    print("KERNEL_OK")
</pallas_src>

<mosaic_0001>
module attributes {stable_mosaic.version = 11 : i64} {
  func.func @_window_attn_kernel(%arg0: i32, %arg1: memref<8x16x32xbf16, #tpu.memory_space<vmem>>, %arg2: memref<4x32x8xbf16, #tpu.memory_space<vmem>>, %arg3: memref<4x1x8xf32, #tpu.memory_space<vmem>>, %arg4: memref<4x32x8xbf16, #tpu.memory_space<vmem>>, %arg5: memref<4x1x8xf32, #tpu.memory_space<vmem>>, %arg6: memref<4x32x8xbf16, #tpu.memory_space<vmem>>, %arg7: memref<4x1x8xf32, #tpu.memory_space<vmem>>, %arg8: memref<4x16x16xf32, #tpu.memory_space<vmem>>, %arg9: memref<4x8x32xbf16, #tpu.memory_space<vmem>>, %arg10: memref<1x32xf32, #tpu.memory_space<vmem>>, %arg11: memref<8x16x32xf32, #tpu.memory_space<vmem>>) attributes {dimension_semantics = [#tpu.dimension_semantics<parallel>], iteration_bounds = array<i64: 2>, scalar_prefetch = 0 : i64, scratch_operands = 0 : i64, tpu.core_type = #tpu.core_type<tc>, window_params = [{transform_indices = @transform_0, window_bounds = array<i64: 8, 16, 32>}, {pipeline_mode = #tpu.pipeline_mode<synchronous>, transform_indices = @transform_1, window_bounds = array<i64: 4, 32, 8>}, {pipeline_mode = #tpu.pipeline_mode<synchronous>, transform_indices = @transform_2, window_bounds = array<i64: 4, 1, 8>}, {pipeline_mode = #tpu.pipeline_mode<synchronous>, transform_indices = @transform_3, window_bounds = array<i64: 4, 32, 8>}, {pipeline_mode = #tpu.pipeline_mode<synchronous>, transform_indices = @transform_4, window_bounds = array<i64: 4, 1, 8>}, {pipeline_mode = #tpu.pipeline_mode<synchronous>, transform_indices = @transform_5, window_bounds = array<i64: 4, 32, 8>}, {pipeline_mode = #tpu.pipeline_mode<synchronous>, transform_indices = @transform_6, window_bounds = array<i64: 4, 1, 8>}, {pipeline_mode = #tpu.pipeline_mode<synchronous>, transform_indices = @transform_7, window_bounds = array<i64: 4, 16, 16>}, {pipeline_mode = #tpu.pipeline_mode<synchronous>, transform_indices = @transform_8, window_bounds = array<i64: 4, 8, 32>}, {pipeline_mode = #tpu.pipeline_mode<synchronous>, transform_indices = @transform_9, window_bounds = array<i64: 1, 32>}, {transform_indices = @transform_10, window_bounds = array<i64: 8, 16, 32>}]} {
    %c0 = arith.constant 0 : index
    %c0_0 = arith.constant 0 : index
    %c0_1 = arith.constant 0 : index
    %0 = vector.load %arg1[%c0, %c0_0, %c0_1] : memref<8x16x32xbf16, #tpu.memory_space<vmem>>, vector<8x16x32xbf16>
    %1 = vector.shape_cast %0 : vector<8x16x32xbf16> to vector<128x32xbf16>
    %c0_2 = arith.constant 0 : index
    %c0_3 = arith.constant 0 : index
    %c0_4 = arith.constant 0 : index
    %2 = vector.load %arg2[%c0_2, %c0_3, %c0_4] : memref<4x32x8xbf16, #tpu.memory_space<vmem>>, vector<1x32x8xbf16>
    %3 = vector.shape_cast %2 : vector<1x32x8xbf16> to vector<32x8xbf16>
    %cst = arith.constant dense<0.000000e+00> : vector<128x8xf32>
    %4 = tpu.matmul %1, %3, %cst {dimension_numbers = #tpu.dot_dimension_numbers<[1], [0], [0], [1], [0, 0, 1, 1], [], []>} : vector<128x32xbf16>, vector<32x8xbf16>, vector<128x8xf32> -> vector<128x8xf32>
    %c0_5 = arith.constant 0 : index
    %c0_6 = arith.constant 0 : index
    %c0_7 = arith.constant 0 : index
    %5 = vector.load %arg3[%c0_5, %c0_6, %c0_7] : memref<4x1x8xf32, #tpu.memory_space<vmem>>, vector<1x1x8xf32>
    %6 = vector.shape_cast %5 : vector<1x1x8xf32> to vector<1x8xf32>
    %7 = vector.broadcast %6 : vector<1x8xf32> to vector<128x8xf32>
    %8 = arith.addf %4, %7 : vector<128x8xf32>
    %c0_8 = arith.constant 0 : index
    %c0_9 = arith.constant 0 : index
    %c0_10 = arith.constant 0 : index
    %9 = vector.load %arg4[%c0_8, %c0_9, %c0_10] : memref<4x32x8xbf16, #tpu.memory_space<vmem>>, vector<1x32x8xbf16>
    %10 = vector.shape_cast %9 : vector<1x32x8xbf16> to vector<32x8xbf16>
    %cst_11 = arith.constant dense<0.000000e+00> : vector<128x8xf32>
    %11 = tpu.matmul %1, %10, %cst_11 {dimension_numbers = #tpu.dot_dimension_numbers<[1], [0], [0], [1], [0, 0, 1, 1], [], []>} : vector<128x32xbf16>, vector<32x8xbf16>, vector<128x8xf32> -> vector<128x8xf32>
    %c0_12 = arith.constant 0 : index
    %c0_13 = arith.constant 0 : index
    %c0_14 = arith.constant 0 : index
    %12 = vector.load %arg5[%c0_12, %c0_13, %c0_14] : memref<4x1x8xf32, #tpu.memory_space<vmem>>, vector<1x1x8xf32>
    %13 = vector.shape_cast %12 : vector<1x1x8xf32> to vector<1x8xf32>
    %14 = vector.broadcast %13 : vector<1x8xf32> to vector<128x8xf32>
    %15 = arith.addf %11, %14 : vector<128x8xf32>
    %c0_15 = arith.constant 0 : index
    %c0_16 = arith.constant 0 : index
    %c0_17 = arith.constant 0 : index
    %16 = vector.load %arg6[%c0_15, %c0_16, %c0_17] : memref<4x32x8xbf16, #tpu.memory_space<vmem>>, vector<1x32x8xbf16>
    %17 = vector.shape_cast %16 : vector<1x32x8xbf16> to vector<32x8xbf16>
    %cst_18 = arith.constant dense<0.000000e+00> : vector<128x8xf32>
    %18 = tpu.matmul %1, %17, %cst_18 {dimension_numbers = #tpu.dot_dimension_numbers<[1], [0], [0], [1], [0, 0, 1, 1], [], []>} : vector<128x32xbf16>, vector<32x8xbf16>, vector<128x8xf32> -> vector<128x8xf32>
    %c0_19 = arith.constant 0 : index
    %c0_20 = arith.constant 0 : index
    %c0_21 = arith.constant 0 : index
    %19 = vector.load %arg7[%c0_19, %c0_20, %c0_21] : memref<4x1x8xf32, #tpu.memory_space<vmem>>, vector<1x1x8xf32>
    %20 = vector.shape_cast %19 : vector<1x1x8xf32> to vector<1x8xf32>
    %21 = vector.broadcast %20 : vector<1x8xf32> to vector<128x8xf32>
    %22 = arith.addf %18, %21 : vector<128x8xf32>
    %23 = vector.shape_cast %8 : vector<128x8xf32> to vector<8x16x8xf32>
    %24 = arith.truncf %23 : vector<8x16x8xf32> to vector<8x16x8xbf16>
    %25 = vector.shape_cast %15 : vector<128x8xf32> to vector<8x16x8xf32>
    %26 = arith.truncf %25 : vector<8x16x8xf32> to vector<8x16x8xbf16>
    %27 = vector.shape_cast %22 : vector<128x8xf32> to vector<8x16x8xf32>
    %28 = arith.truncf %27 : vector<8x16x8xf32> to vector<8x16x8xbf16>
    "tpu.trace_start"() <{level = 10 : i32, message = "bnd,bmd->bnm"}> : () -> ()
    %cst_22 = arith.constant dense<0.000000e+00> : vector<8x16x16xf32>
    %29 = tpu.matmul %24, %26, %cst_22 {dimension_numbers = #tpu.dot_dimension_numbers<[2], [2], [1], [1], [0, 0, 0, 1, 1, 1], [0], [0]>} : vector<8x16x8xbf16>, vector<8x16x8xbf16>, vector<8x16x16xf32> -> vector<8x16x16xf32>
    "tpu.trace_stop"() : () -> ()
    %c0_23 = arith.constant 0 : index
    %c0_24 = arith.constant 0 : index
    %c0_25 = arith.constant 0 : index
    %30 = vector.load %arg8[%c0_23, %c0_24, %c0_25] : memref<4x16x16xf32, #tpu.memory_space<vmem>>, vector<1x16x16xf32>
    %31 = vector.shape_cast %30 : vector<1x16x16xf32> to vector<16x16xf32>
    %32 = vector.shape_cast %31 : vector<16x16xf32> to vector<1x16x16xf32>
    %33 = vector.broadcast %32 : vector<1x16x16xf32> to vector<8x16x16xf32>
    %34 = arith.addf %29, %33 : vector<8x16x16xf32>
    %cst_26 = arith.constant dense<0xFF800000> : vector<8x16xf32>
    %35 = vector.multi_reduction <maximumf>, %34, %cst_26 [2] : vector<8x16x16xf32> to vector<8x16xf32>
    %36 = vector.shape_cast %35 : vector<8x16xf32> to vector<8x16x1xf32>
    %37 = vector.broadcast %36 : vector<8x16x1xf32> to vector<8x16x16xf32>
    %38 = arith.subf %34, %37 : vector<8x16x16xf32>
    %39 = math.exp %38 : vector<8x16x16xf32>
    %cst_27 = arith.constant dense<0.000000e+00> : vector<8x16xf32>
    %40 = vector.multi_reduction <add>, %39, %cst_27 [2] : vector<8x16x16xf32> to vector<8x16xf32>
    %41 = vector.shape_cast %40 : vector<8x16xf32> to vector<8x16x1xf32>
    %42 = tpu.reciprocal %41 {approx = true} : vector<8x16x1xf32> -> vector<8x16x1xf32>
    %43 = vector.broadcast %42 : vector<8x16x1xf32> to vector<8x16x16xf32>
    %44 = arith.mulf %39, %43 : vector<8x16x16xf32>
    %45 = arith.truncf %44 : vector<8x16x16xf32> to vector<8x16x16xbf16>
    "tpu.trace_start"() <{level = 10 : i32, message = "bnm,bmd->bnd"}> : () -> ()
    %cst_28 = arith.constant dense<0.000000e+00> : vector<8x16x8xf32>
    %46 = tpu.matmul %45, %28, %cst_28 {dimension_numbers = #tpu.dot_dimension_numbers<[2], [1], [1], [2], [0, 0, 0, 1, 1, 2], [0], [0]>} : vector<8x16x16xbf16>, vector<8x16x8xbf16>, vector<8x16x8xf32> -> vector<8x16x8xf32>
    "tpu.trace_stop"() : () -> ()
    %47 = vector.shape_cast %46 : vector<8x16x8xf32> to vector<128x8xf32>
    %48 = arith.truncf %47 : vector<128x8xf32> to vector<128x8xbf16>
    %c0_29 = arith.constant 0 : index
    %c0_30 = arith.constant 0 : index
    %c0_31 = arith.constant 0 : index
    %49 = vector.load %arg9[%c0_29, %c0_30, %c0_31] : memref<4x8x32xbf16, #tpu.memory_space<vmem>>, vector<1x8x32xbf16>
    %50 = vector.shape_cast %49 : vector<1x8x32xbf16> to vector<8x32xbf16>
    %cst_32 = arith.constant dense<0.000000e+00> : vector<128x32xf32>
    %51 = tpu.matmul %48, %50, %cst_32 {dimension_numbers = #tpu.dot_dimension_numbers<[1], [0], [0], [1], [0, 0, 1, 1], [], []>} : vector<128x8xbf16>, vector<8x32xbf16>, vector<128x32xf32> -> vector<128x32xf32>
    %c1 = arith.constant 1 : index
    %c0_33 = arith.constant 0 : index
    %c0_34 = arith.constant 0 : index
    %52 = vector.load %arg2[%c1, %c0_33, %c0_34] : memref<4x32x8xbf16, #tpu.memory_space<vmem>>, vector<1x32x8xbf16>
    %53 = vector.shape_cast %52 : vector<1x32x8xbf16> to vector<32x8xbf16>
    %cst_35 = arith.constant dense<0.000000e+00> : vector<128x8xf32>
    %54 = tpu.matmul %1, %53, %cst_35 {dimension_numbers = #tpu.dot_dimension_numbers<[1], [0], [0], [1], [0, 0, 1, 1], [], []>} : vector<128x32xbf16>, vector<32x8xbf16>, vector<128x8xf32> -> vector<128x8xf32>
    %c1_36 = arith.constant 1 : index
    %c0_37 = arith.constant 0 : index
    %c0_38 = arith.constant 0 : index
    %55 = vector.load %arg3[%c1_36, %c0_37, %c0_38] : memref<4x1x8xf32, #tpu.memory_space<vmem>>, vector<1x1x8xf32>
    %56 = vector.shape_cast %55 : vector<1x1x8xf32> to vector<1x8xf32>
    %57 = vector.broadcast %56 : vector<1x8xf32> to vector<128x8xf32>
    %58 = arith.addf %54, %57 : vector<128x8xf32>
    %c1_39 = arith.constant 1 : index
    %c0_40 = arith.constant 0 : index
    %c0_41 = arith.constant 0 : index
    %59 = vector.load %arg4[%c1_39, %c0_40, %c0_41] : memref<4x32x8xbf16, #tpu.memory_space<vmem>>, vector<1x32x8xbf16>
    %60 = vector.shape_cast %59 : vector<1x32x8xbf16> to vector<32x8xbf16>
    %cst_42 = arith.constant dense<0.000000e+00> : vector<128x8xf32>
    %61 = tpu.matmul %1, %60, %cst_42 {dimension_numbers = #tpu.dot_dimension_numbers<[1], [0], [0], [1], [0, 0, 1, 1], [], []>} : vector<128x32xbf16>, vector<32x8xbf16>, vector<128x8xf32> -> vector<128x8xf32>
    %c1_43 = arith.constant 1 : index
    %c0_44 = arith.constant 0 : index
    %c0_45 = arith.constant 0 : index
    %62 = vector.load %arg5[%c1_43, %c0_44, %c0_45] : memref<4x1x8xf32, #tpu.memory_space<vmem>>, vector<1x1x8xf32>
    %63 = vector.shape_cast %62 : vector<1x1x8xf32> to vector<1x8xf32>
    %64 = vector.broadcast %63 : vector<1x8xf32> to vector<128x8xf32>
    %65 = arith.addf %61, %64 : vector<128x8xf32>
    %c1_46 = arith.constant 1 : index
    %c0_47 = arith.constant 0 : index
    %c0_48 = arith.constant 0 : index
    %66 = vector.load %arg6[%c1_46, %c0_47, %c0_48] : memref<4x32x8xbf16, #tpu.memory_space<vmem>>, vector<1x32x8xbf16>
    %67 = vector.shape_cast %66 : vector<1x32x8xbf16> to vector<32x8xbf16>
    %cst_49 = arith.constant dense<0.000000e+00> : vector<128x8xf32>
    %68 = tpu.matmul %1, %67, %cst_49 {dimension_numbers = #tpu.dot_dimension_numbers<[1], [0], [0], [1], [0, 0, 1, 1], [], []>} : vector<128x32xbf16>, vector<32x8xbf16>, vector<128x8xf32> -> vector<128x8xf32>
    %c1_50 = arith.constant 1 : index
    %c0_51 = arith.constant 0 : index
    %c0_52 = arith.constant 0 : index
    %69 = vector.load %arg7[%c1_50, %c0_51, %c0_52] : memref<4x1x8xf32, #tpu.memory_space<vmem>>, vector<1x1x8xf32>
    %70 = vector.shape_cast %69 : vector<1x1x8xf32> to vector<1x8xf32>
    %71 = vector.broadcast %70 : vector<1x8xf32> to vector<128x8xf32>
    %72 = arith.addf %68, %71 : vector<128x8xf32>
    %73 = vector.shape_cast %58 : vector<128x8xf32> to vector<8x16x8xf32>
    %74 = arith.truncf %73 : vector<8x16x8xf32> to vector<8x16x8xbf16>
    %75 = vector.shape_cast %65 : vector<128x8xf32> to vector<8x16x8xf32>
    %76 = arith.truncf %75 : vector<8x16x8xf32> to vector<8x16x8xbf16>
    %77 = vector.shape_cast %72 : vector<128x8xf32> to vector<8x16x8xf32>
    %78 = arith.truncf %77 : vector<8x16x8xf32> to vector<8x16x8xbf16>
    "tpu.trace_start"() <{level = 10 : i32, message = "bnd,bmd->bnm"}> : () -> ()
    %cst_53 = arith.constant dense<0.000000e+00> : vector<8x16x16xf32>
    %79 = tpu.matmul %74, %76, %cst_53 {dimension_numbers = #tpu.dot_dimension_numbers<[2], [2], [1], [1], [0, 0, 0, 1, 1, 1], [0], [0]>} : vector<8x16x8xbf16>, vector<8x16x8xbf16>, vector<8x16x16xf32> -> vector<8x16x16xf32>
    "tpu.trace_stop"() : () -> ()
    %c1_54 = arith.constant 1 : index
    %c0_55 = arith.constant 0 : index
    %c0_56 = arith.constant 0 : index
    %80 = vector.load %arg8[%c1_54, %c0_55, %c0_56] : memref<4x16x16xf32, #tpu.memory_space<vmem>>, vector<1x16x16xf32>
    %81 = vector.shape_cast %80 : vector<1x16x16xf32> to vector<16x16xf32>
    %82 = vector.shape_cast %81 : vector<16x16xf32> to vector<1x16x16xf32>
    %83 = vector.broadcast %82 : vector<1x16x16xf32> to vector<8x16x16xf32>
    %84 = arith.addf %79, %83 : vector<8x16x16xf32>
    %cst_57 = arith.constant dense<0xFF800000> : vector<8x16xf32>
    %85 = vector.multi_reduction <maximumf>, %84, %cst_57 [2] : vector<8x16x16xf32> to vector<8x16xf32>
    %86 = vector.shape_cast %85 : vector<8x16xf32> to vector<8x16x1xf32>
    %87 = vector.broadcast %86 : vector<8x16x1xf32> to vector<8x16x16xf32>
    %88 = arith.subf %84, %87 : vector<8x16x16xf32>
    %89 = math.exp %88 : vector<8x16x16xf32>
    %cst_58 = arith.constant dense<0.000000e+00> : vector<8x16xf32>
    %90 = vector.multi_reduction <add>, %89, %cst_58 [2] : vector<8x16x16xf32> to vector<8x16xf32>
    %91 = vector.shape_cast %90 : vector<8x16xf32> to vector<8x16x1xf32>
    %92 = tpu.reciprocal %91 {approx = true} : vector<8x16x1xf32> -> vector<8x16x1xf32>
    %93 = vector.broadcast %92 : vector<8x16x1xf32> to vector<8x16x16xf32>
    %94 = arith.mulf %89, %93 : vector<8x16x16xf32>
    %95 = arith.truncf %94 : vector<8x16x16xf32> to vector<8x16x16xbf16>
    "tpu.trace_start"() <{level = 10 : i32, message = "bnm,bmd->bnd"}> : () -> ()
    %cst_59 = arith.constant dense<0.000000e+00> : vector<8x16x8xf32>
    %96 = tpu.matmul %95, %78, %cst_59 {dimension_numbers = #tpu.dot_dimension_numbers<[2], [1], [1], [2], [0, 0, 0, 1, 1, 2], [0], [0]>} : vector<8x16x16xbf16>, vector<8x16x8xbf16>, vector<8x16x8xf32> -> vector<8x16x8xf32>
    "tpu.trace_stop"() : () -> ()
    %97 = vector.shape_cast %96 : vector<8x16x8xf32> to vector<128x8xf32>
    %98 = arith.truncf %97 : vector<128x8xf32> to vector<128x8xbf16>
    %c1_60 = arith.constant 1 : index
    %c0_61 = arith.constant 0 : index
    %c0_62 = arith.constant 0 : index
    %99 = vector.load %arg9[%c1_60, %c0_61, %c0_62] : memref<4x8x32xbf16, #tpu.memory_space<vmem>>, vector<1x8x32xbf16>
    %100 = vector.shape_cast %99 : vector<1x8x32xbf16> to vector<8x32xbf16>
    %cst_63 = arith.constant dense<0.000000e+00> : vector<128x32xf32>
    %101 = tpu.matmul %98, %100, %cst_63 {dimension_numbers = #tpu.dot_dimension_numbers<[1], [0], [0], [1], [0, 0, 1, 1], [], []>} : vector<128x8xbf16>, vector<8x32xbf16>, vector<128x32xf32> -> vector<128x32xf32>
    %102 = arith.addf %51, %101 : vector<128x32xf32>
    %c2 = arith.constant 2 : index
    %c0_64 = arith.constant 0 : index
    %c0_65 = arith.constant 0 : index
    %103 = vector.load %arg2[%c2, %c0_64, %c0_65] : memref<4x32x8xbf16, #tpu.memory_space<vmem>>, vector<1x32x8xbf16>
    %104 = vector.shape_cast %103 : vector<1x32x8xbf16> to vector<32x8xbf16>
    %cst_66 = arith.constant dense<0.000000e+00> : vector<128x8xf32>
    %105 = tpu.matmul %1, %104, %cst_66 {dimension_numbers = #tpu.dot_dimension_numbers<[1], [0], [0], [1], [0, 0, 1, 1], [], []>} : vector<128x32xbf16>, vector<32x8xbf16>, vector<128x8xf32> -> vector<128x8xf32>
    %c2_67 = arith.constant 2 : index
    %c0_68 = arith.constant 0 : index
    %c0_69 = arith.constant 0 : index
    %106 = vector.load %arg3[%c2_67, %c0_68, %c0_69] : memref<4x1x8xf32, #tpu.memory_space<vmem>>, vector<1x1x8xf32>
    %107 = vector.shape_cast %106 : vector<1x1x8xf32> to vector<1x8xf32>
    %108 = vector.broadcast %107 : vector<1x8xf32> to vector<128x8xf32>
    %109 = arith.addf %105, %108 : vector<128x8xf32>
    %c2_70 = arith.constant 2 : index
    %c0_71 = arith.constant 0 : index
    %c0_72 = arith.constant 0 : index
    %110 = vector.load %arg4[%c2_70, %c0_71, %c0_72] : memref<4x32x8xbf16, #tpu.memory_space<vmem>>, vector<1x32x8xbf16>
    %111 = vector.shape_cast %110 : vector<1x32x8xbf16> to vector<32x8xbf16>
    %cst_73 = arith.constant dense<0.000000e+00> : vector<128x8xf32>
    %112 = tpu.matmul %1, %111, %cst_73 {dimension_numbers = #tpu.dot_dimension_numbers<[1], [0], [0], [1], [0, 0, 1, 1], [], []>} : vector<128x32xbf16>, vector<32x8xbf16>, vector<128x8xf32> -> vector<128x8xf32>
    %c2_74 = arith.constant 2 : index
    %c0_75 = arith.constant 0 : index
    %c0_76 = arith.constant 0 : index
    %113 = vector.load %arg5[%c2_74, %c0_75, %c0_76] : memref<4x1x8xf32, #tpu.memory_space<vmem>>, vector<1x1x8xf32>
    %114 = vector.shape_cast %113 : vector<1x1x8xf32> to vector<1x8xf32>
    %115 = vector.broadcast %114 : vector<1x8xf32> to vector<128x8xf32>
    %116 = arith.addf %112, %115 : vector<128x8xf32>
    %c2_77 = arith.constant 2 : index
    %c0_78 = arith.constant 0 : index
    %c0_79 = arith.constant 0 : index
    %117 = vector.load %arg6[%c2_77, %c0_78, %c0_79] : memref<4x32x8xbf16, #tpu.memory_space<vmem>>, vector<1x32x8xbf16>
    %118 = vector.shape_cast %117 : vector<1x32x8xbf16> to vector<32x8xbf16>
    %cst_80 = arith.constant dense<0.000000e+00> : vector<128x8xf32>
    %119 = tpu.matmul %1, %118, %cst_80 {dimension_numbers = #tpu.dot_dimension_numbers<[1], [0], [0], [1], [0, 0, 1, 1], [], []>} : vector<128x32xbf16>, vector<32x8xbf16>, vector<128x8xf32> -> vector<128x8xf32>
    %c2_81 = arith.constant 2 : index
    %c0_82 = arith.constant 0 : index
    %c0_83 = arith.constant 0 : index
    %120 = vector.load %arg7[%c2_81, %c0_82, %c0_83] : memref<4x1x8xf32, #tpu.memory_space<vmem>>, vector<1x1x8xf32>
    %121 = vector.shape_cast %120 : vector<1x1x8xf32> to vector<1x8xf32>
    %122 = vector.broadcast %121 : vector<1x8xf32> to vector<128x8xf32>
    %123 = arith.addf %119, %122 : vector<128x8xf32>
    %124 = vector.shape_cast %109 : vector<128x8xf32> to vector<8x16x8xf32>
    %125 = arith.truncf %124 : vector<8x16x8xf32> to vector<8x16x8xbf16>
    %126 = vector.shape_cast %116 : vector<128x8xf32> to vector<8x16x8xf32>
    %127 = arith.truncf %126 : vector<8x16x8xf32> to vector<8x16x8xbf16>
    %128 = vector.shape_cast %123 : vector<128x8xf32> to vector<8x16x8xf32>
    %129 = arith.truncf %128 : vector<8x16x8xf32> to vector<8x16x8xbf16>
    "tpu.trace_start"() <{level = 10 : i32, message = "bnd,bmd->bnm"}> : () -> ()
    %cst_84 = arith.constant dense<0.000000e+00> : vector<8x16x16xf32>
    %130 = tpu.matmul %125, %127, %cst_84 {dimension_numbers = #tpu.dot_dimension_numbers<[2], [2], [1], [1], [0, 0, 0, 1, 1, 1], [0], [0]>} : vector<8x16x8xbf16>, vector<8x16x8xbf16>, vector<8x16x16xf32> -> vector<8x16x16xf32>
    "tpu.trace_stop"() : () -> ()
    %c2_85 = arith.constant 2 : index
    %c0_86 = arith.constant 0 : index
    %c0_87 = arith.constant 0 : index
    %131 = vector.load %arg8[%c2_85, %c0_86, %c0_87] : memref<4x16x16xf32, #tpu.memory_space<vmem>>, vector<1x16x16xf32>
    %132 = vector.shape_cast %131 : vector<1x16x16xf32> to vector<16x16xf32>
    %133 = vector.shape_cast %132 : vector<16x16xf32> to vector<1x16x16xf32>
    %134 = vector.broadcast %133 : vector<1x16x16xf32> to vector<8x16x16xf32>
    %135 = arith.addf %130, %134 : vector<8x16x16xf32>
    %cst_88 = arith.constant dense<0xFF800000> : vector<8x16xf32>
    %136 = vector.multi_reduction <maximumf>, %135, %cst_88 [2] : vector<8x16x16xf32> to vector<8x16xf32>
    %137 = vector.shape_cast %136 : vector<8x16xf32> to vector<8x16x1xf32>
    %138 = vector.broadcast %137 : vector<8x16x1xf32> to vector<8x16x16xf32>
    %139 = arith.subf %135, %138 : vector<8x16x16xf32>
    %140 = math.exp %139 : vector<8x16x16xf32>
    %cst_89 = arith.constant dense<0.000000e+00> : vector<8x16xf32>
    %141 = vector.multi_reduction <add>, %140, %cst_89 [2] : vector<8x16x16xf32> to vector<8x16xf32>
    %142 = vector.shape_cast %141 : vector<8x16xf32> to vector<8x16x1xf32>
    %143 = tpu.reciprocal %142 {approx = true} : vector<8x16x1xf32> -> vector<8x16x1xf32>
    %144 = vector.broadcast %143 : vector<8x16x1xf32> to vector<8x16x16xf32>
    %145 = arith.mulf %140, %144 : vector<8x16x16xf32>
    %146 = arith.truncf %145 : vector<8x16x16xf32> to vector<8x16x16xbf16>
    "tpu.trace_start"() <{level = 10 : i32, message = "bnm,bmd->bnd"}> : () -> ()
    %cst_90 = arith.constant dense<0.000000e+00> : vector<8x16x8xf32>
    %147 = tpu.matmul %146, %129, %cst_90 {dimension_numbers = #tpu.dot_dimension_numbers<[2], [1], [1], [2], [0, 0, 0, 1, 1, 2], [0], [0]>} : vector<8x16x16xbf16>, vector<8x16x8xbf16>, vector<8x16x8xf32> -> vector<8x16x8xf32>
    "tpu.trace_stop"() : () -> ()
    %148 = vector.shape_cast %147 : vector<8x16x8xf32> to vector<128x8xf32>
    %149 = arith.truncf %148 : vector<128x8xf32> to vector<128x8xbf16>
    %c2_91 = arith.constant 2 : index
    %c0_92 = arith.constant 0 : index
    %c0_93 = arith.constant 0 : index
    %150 = vector.load %arg9[%c2_91, %c0_92, %c0_93] : memref<4x8x32xbf16, #tpu.memory_space<vmem>>, vector<1x8x32xbf16>
    %151 = vector.shape_cast %150 : vector<1x8x32xbf16> to vector<8x32xbf16>
    %cst_94 = arith.constant dense<0.000000e+00> : vector<128x32xf32>
    %152 = tpu.matmul %149, %151, %cst_94 {dimension_numbers = #tpu.dot_dimension_numbers<[1], [0], [0], [1], [0, 0, 1, 1], [], []>} : vector<128x8xbf16>, vector<8x32xbf16>, vector<128x32xf32> -> vector<128x32xf32>
    %153 = arith.addf %102, %152 : vector<128x32xf32>
    %c3 = arith.constant 3 : index
    %c0_95 = arith.constant 0 : index
    %c0_96 = arith.constant 0 : index
    %154 = vector.load %arg2[%c3, %c0_95, %c0_96] : memref<4x32x8xbf16, #tpu.memory_space<vmem>>, vector<1x32x8xbf16>
    %155 = vector.shape_cast %154 : vector<1x32x8xbf16> to vector<32x8xbf16>
    %cst_97 = arith.constant dense<0.000000e+00> : vector<128x8xf32>
    %156 = tpu.matmul %1, %155, %cst_97 {dimension_numbers = #tpu.dot_dimension_numbers<[1], [0], [0], [1], [0, 0, 1, 1], [], []>} : vector<128x32xbf16>, vector<32x8xbf16>, vector<128x8xf32> -> vector<128x8xf32>
    %c3_98 = arith.constant 3 : index
    %c0_99 = arith.constant 0 : index
    %c0_100 = arith.constant 0 : index
    %157 = vector.load %arg3[%c3_98, %c0_99, %c0_100] : memref<4x1x8xf32, #tpu.memory_space<vmem>>, vector<1x1x8xf32>
    %158 = vector.shape_cast %157 : vector<1x1x8xf32> to vector<1x8xf32>
    %159 = vector.broadcast %158 : vector<1x8xf32> to vector<128x8xf32>
    %160 = arith.addf %156, %159 : vector<128x8xf32>
    %c3_101 = arith.constant 3 : index
    %c0_102 = arith.constant 0 : index
    %c0_103 = arith.constant 0 : index
    %161 = vector.load %arg4[%c3_101, %c0_102, %c0_103] : memref<4x32x8xbf16, #tpu.memory_space<vmem>>, vector<1x32x8xbf16>
    %162 = vector.shape_cast %161 : vector<1x32x8xbf16> to vector<32x8xbf16>
    %cst_104 = arith.constant dense<0.000000e+00> : vector<128x8xf32>
    %163 = tpu.matmul %1, %162, %cst_104 {dimension_numbers = #tpu.dot_dimension_numbers<[1], [0], [0], [1], [0, 0, 1, 1], [], []>} : vector<128x32xbf16>, vector<32x8xbf16>, vector<128x8xf32> -> vector<128x8xf32>
    %c3_105 = arith.constant 3 : index
    %c0_106 = arith.constant 0 : index
    %c0_107 = arith.constant 0 : index
    %164 = vector.load %arg5[%c3_105, %c0_106, %c0_107] : memref<4x1x8xf32, #tpu.memory_space<vmem>>, vector<1x1x8xf32>
    %165 = vector.shape_cast %164 : vector<1x1x8xf32> to vector<1x8xf32>
    %166 = vector.broadcast %165 : vector<1x8xf32> to vector<128x8xf32>
    %167 = arith.addf %163, %166 : vector<128x8xf32>
    %c3_108 = arith.constant 3 : index
    %c0_109 = arith.constant 0 : index
    %c0_110 = arith.constant 0 : index
    %168 = vector.load %arg6[%c3_108, %c0_109, %c0_110] : memref<4x32x8xbf16, #tpu.memory_space<vmem>>, vector<1x32x8xbf16>
    %169 = vector.shape_cast %168 : vector<1x32x8xbf16> to vector<32x8xbf16>
    %cst_111 = arith.constant dense<0.000000e+00> : vector<128x8xf32>
    %170 = tpu.matmul %1, %169, %cst_111 {dimension_numbers = #tpu.dot_dimension_numbers<[1], [0], [0], [1], [0, 0, 1, 1], [], []>} : vector<128x32xbf16>, vector<32x8xbf16>, vector<128x8xf32> -> vector<128x8xf32>
    %c3_112 = arith.constant 3 : index
    %c0_113 = arith.constant 0 : index
    %c0_114 = arith.constant 0 : index
    %171 = vector.load %arg7[%c3_112, %c0_113, %c0_114] : memref<4x1x8xf32, #tpu.memory_space<vmem>>, vector<1x1x8xf32>
    %172 = vector.shape_cast %171 : vector<1x1x8xf32> to vector<1x8xf32>
    %173 = vector.broadcast %172 : vector<1x8xf32> to vector<128x8xf32>
    %174 = arith.addf %170, %173 : vector<128x8xf32>
    %175 = vector.shape_cast %160 : vector<128x8xf32> to vector<8x16x8xf32>
    %176 = arith.truncf %175 : vector<8x16x8xf32> to vector<8x16x8xbf16>
    %177 = vector.shape_cast %167 : vector<128x8xf32> to vector<8x16x8xf32>
    %178 = arith.truncf %177 : vector<8x16x8xf32> to vector<8x16x8xbf16>
    %179 = vector.shape_cast %174 : vector<128x8xf32> to vector<8x16x8xf32>
    %180 = arith.truncf %179 : vector<8x16x8xf32> to vector<8x16x8xbf16>
    "tpu.trace_start"() <{level = 10 : i32, message = "bnd,bmd->bnm"}> : () -> ()
    %cst_115 = arith.constant dense<0.000000e+00> : vector<8x16x16xf32>
    %181 = tpu.matmul %176, %178, %cst_115 {dimension_numbers = #tpu.dot_dimension_numbers<[2], [2], [1], [1], [0, 0, 0, 1, 1, 1], [0], [0]>} : vector<8x16x8xbf16>, vector<8x16x8xbf16>, vector<8x16x16xf32> -> vector<8x16x16xf32>
    "tpu.trace_stop"() : () -> ()
    %c3_116 = arith.constant 3 : index
    %c0_117 = arith.constant 0 : index
    %c0_118 = arith.constant 0 : index
    %182 = vector.load %arg8[%c3_116, %c0_117, %c0_118] : memref<4x16x16xf32, #tpu.memory_space<vmem>>, vector<1x16x16xf32>
    %183 = vector.shape_cast %182 : vector<1x16x16xf32> to vector<16x16xf32>
    %184 = vector.shape_cast %183 : vector<16x16xf32> to vector<1x16x16xf32>
    %185 = vector.broadcast %184 : vector<1x16x16xf32> to vector<8x16x16xf32>
    %186 = arith.addf %181, %185 : vector<8x16x16xf32>
    %cst_119 = arith.constant dense<0xFF800000> : vector<8x16xf32>
    %187 = vector.multi_reduction <maximumf>, %186, %cst_119 [2] : vector<8x16x16xf32> to vector<8x16xf32>
    %188 = vector.shape_cast %187 : vector<8x16xf32> to vector<8x16x1xf32>
    %189 = vector.broadcast %188 : vector<8x16x1xf32> to vector<8x16x16xf32>
    %190 = arith.subf %186, %189 : vector<8x16x16xf32>
    %191 = math.exp %190 : vector<8x16x16xf32>
    %cst_120 = arith.constant dense<0.000000e+00> : vector<8x16xf32>
    %192 = vector.multi_reduction <add>, %191, %cst_120 [2] : vector<8x16x16xf32> to vector<8x16xf32>
    %193 = vector.shape_cast %192 : vector<8x16xf32> to vector<8x16x1xf32>
    %194 = tpu.reciprocal %193 {approx = true} : vector<8x16x1xf32> -> vector<8x16x1xf32>
    %195 = vector.broadcast %194 : vector<8x16x1xf32> to vector<8x16x16xf32>
    %196 = arith.mulf %191, %195 : vector<8x16x16xf32>
    %197 = arith.truncf %196 : vector<8x16x16xf32> to vector<8x16x16xbf16>
    "tpu.trace_start"() <{level = 10 : i32, message = "bnm,bmd->bnd"}> : () -> ()
    %cst_121 = arith.constant dense<0.000000e+00> : vector<8x16x8xf32>
    %198 = tpu.matmul %197, %180, %cst_121 {dimension_numbers = #tpu.dot_dimension_numbers<[2], [1], [1], [2], [0, 0, 0, 1, 1, 2], [0], [0]>} : vector<8x16x16xbf16>, vector<8x16x8xbf16>, vector<8x16x8xf32> -> vector<8x16x8xf32>
    "tpu.trace_stop"() : () -> ()
    %199 = vector.shape_cast %198 : vector<8x16x8xf32> to vector<128x8xf32>
    %200 = arith.truncf %199 : vector<128x8xf32> to vector<128x8xbf16>
    %c3_122 = arith.constant 3 : index
    %c0_123 = arith.constant 0 : index
    %c0_124 = arith.constant 0 : index
    %201 = vector.load %arg9[%c3_122, %c0_123, %c0_124] : memref<4x8x32xbf16, #tpu.memory_space<vmem>>, vector<1x8x32xbf16>
    %202 = vector.shape_cast %201 : vector<1x8x32xbf16> to vector<8x32xbf16>
    %cst_125 = arith.constant dense<0.000000e+00> : vector<128x32xf32>
    %203 = tpu.matmul %200, %202, %cst_125 {dimension_numbers = #tpu.dot_dimension_numbers<[1], [0], [0], [1], [0, 0, 1, 1], [], []>} : vector<128x8xbf16>, vector<8x32xbf16>, vector<128x32xf32> -> vector<128x32xf32>
    %204 = arith.addf %153, %203 : vector<128x32xf32>
    %c0_126 = arith.constant 0 : index
    %c0_127 = arith.constant 0 : index
    %205 = vector.load %arg10[%c0_126, %c0_127] : memref<1x32xf32, #tpu.memory_space<vmem>>, vector<1x32xf32>
    %206 = vector.broadcast %205 : vector<1x32xf32> to vector<128x32xf32>
    %207 = arith.addf %204, %206 : vector<128x32xf32>
    %208 = vector.shape_cast %207 : vector<128x32xf32> to vector<8x16x32xf32>
    %c0_128 = arith.constant 0 : index
    %c0_129 = arith.constant 0 : index
    %c0_130 = arith.constant 0 : index
    %209 = vector.load %arg11[%c0_128, %c0_129, %c0_130] : memref<8x16x32xf32, #tpu.memory_space<vmem>>, vector<8x16x32xf32>
    tpu.vector_store %arg11[%c0_128, %c0_129, %c0_130], %208 {strides = array<i32>} : memref<8x16x32xf32, #tpu.memory_space<vmem>>, vector<8x16x32xf32>,
    return
  }
  func.func @transform_0(%arg0: i32) -> (i32, i32, i32) {
    %c0_i32 = arith.constant 0 : i32
    %c0_i32_0 = arith.constant 0 : i32
    %c0_i32_1 = arith.constant 0 : i32
    return %arg0, %c0_i32, %c0_i32_0 : i32, i32, i32
  }
  func.func @transform_1(%arg0: i32) -> (i32, i32, i32) {
    %c0_i32 = arith.constant 0 : i32
    %c0_i32_0 = arith.constant 0 : i32
    %c0_i32_1 = arith.constant 0 : i32
    %c0_i32_2 = arith.constant 0 : i32
    return %c0_i32, %c0_i32_0, %c0_i32_1 : i32, i32, i32
  }
  func.func @transform_2(%arg0: i32) -> (i32, i32, i32) {
    %c0_i32 = arith.constant 0 : i32
    %c0_i32_0 = arith.constant 0 : i32
    %c0_i32_1 = arith.constant 0 : i32
    %c0_i32_2 = arith.constant 0 : i32
    return %c0_i32, %c0_i32_0, %c0_i32_1 : i32, i32, i32
  }
  func.func @transform_3(%arg0: i32) -> (i32, i32, i32) {
    %c0_i32 = arith.constant 0 : i32
    %c0_i32_0 = arith.constant 0 : i32
    %c0_i32_1 = arith.constant 0 : i32
    %c0_i32_2 = arith.constant 0 : i32
    return %c0_i32, %c0_i32_0, %c0_i32_1 : i32, i32, i32
  }
  func.func @transform_4(%arg0: i32) -> (i32, i32, i32) {
    %c0_i32 = arith.constant 0 : i32
    %c0_i32_0 = arith.constant 0 : i32
    %c0_i32_1 = arith.constant 0 : i32
    %c0_i32_2 = arith.constant 0 : i32
    return %c0_i32, %c0_i32_0, %c0_i32_1 : i32, i32, i32
  }
  func.func @transform_5(%arg0: i32) -> (i32, i32, i32) {
    %c0_i32 = arith.constant 0 : i32
    %c0_i32_0 = arith.constant 0 : i32
    %c0_i32_1 = arith.constant 0 : i32
    %c0_i32_2 = arith.constant 0 : i32
    return %c0_i32, %c0_i32_0, %c0_i32_1 : i32, i32, i32
  }
  func.func @transform_6(%arg0: i32) -> (i32, i32, i32) {
    %c0_i32 = arith.constant 0 : i32
    %c0_i32_0 = arith.constant 0 : i32
    %c0_i32_1 = arith.constant 0 : i32
    %c0_i32_2 = arith.constant 0 : i32
    return %c0_i32, %c0_i32_0, %c0_i32_1 : i32, i32, i32
  }
  func.func @transform_7(%arg0: i32) -> (i32, i32, i32) {
    %c0_i32 = arith.constant 0 : i32
    %c0_i32_0 = arith.constant 0 : i32
    %c0_i32_1 = arith.constant 0 : i32
    %c0_i32_2 = arith.constant 0 : i32
    return %c0_i32, %c0_i32_0, %c0_i32_1 : i32, i32, i32
  }
  func.func @transform_8(%arg0: i32) -> (i32, i32, i32) {
    %c0_i32 = arith.constant 0 : i32
    %c0_i32_0 = arith.constant 0 : i32
    %c0_i32_1 = arith.constant 0 : i32
    %c0_i32_2 = arith.constant 0 : i32
    return %c0_i32, %c0_i32_0, %c0_i32_1 : i32, i32, i32
  }
  func.func @transform_9(%arg0: i32) -> (i32, i32) {
    %c0_i32 = arith.constant 0 : i32
    %c0_i32_0 = arith.constant 0 : i32
    %c0_i32_1 = arith.constant 0 : i32
    return %c0_i32, %c0_i32_0 : i32, i32
  }
  func.func @transform_10(%arg0: i32) -> (i32, i32, i32) {
    %c0_i32 = arith.constant 0 : i32
    %c0_i32_0 = arith.constant 0 : i32
    %c0_i32_1 = arith.constant 0 : i32
    return %arg0, %c0_i32, %c0_i32_0 : i32, i32, i32
  }
}

</mosaic_0001>

<bundles_post_ra>
// kernel: tpu_custom_call.1
= control target key start
LH: loop header
LB: loop body
LE: loop exit
PB: predicated region body
PF: predicated region fallthrough
CT: control target
= control target key end

     0   :  { %15 = vsyncpa [#allocation3], 0  ;;  %s10327_s0 = inlined_call_operand.vmem [shape: bf16[16,16,32], index: 0, kind: input, shape index: {}]   ;;  %s10328_s1 = inlined_call_operand.vmem [shape: bf16[4,32,8], index: 1, kind: input, shape index: {}]   ;;  %s10329_s2 = inlined_call_operand.vmem [shape: f32[4,1,8], index: 2, kind: input, shape index: {}]   ;;  %s10330_s3 = inlined_call_operand.vmem [shape: bf16[4,32,8], index: 3, kind: input, shape index: {}]   ;;  %s10331_s4 = inlined_call_operand.vmem [shape: f32[4,1,8], index: 4, kind: input, shape index: {}]   ;;  %s10332_s5 = inlined_call_operand.vmem [shape: bf16[4,32,8], index: 5, kind: input, shape index: {}]   ;;  %s10333_s6 = inlined_call_operand.vmem [shape: f32[4,1,8], index: 6, kind: input, shape index: {}]   ;;  %s10334_s7 = inlined_call_operand.vmem [shape: f32[4,16,16], index: 7, kind: input, shape index: {}]   ;;  %s10335_s8 = inlined_call_operand.vmem [shape: bf16[4,8,32], index: 8, kind: input, shape index: {}]   ;;  %s10336_s9 = inlined_call_operand.vmem [shape: f32[1,32], index: 9, kind: input, shape index: {}]   ;;  %s10337_s10 = inlined_call_operand.hbm [shape: f32[16,16,32], index: 10, kind: output, shape index: {}]  }
   0x1   :  { %17 = vsyncpa [#allocation3 + $0x1], 0  ;;  %s8168_s13 = smov 0   ;;  %s8170_s14 = smov 0  }
   0x2   :  { %s8172_s15 = smov 0   ;;  %s8174_s16 = smov 0  }
   0x3 LB: > { %s8189_s17 = sadd.s32 4294967295, %s8106_s16   ;;  %s6345_s18 = sadd.s32 4294967294, %s8106_s16   ;;  %s8106_s16 = sphi %s8174_s16, %s10352_s16   ;;  %s8102_s15 = sphi %s8172_s15, %s10351_s15   ;;  %s8098_s14 = sphi %s8170_s14, %s10350_s14   ;;  %s8094_s13 = sphi %s8168_s13, %s10349_s13  }
   0x4   : > { %s8193_s19 = sadd.s32 1, %s8106_s16   ;;  %s245_s20 = sadd.s32 1, %s8102_s15 }
   0x5   : > { %s242_s21 = ssub.s32 %s8106_s16, %s8193_s19  ;;  %p255_p0 = scmp.ne.s32.totalorder %s8102_s15, %s8098_s14 }
   0x6   : > { %p243_p1 = scmp.eq.s32.totalorder %s242_s21, 0  ;;  %p256_p2 = scmp.eq.s32.totalorder %s8189_s17, 1 }
   0x7   : > { %p261_p3 = scmp.ne.s32.totalorder %s8098_s14, %s8094_s13  ;;  %p262_p4 = scmp.eq.s32.totalorder %s6345_s18, 1 }
   0x8   : > { %s8204_s22 = scalar_select %p243_p1, %s8102_s15, %s245_s20  }
   0x9   : > { %p8206_p5 = por %p256_p2, %p255_p0  ;;  %p8210_p6 = por %p262_p4, %p261_p3 }
   0xa   : > { %p6348_p7 = scmp.ge.s32.totalorder %s8106_s16, 1  ;;  %p317_p8 = scmp.lt.s32.totalorder %s8106_s16, 3 }
   0xc   : > { %p318_p9 = pnand %p6348_p7, %p317_p8 }
   0xd   : > { %v7732_v0 = vld [vmem:[%s10328_s1] sm:$0xff] (!%p318_p9)   ;;  %s6350_s27 = sshll.u32 (!%p318_p9), %s8189_s17, 3  ;;  %v7733_v1 = vld [vmem:[%s10328_s1 + $0x8] sm:$0xff] (!%p318_p9)   ;;  %vm444_vm0 = vcmask (!%p318_p9), 261120   ;;  %v8108_v14 = vmov (!%p318_p9), 0.0   ;;  %vm8109_vm1 = vmmov (!%p318_p9), 0  }
   0xe   : > { %321 = sbr.rel (%p318_p9) target bundleno = 3952 (0xf70), region = 60  ;;  %p357_p10 = scmp.lt.s32.totalorder (!%p318_p9), %s6350_s27, 15  ;;  %7633 = vmatprep.subr.bf16.mxu1 (!%p318_p9), %v7732_v0  ;;  %6937 = vmatprep.subr.bf16.mxu0 (!%p318_p9), %v7732_v0  ;;  %v7738_v2 = vld [vmem:[%s10330_s3] sm:$0xff] (!%p318_p9)   ;;  %v7739_v3 = vld [vmem:[%s10330_s3 + $0x8] sm:$0xff] (!%p318_p9)   ;;  %vm832_vm2 = vcmask (!%p318_p9), 64512   ;;  %vm1209_vm3 = vcmask (!%p318_p9), 130048  }
   0xf   : > { %7635 = vmatpush3.bf16.msra.mxu1 (!%p318_p9), %v7732_v0  ;;  %6938 = vmatpush3.bf16.msra.mxu0 (!%p318_p9), %v7732_v0  ;;  %v7744_v12 = vld [vmem:[%s10332_s5] sm:$0xff] (!%p318_p9)   ;;  %v7745_v13 = vld [vmem:[%s10332_s5 + $0x8] sm:$0xff] (!%p318_p9)   ;;  %vm3094_vm4 = vcmask (!%p318_p9), 1043456   ;;  %s353_s18 = sand.u32 (!%p318_p9), 1, %s8098_s14   ;;  %s6652_s28 = sshll.u32 (!%p318_p9), %s8189_s17, 11 }
  0x10   : > { %7634 = vmatprep.subr.bf16.mxu1 (!%p318_p9), %v7733_v1  ;;  %6939 = vmatprep.subr.bf16.mxu0 (!%p318_p9), %v7733_v1  ;;  %v6353_v15 = vld [vmem:[%s10329_s2] ss:$0 sm:$0xff] (!%p318_p9)  ;;  %s6349_s20 = sshll.u32 (!%p318_p9), %s353_s18, 7  ;;  %s10274_s11 = scalar_lea.hbm (!%p318_p9), %s10337_s10, %s6652_s28 }
  0x11   : > { %v6372_v54 = vld [vmem:[%s10331_s4] ss:$0 sm:$0xff] (!%p318_p9)  ;;  %s10286_s17 = scalar_lea.sflag (!%p318_p9), [#allocation3], %s353_s18 }
  0x13   : > { %7636 = vmatpush3.bf16.msra.mxu1 (!%p318_p9), %v7733_v1  ;;  %6940 = vmatpush3.bf16.msra.mxu0 (!%p318_p9), %v7733_v1 }
  0x14   : > { %6957 = vmatprep.subr.bf16.mxu1 (!%p318_p9), %v7738_v2  ;;  %6977 = vmatprep.subr.bf16.mxu0 (!%p318_p9), %v7744_v12 }
  0x15   : > { %s10354_s27 = smov (!%p357_p10, %s6350_s27), 15 }
  0x16   : > { %s6650_s12 = sshll.u32 %s10354_s27, 3  ;;  %s10241_s27 = scalar_lea.vmem [#allocation2], %s6349_s20 }
  0x17   : > { %s8229_s21 = scalar_lea.vmem %s10327_s0, %s6650_s12  ;;  %s6283_s29 = sshll.u32 %s10241_s27, 4  ;;  %s10276_s29 = int_to_ptr.vmem [resolvable:$true] %s6283_s29 }
  0x18   : > { %v7734_v4 = vld [vmem:[%s8229_s21 + $0x20] sm:$0xff]   ;;  %v7735_v5 = vld [vmem:[%s8229_s21 + $0x28] sm:$0xff]   ;;  %v7736_v6 = vld [vmem:[%s8229_s21 + $0x30] sm:$0xff]   ;;  %s8044_s12 = scalar_lea.vmem %s10276_s29, 2048  ;;  %s8110_s20 = smov [#allocation2]  }
  0x19   : > { %6949 = vmatprep.mubr.msk.bf16.mxu1 %vm444_vm0, %v7734_v4  ;;  %v7740_v7 = vld [vmem:[%s8229_s21] sm:$0xff]   ;;  %v7741_v8 = vld [vmem:[%s8229_s21 + $0x8] sm:$0xff]   ;;  %v7742_v9 = vld [vmem:[%s8229_s21 + $0x10] sm:$0xff]   ;;  %p8045_p11 = scmp.ne.s32.totalorder %s10276_s29, %s8044_s12  ;;  %s8048_s25 = sshll.u32 %s8110_s20, 4  ;;  %s8049_s25 = int_to_ptr.vmem [resolvable:$false] %s8048_s25 }
  0x1a   : > { %6950 = vmatmul.mubr.msk.bf16.vlgmr.msra.gmra.mrb[0].mxu1 %vm444_vm0, %v7735_v5  ;;  %6941 = vmatprep.mubr.msk.bf16.mxu0 %vm444_vm0, %v7740_v7  ;;  %v7737_v10 = vld [vmem:[%s8229_s21 + $0x38] sm:$0xff]   ;;  %s8050_s26 = scalar_lea.vmem %s8049_s25, 4096  ;;  %p8051_p0 = scmp.lt.s32.totalorder %s10276_s29, %s8049_s25 }
  0x1b   : > { %6953 = vmatprep.mubr.msk.bf16.mxu1 %vm444_vm0, %v7736_v6  ;;  %6958 = vmatpush3.bf16.msra.mxu1 %v7738_v2  ;;  %v7743_v11 = vld [vmem:[%s8229_s21 + $0x18] sm:$0xff]   ;;  %p8046_p12 = pnand %p8045_p11, %p8206_p5  ;;  %p8052_p1 = scmp.lt.s32.totalorder %s8050_s26, %s8044_s12 }
  0x1c   : > { %6959 = vmatprep.subr.bf16.mxu1 %v7739_v3  ;;  %6942 = vmatmul.mubr.msk.bf16.vlgmr.msra.gmra.mrb[0].mxu0 %vm444_vm0, %v7741_v8 }
  0x1d   : > { %6945 = vmatprep.mubr.msk.bf16.mxu0 %vm444_vm0, %v7742_v9  ;;  %6978 = vmatpush3.bf16.msra.mxu0 %v7744_v12  ;;  %p8047_p13 = pneg %p8046_p12  ;;  %p8053_p2 = por %p8052_p1, %p8051_p0 }
  0x1e   : > { %6979 = vmatprep.subr.bf16.mxu0 %v7745_v13 }
  0x1f   : > { %6960 = vmatpush3.bf16.msra.mxu1 %v7739_v3  ;;  %p8054_p3 = pnand %p8053_p2, %p8047_p13 }
  0x20   : > { %6997 = vmatprep.subr.bf16.mxu1 %v8108_v14 }
  0x21   : > { %6980 = vmatpush3.bf16.msra.mxu0 %v7745_v13 }
  0x22   : > { %6954 = vmatmul.mubr.msk.bf16.gmra.mrb[4].mxu1 %vm444_vm0, %v7737_v10  ;;  %7021 = vmatprep.subr.bf16.mxu0 %v8108_v14 }
  0x23   : > { %6961 = vmatprep.mubr.msk.bf16.mxu1 %vm444_vm0, %v7740_v7 }
  0x24   : > { %6946 = vmatmul.mubr.msk.bf16.gmra.mrb[4].mxu0 %vm444_vm0, %v7743_v11 }
  0x25   : > { %6981 = vmatprep.mubr.msk.bf16.mxu0 %vm444_vm0, %v7740_v7 }
  0x2a   : > { %6962 = vmatmul.mubr.msk.bf16.vlgmr.msra.gmra.mrb[8].mxu1 %vm444_vm0, %v7741_v8 }
  0x2b   : > { %6965 = vmatprep.mubr.msk.bf16.mxu1 %vm444_vm0, %v7742_v9 }
  0x2c   : > { %6982 = vmatmul.mubr.msk.bf16.vlgmr.msra.gmra.mrb[8].mxu0 %vm444_vm0, %v7741_v8 }
  0x2d   : > { %6985 = vmatprep.mubr.msk.bf16.mxu0 %vm444_vm0, %v7742_v9 }
  0x32   : > { %6966 = vmatmul.mubr.msk.bf16.gmra.mrb[12].mxu1 %vm444_vm0, %v7743_v11 }
  0x33   : > { %6969 = vmatprep.mubr.msk.bf16.mxu1 %vm444_vm0, %v7734_v4 }
  0x34   : > { %6986 = vmatmul.mubr.msk.bf16.gmra.mrb[12].mxu0 %vm444_vm0, %v7743_v11 }
  0x35   : > { %6989 = vmatprep.mubr.msk.bf16.mxu0 %vm444_vm0, %v7734_v4 }
  0x3a   : > { %6970 = vmatmul.mubr.msk.bf16.gmra.mrb[16].mxu1 %vm444_vm0, %v7735_v5 }
  0x3b   : > { %6973 = vmatprep.mubr.msk.bf16.mxu1 %vm444_vm0, %v7736_v6 }
  0x3c   : > { %6990 = vmatmul.mubr.msk.bf16.gmra.mrb[16].mxu0 %vm444_vm0, %v7735_v5 }
  0x3d   : > { %6993 = vmatprep.mubr.msk.bf16.mxu0 %vm444_vm0, %v7736_v6 }
  0x42   : > { %6974 = vmatmul.mubr.msk.bf16.gmra.mrb[20].mxu1 %vm444_vm0, %v7737_v10 }
  0x43   : > { %6999 = vmatprep.mubr.msk.bf16.mxu1 %vm8109_vm1, %v8108_v14 }
  0x44   : > { %6994 = vmatmul.mubr.msk.bf16.gmra.mrb[20].mxu0 %vm444_vm0, %v7737_v10 }
  0x45   : > { %7023 = vmatprep.mubr.msk.bf16.mxu0 %vm8109_vm1, %v8108_v14 }
  0xed   : > { %v6951_v16 = vpop.f32.mrb[0].mxu1 }
  0xee   : > { %v535_v17 = vpop.f32.mrb[1].mxu1  ;;  %v8281_v19 = vadd.f32 %v6951_v16, %v6353_v15 }
  0xef   : > { %v6952_v18 = vpop.f32.mrb[2].mxu1  ;;  %v8285_v22 = vadd.f32 %v6353_v15, %v535_v17  ;;  %v6943_v24 = vpop.f32.mrb[0].mxu0 }
  0xf0   : > { %v8283_v20 = vadd.f32 %v6952_v18, %v6353_v15  ;;  %v538_v21 = vpop.f32.mrb[3].mxu1  ;;  %v8291_v26 = vadd.f32 %v6943_v24, %v6353_v15  ;;  %v503_v27 = vpop.f32.mrb[1].mxu0 }
  0xf1   : > { %v8287_v23 = vadd.f32 %v6353_v15, %v538_v21  ;;  %v504_v29 = vadd.f32 %v6353_v15, %v503_v27  ;;  %v6944_v30 = vpop.f32.mrb[2].mxu0 }
  0xf2   : > { %v811_v25 = vpack.c.bf16 %v8283_v20, %v8281_v19  ;;  %v8295_v31 = vadd.f32 %v6944_v30, %v6353_v15  ;;  %v506_v32 = vpop.f32.mrb[3].mxu0  ;;  %v6383_v19 = vld [vmem:[%s10333_s6] ss:$0 sm:$0xff] }
  0xf3   : > { %v810_v28 = vpack.c.bf16 %v8287_v23, %v8285_v22  ;;  %v507_v34 = vadd.f32 %v6353_v15, %v506_v32 }
  0xf4   : > { %v807_v36 = vpack.c.bf16 %v8295_v31, %v8291_v26 }
  0xf5   : > { %v6955_v33 = vpop.f32.mrb[4].mxu1  ;;  %v806_v38 = vpack.c.bf16 %v507_v34, %v504_v29 }
  0xf6   : > { %v551_v35 = vpop.f32.mrb[5].mxu1  ;;  %v8299_v39 = vadd.f32 %v6955_v33, %v6353_v15 }
  0xf7   : > { %v6956_v37 = vpop.f32.mrb[6].mxu1  ;;  %v8303_v42 = vadd.f32 %v6353_v15, %v551_v35  ;;  %v6947_v44 = vpop.f32.mrb[4].mxu0 }
  0xf8   : > { %v8301_v40 = vadd.f32 %v6956_v37, %v6353_v15  ;;  %v554_v41 = vpop.f32.mrb[7].mxu1  ;;  %v8309_v46 = vadd.f32 %v6947_v44, %v6353_v15  ;;  %v519_v47 = vpop.f32.mrb[5].mxu0 }
  0xf9   : > { %v8305_v43 = vadd.f32 %v6353_v15, %v554_v41  ;;  %v8313_v49 = vadd.f32 %v6353_v15, %v519_v47  ;;  %v6948_v50 = vpop.f32.mrb[6].mxu0 }
  0xfa   : > { %v813_v45 = vpack.c.bf16 %v8301_v40, %v8299_v39  ;;  %v8315_v51 = vadd.f32 %v6948_v50, %v6353_v15  ;;  %v522_v52 = vpop.f32.mrb[7].mxu0 }
  0xfb   : > { %v812_v48 = vpack.c.bf16 %v8305_v43, %v8303_v42  ;;  %v523_v55 = vadd.f32 %v6353_v15, %v522_v52 }
  0xfc   : > { %v809_v57 = vpack.c.bf16 %v8315_v51, %v8309_v46 }
  0xfd   : > { %v6963_v53 = vpop.f32.mrb[8].mxu1  ;;  %v808_v59 = vpack.c.bf16 %v523_v55, %v8313_v49 }
  0xfe   : > { %v623_v56 = vpop.f32.mrb[9].mxu1  ;;  %v632_v60 = vadd.f32 %v6963_v53, %v6372_v54 }
  0xff   : > { %v6964_v58 = vpop.f32.mrb[10].mxu1  ;;  %v624_v63 = vadd.f32 %v6372_v54, %v623_v56 }
 0x100   : > { %v635_v61 = vadd.f32 %v6964_v58, %v6372_v54  ;;  %v626_v62 = vpop.f32.mrb[11].mxu1 }
 0x101   : > { %v627_v0 = vadd.f32 %v6372_v54, %v626_v62 }
 0x102   : > { %v815_v1 = vpack.c.bf16 %v635_v61, %v632_v60 }
 0x103   : > { %v814_v2 = vpack.c.bf16 %v627_v0, %v624_v63 }
 0x104   : > { %v884_v16 = vsel %vm832_vm2, %v815_v1, 0 }
 0x105   : > { %v837_v3 = vsel %vm832_vm2, %v814_v2, 0  ;;  %v6967_v4 = vpop.f32.mrb[12].mxu1 }
 0x106   : > { %6998 = vmatpush3.bf16.xpose.msra.mxu1 %v837_v3  ;;  %v648_v5 = vadd.f32 %v6967_v4, %v6372_v54  ;;  %v639_v6 = vpop.f32.mrb[13].mxu1 }
 0x107   : > { %v640_v7 = vadd.f32 %v6372_v54, %v639_v6  ;;  %v6968_v8 = vpop.f32.mrb[14].mxu1  ;;  %7003 = vmatprep.subr.bf16.mxu1 %v8108_v14 }
 0x108   : > { %v651_v9 = vadd.f32 %v6968_v8, %v6372_v54  ;;  %v642_v10 = vpop.f32.mrb[15].mxu1 }
 0x109   : > { %v643_v11 = vadd.f32 %v6372_v54, %v642_v10 }
 0x10a   : > { %v817_v12 = vpack.c.bf16 %v651_v9, %v648_v5 }
 0x10b   : > { %v816_v13 = vpack.c.bf16 %v643_v11, %v640_v7 }
 0x10c   : > { %v978_v52 = vsel %vm832_vm2, %v817_v12, 0 }
 0x10d   : > { %v6971_v15 = vpop.f32.mrb[16].mxu1  ;;  %7000 = vmatmul.mubr.msk.bf16.vlgmr.msra.gmra.mrb[24].mxu1 %vm832_vm2, %v806_v38  ;;  %v931_v33 = vsel %vm832_vm2, %v816_v13, 0 }
 0x10e   : > { %v664_v17 = vadd.f32 %v6971_v15, %v6372_v54  ;;  %v655_v18 = vpop.f32.mrb[17].mxu1  ;;  %7004 = vmatpush3.bf16.xpose.msra.mxu1 %v884_v16  ;;  %7005 = vmatprep.mubr.msk.bf16.mxu1 %vm8109_vm1, %v8108_v14 }
 0x10f   : > { %v656_v21 = vadd.f32 %v6372_v54, %v655_v18  ;;  %v6972_v24 = vpop.f32.mrb[18].mxu1  ;;  %7009 = vmatprep.subr.bf16.mxu1 %v8108_v14 }
 0x110   : > { %v667_v26 = vadd.f32 %v6972_v24, %v6372_v54  ;;  %v658_v27 = vpop.f32.mrb[19].mxu1  ;;  %v8422_v24 = vld [vmem:[%s10334_s7] sm:$0xff] }
 0x111   : > { %v659_v29 = vadd.f32 %v6372_v54, %v658_v27  ;;  %v8427_v27 = vld [vmem:[%s10334_s7 + $0x8] sm:$0xff] }
 0x112   : > { %v819_v30 = vpack.c.bf16 %v667_v26, %v664_v17 }
 0x113   : > { %v818_v31 = vpack.c.bf16 %v659_v29, %v656_v21 }
 0x114   : > { %v1072_v22 = vsel %vm832_vm2, %v819_v30, 0 }
 0x115   : > { %v6975_v32 = vpop.f32.mrb[20].mxu1  ;;  %7006 = vmatmul.mubr.msk.bf16.vlgmr.msra.gmra.mrb[28].mxu1 %vm832_vm2, %v807_v36  ;;  %v1025_v34 = vsel %vm832_vm2, %v818_v31, 0 }
 0x116   : > { %v680_v35 = vadd.f32 %v6975_v32, %v6372_v54  ;;  %v671_v37 = vpop.f32.mrb[21].mxu1  ;;  %7010 = vmatpush3.bf16.xpose.msra.mxu1 %v931_v33  ;;  %7022 = vmatpush3.bf16.xpose.msra.mxu0 %v1025_v34 }
 0x117   : > { %v672_v38 = vadd.f32 %v6372_v54, %v671_v37  ;;  %v6976_v41 = vpop.f32.mrb[22].mxu1  ;;  %7011 = vmatprep.mubr.msk.bf16.mxu1 %vm8109_vm1, %v8108_v14  ;;  %7015 = vmatprep.subr.bf16.mxu1 %v8108_v14 }
 0x118   : > { %v683_v44 = vadd.f32 %v6976_v41, %v6372_v54  ;;  %v674_v47 = vpop.f32.mrb[23].mxu1  ;;  %7033 = vmatprep.subr.bf16.mxu0 %v8108_v14 }
 0x119   : > { %v675_v36 = vadd.f32 %v6372_v54, %v674_v47 }
 0x11a   : > { %v821_v49 = vpack.c.bf16 %v683_v44, %v680_v35 }
 0x11b   : > { %v820_v50 = vpack.c.bf16 %v675_v36, %v672_v38 }
 0x11c   : > { %v1166_v23 = vsel %vm832_vm2, %v821_v49, 0 }
 0x11d   : > { %7012 = vmatmul.mubr.msk.bf16.vlgmr.msra.gmra.mrb[32].mxu1 %vm832_vm2, %v808_v59  ;;  %7024 = vmatmul.mubr.msk.bf16.vlgmr.msra.gmra.mrb[24].mxu0 %vm832_vm2, %v810_v28  ;;  %v1119_v53 = vsel %vm832_vm2, %v820_v50, 0  ;;  %v6983_v28 = vpop.f32.mrb[8].mxu0 }
 0x11e   : > { %7016 = vmatpush3.bf16.xpose.msra.mxu1 %v978_v52  ;;  %7034 = vmatpush3.bf16.xpose.msra.mxu0 %v1119_v53  ;;  %v752_v20 = vadd.f32 %v6983_v28, %v6383_v19 }
 0x11f   : > { %7017 = vmatprep.mubr.msk.bf16.mxu1 %vm8109_vm1, %v8108_v14  ;;  %7035 = vmatprep.mubr.msk.bf16.mxu0 %vm8109_vm1, %v8108_v14 }
 0x120   : > { %7027 = vmatprep.subr.bf16.mxu1 %v8108_v14  ;;  %7045 = vmatprep.subr.bf16.mxu0 %v8108_v14 }
 0x125   : > { %7018 = vmatmul.mubr.msk.bf16.vlgmr.msra.gmra.mrb[36].mxu1 %vm832_vm2, %v809_v57  ;;  %7036 = vmatmul.mubr.msk.bf16.vlgmr.msra.gmra.mrb[28].mxu0 %vm832_vm2, %v812_v48 }
 0x126   : > { %7028 = vmatpush3.bf16.xpose.msra.mxu1 %v1072_v22  ;;  %7029 = vmatprep.mubr.msk.bf16.mxu1 %vm8109_vm1, %v8108_v14 }
 0x127   : > { %7039 = vmatprep.subr.bf16.mxu1 %v8108_v14  ;;  %7047 = vmatprep.mubr.msk.bf16.mxu0 %vm8109_vm1, %v8108_v14 }
 0x12d   : > { %7030 = vmatmul.mubr.msk.bf16.vlgmr.msra.gmra.mrb[40].mxu1 %vm832_vm2, %v811_v25  ;;  %v743_v25 = vpop.f32.mrb[9].mxu0 }
 0x12e   : > { %7040 = vmatpush3.bf16.xpose.msra.mxu1 %v1166_v23  ;;  %7041 = vmatprep.mubr.msk.bf16.mxu1 %vm8109_vm1, %v8108_v14  ;;  %v744_v42 = vadd.f32 %v6383_v19, %v743_v25  ;;  %v6984_v43 = vpop.f32.mrb[10].mxu0 }
 0x12f   : > { %7051 = vmatprep.subr.bf16.mxu1 %v8108_v14  ;;  %v755_v46 = vadd.f32 %v6984_v43, %v6383_v19  ;;  %v746_v48 = vpop.f32.mrb[11].mxu0 }
 0x130   : > { %v747_v51 = vadd.f32 %v6383_v19, %v746_v48  ;;  %v6987_v54 = vpop.f32.mrb[12].mxu0 }
 0x131   : > { %v823_v55 = vpack.c.bf16 %v755_v46, %v752_v20  ;;  %v8381_v39 = vadd.f32 %v6987_v54, %v6383_v19  ;;  %v759_v40 = vpop.f32.mrb[13].mxu0 }
 0x132   : > { %v8383_v56 = vadd.f32 %v6383_v19, %v759_v40  ;;  %v6988_v57 = vpop.f32.mrb[14].mxu0 }
 0x133   : > { %v8385_v58 = vadd.f32 %v6988_v57, %v6383_v19  ;;  %v762_v59 = vpop.f32.mrb[15].mxu0 }
 0x134   : > { %v8387_v60 = vadd.f32 %v6383_v19, %v762_v59  ;;  %v6991_v61 = vpop.f32.mrb[16].mxu0 }
 0x135   : > { %7042 = vmatmul.mubr.msk.bf16.vlgmr.msra.gmra.mrb[44].mxu1 %vm832_vm2, %v813_v45  ;;  %v822_v45 = vpack.c.bf16 %v747_v51, %v744_v42  ;;  %v825_v62 = vpack.c.bf16 %v8385_v58, %v8381_v39  ;;  %v8392_v63 = vadd.f32 %v6991_v61, %v6383_v19  ;;  %v775_v0 = vpop.f32.mrb[17].mxu0 }
 0x136   : > { %7053 = vmatprep.mubr.msk.bf16.mxu1 %vm8109_vm1, %v8108_v14  ;;  %7052 = vmatpush3.bf16.msra.mxu1 %v823_v55  ;;  %v824_v1 = vpack.c.bf16 %v8387_v60, %v8383_v56  ;;  %v8397_v2 = vadd.f32 %v6383_v19, %v775_v0  ;;  %v6992_v3 = vpop.f32.mrb[18].mxu0 }
 0x137   : > { %7046 = vmatpush3.bf16.msra.mxu0 %v822_v45  ;;  %7063 = vmatprep.subr.bf16.mxu1 %v8108_v14  ;;  %v8399_v4 = vadd.f32 %v6992_v3, %v6383_v19  ;;  %v778_v5 = vpop.f32.mrb[19].mxu0 }
 0x138   : > { %7057 = vmatprep.subr.bf16.mxu0 %v8108_v14  ;;  %v8401_v6 = vadd.f32 %v6383_v19, %v778_v5  ;;  %v6995_v7 = vpop.f32.mrb[20].mxu0 }
 0x139   : > { %v827_v8 = vpack.c.bf16 %v8399_v4, %v8392_v63  ;;  %v8405_v9 = vadd.f32 %v6995_v7, %v6383_v19  ;;  %v791_v10 = vpop.f32.mrb[21].mxu0  ;;  %v7746_v4 = vld [vmem:[%s10330_s3 + $0x10] sm:$0xff]  }
 0x13a   : > { %v826_v11 = vpack.c.bf16 %v8401_v6, %v8397_v2  ;;  %v8409_v12 = vadd.f32 %v6383_v19, %v791_v10  ;;  %v6996_v13 = vpop.f32.mrb[22].mxu0 }
 0x13b   : > { %v8411_v15 = vadd.f32 %v6996_v13, %v6383_v19  ;;  %v794_v16 = vpop.f32.mrb[23].mxu0 }
 0x13c   : > { %v8413_v17 = vadd.f32 %v6383_v19, %v794_v16 }
 0x13d   : > { %v829_v18 = vpack.c.bf16 %v8411_v15, %v8405_v9  ;;  %v7747_v15 = vld [vmem:[%s10330_s3 + $0x18] sm:$0xff]  }
 0x13e   : > { %v828_v21 = vpack.c.bf16 %v8413_v17, %v8409_v12  ;;  %v8020_v12 = vld [vmem:[%s8229_s21] sm:$0xff]  }
 0x1e0   : > { %v873_v26 = vpop.f32.mrb[24].mxu1 }
 0x1e1   : > { %v8430_v29 = vadd.f32 %v873_v26, %v8422_v24  ;;  %v7001_v30 = vpop.f32.mrb[25].mxu1 }
 0x1e2   : > { %v876_v31 = vpop.f32.mrb[26].mxu1 }
 0x1e3   : > { %v8433_v32 = vadd.f32 %v876_v31, %v8427_v27  ;;  %v7002_v33 = vpop.f32.mrb[27].mxu1  ;;  %v1210_v34 = vsel %vm1209_vm3, %v8430_v29, -inf }
 0x1e4   : > { %1211 = vmax.xlane.f32.xlu1 %v1210_v34 }
 0x1e5   : > { %v1213_v35 = vsel %vm1209_vm3, %v8433_v32, -inf }
 0x1e8   : > { %1214 = vmax.xlane.f32.xlu1 %v1213_v35  ;;  %v920_v37 = vpop.f32.mrb[28].mxu1 }
 0x1e9   : > { %v8440_v38 = vadd.f32 %v920_v37, %v8422_v24  ;;  %v7007_v41 = vpop.f32.mrb[29].mxu1 }
 0x1ea   : > { %v923_v44 = vpop.f32.mrb[30].mxu1 }
 0x1eb   : > { %v8443_v47 = vadd.f32 %v923_v44, %v8427_v27  ;;  %v7008_v36 = vpop.f32.mrb[31].mxu1  ;;  %v1216_v49 = vsel %vm1209_vm3, %v8440_v38, -inf }
 0x1ec   : > { %1217 = vmax.xlane.f32.xlu0 %v1216_v49 }
 0x1ed   : > { %v1219_v50 = vsel %vm1209_vm3, %v8443_v47, -inf }
 0x1f0   : > { %v1061_v52 = vpop.f32.mrb[24].mxu0  ;;  %1220 = vmax.xlane.f32.xlu0 %v1219_v50  ;;  %v967_v53 = vpop.f32.mrb[32].mxu1 }
 0x1f1   : > { %v7013_v22 = vpop.f32.mrb[33].mxu1  ;;  %v7025_v23 = vpop.f32.mrb[25].mxu0  ;;  %v8453_v40 = vadd.f32 %v967_v53, %v8422_v24  ;;  %v8473_v30 = vadd.f32 %v1061_v52, %v8422_v24 }
 0x1f2   : > { %v970_v28 = vpop.f32.mrb[34].mxu1  ;;  %v1064_v19 = vpop.f32.mrb[26].mxu0 }
 0x1f3   : > { %v7014_v20 = vpop.f32.mrb[35].mxu1  ;;  %v7026_v25 = vpop.f32.mrb[27].mxu0  ;;  %v8461_v0 = vadd.f32 %v970_v28, %v8427_v27  ;;  %v1222_v5 = vsel %vm1209_vm3, %v8453_v40, -inf  ;;  %v8481_v35 = vadd.f32 %v1064_v19, %v8427_v27  ;;  %v1234_v41 = vsel %vm1209_vm3, %v8473_v30, -inf }
 0x1f5   : > { %v1225_v16 = vsel %vm1209_vm3, %v8461_v0, -inf  ;;  %v1237_v50 = vsel %vm1209_vm3, %v8481_v35, -inf }
 0x1f8   : > { %v1014_v42 = vpop.f32.mrb[36].mxu1  ;;  %v1155_v43 = vpop.f32.mrb[28].mxu0 }
 0x1f9   : > { %v8450_v46 = vadd.f32 %v1014_v42, %v8422_v24  ;;  %v7019_v48 = vpop.f32.mrb[37].mxu1  ;;  %v7037_v51 = vpop.f32.mrb[29].mxu0  ;;  %v8493_v53 = vadd.f32 %v1155_v43, %v8422_v24 }
 0x1fa   : > { %v1017_v54 = vpop.f32.mrb[38].mxu1  ;;  %v1158_v55 = vpop.f32.mrb[30].mxu0 }
 0x1fb   : > { %v8456_v45 = vadd.f32 %v1017_v54, %v8427_v27  ;;  %v7020_v57 = vpop.f32.mrb[39].mxu1  ;;  %v7038_v59 = vpop.f32.mrb[31].mxu0  ;;  %v1228_v61 = vsel %vm1209_vm3, %v8450_v46, -inf  ;;  %v8501_v19 = vadd.f32 %v1158_v55, %v8427_v27  ;;  %v1246_v25 = vsel %vm1209_vm3, %v8493_v53, -inf }
 0x1fc   : > { %1229 = vmax.xlane.f32.xlu0 %v1228_v61 }
 0x1fd   : > { %v1231_v3 = vsel %vm1209_vm3, %v8456_v45, -inf }
 0x1fe   : > { %1232 = vmax.xlane.f32.xlu1 %v1231_v3 }
 0x200   : > { %1223 = vmax.xlane.f32.xlu0 %v1222_v5  ;;  %v1108_v7 = vpop.f32.mrb[40].mxu1 }
 0x201   : > { %v8468_v10 = vadd.f32 %v1108_v7, %v8422_v24  ;;  %v7031_v13 = vpop.f32.mrb[41].mxu1 }
 0x202   : > { %1226 = vmax.xlane.f32.xlu1 %v1225_v16  ;;  %v1111_v26 = vpop.f32.mrb[42].mxu1 }
 0x203   : > { %v8476_v31 = vadd.f32 %v1111_v26, %v8427_v27  ;;  %v7032_v33 = vpop.f32.mrb[43].mxu1  ;;  %v1240_v34 = vsel %vm1209_vm3, %v8468_v10, -inf }
 0x204   : > { %1241 = vmax.xlane.f32.xlu0 %v1240_v34 }
 0x205   : > { %v1243_v37 = vsel %vm1209_vm3, %v8476_v31, -inf }
 0x206   : > { %1244 = vmax.xlane.f32.xlu1 %v1243_v37 }
 0x208   : > { %1235 = vmax.xlane.f32.xlu0 %v1234_v41  ;;  %v1202_v44 = vpop.f32.mrb[44].mxu1 }
 0x209   : > { %v8488_v36 = vadd.f32 %v1202_v44, %v8422_v24  ;;  %v7043_v49 = vpop.f32.mrb[45].mxu1  ;;  %v1249_v24 = vsel %vm1209_vm3, %v8501_v19, -inf }
 0x20a   : > { %1238 = vmax.xlane.f32.xlu1 %v1237_v50  ;;  %v1205_v52 = vpop.f32.mrb[46].mxu1 }
 0x20b   : > { %v8496_v22 = vadd.f32 %v1205_v52, %v8427_v27  ;;  %v7044_v23 = vpop.f32.mrb[47].mxu1  ;;  %v1252_v28 = vsel %vm1209_vm3, %v8488_v36, -inf }
 0x20c   : > { %1253 = vmax.xlane.f32.xlu0 %v1252_v28 }
 0x20d   : > { %v1255_v20 = vsel %vm1209_vm3, %v8496_v22, -inf }
 0x20e   : > { %1256 = vmax.xlane.f32.xlu1 %v1255_v20 }
 0x210   : > { %1247 = vmax.xlane.f32.xlu0 %v1246_v25 }
 0x212   : > { %1250 = vmax.xlane.f32.xlu1 %v1249_v24 }
 0x271   : > { %v1212_v42 = vpop.xlane.xlu1 %1211 }
 0x272   : > { %v1258_v43 = vsub.f32 %v8430_v29, %v1212_v42 }
 0x274   : > { %v1274_v54 = vmul.f32 1.442695, %v1258_v43 }
 0x275   : > { %v1215_v48 = vpop.xlane.xlu1 %1214 }
 0x276   : > { %v1259_v55 = vsub.f32 %v8433_v32, %v1215_v48 }
 0x278   : > { %v1276_v3 = vmul.f32 1.442695, %v1259_v55 }
 0x279   : > { %v1218_v51 = vpop.xlane.xlu0 %1217 }
 0x27a   : > { %v1260_v27 = vsub.f32 %v8440_v38, %v1218_v51 }
 0x27c   : > { %v1278_v57 = vmul.f32 1.442695, %v1260_v27 }
 0x27d   : > { %v1221_v59 = vpop.xlane.xlu0 %1220 }
 0x27e   : > { %7764 = vpow2.f32 %v1278_v57  ;;  %v1261_v61 = vsub.f32 %v8443_v47, %v1221_v59 }
 0x27f   : > { %7766 = vpow2.f32 %v1274_v54 }
 0x280   : > { %v1280_v5 = vmul.f32 1.442695, %v1261_v61 }
 0x282   : > { %7768 = vpow2.f32 %v1280_v5 }
 0x283   : > { %7770 = vpow2.f32 %v1276_v3 }
 0x288   : > { %v8513_v7 = vpop.eup %7764 }
 0x289   : > { %v1230_v29 = vpop.xlane.xlu0 %1229  ;;  %v1312_v13 = vsel %vm1209_vm3, %v8513_v7, 0.0  ;;  %v8517_v38 = vpop.eup %7766 }
 0x28a   : > { %v1264_v32 = vsub.f32 %v8450_v46, %v1230_v29  ;;  %1313 = vadd.xlane.f32.xlu0 %v1312_v13  ;;  %v1306_v37 = vsel %vm1209_vm3, %v8517_v38, 0.0 }
 0x28b   : > { %v1233_v16 = vpop.xlane.xlu1 %1232 }
 0x28c   : > { %v8520_v26 = vpop.eup %7768  ;;  %v1286_v47 = vmul.f32 1.442695, %v1264_v32  ;;  %v1265_v33 = vsub.f32 %v8456_v45, %v1233_v16 }
 0x28d   : > { %v1224_v34 = vpop.xlane.xlu0 %1223  ;;  %v1315_v41 = vsel %vm1209_vm3, %v8520_v26, 0.0  ;;  %v8527_v44 = vpop.eup %7770 }
 0x28e   : > { %7772 = vpow2.f32 %v1286_v47  ;;  %v1288_v49 = vmul.f32 1.442695, %v1265_v33  ;;  %v1262_v46 = vsub.f32 %v8453_v40, %v1224_v34  ;;  %1307 = vadd.xlane.f32.xlu0 %v1306_v37  ;;  %1316 = vadd.xlane.f32.xlu1 %v1315_v41  ;;  %v1309_v28 = vsel %vm1209_vm3, %v8527_v44, 0.0 }
 0x28f   : > { %v1227_v50 = vpop.xlane.xlu1 %1226 }
 0x290   : > { %7774 = vpow2.f32 %v1288_v49  ;;  %v1282_v52 = vmul.f32 1.442695, %v1262_v46  ;;  %v1263_v45 = vsub.f32 %v8461_v0, %v1227_v50 }
 0x291   : > { %v1242_v23 = vpop.xlane.xlu0 %1241 }
 0x292   : > { %7776 = vpow2.f32 %v1282_v52  ;;  %v1284_v20 = vmul.f32 1.442695, %v1263_v45  ;;  %v1268_v25 = vsub.f32 %v8468_v10, %v1242_v23  ;;  %1310 = vadd.xlane.f32.xlu1 %v1309_v28 }
 0x293   : > { %v1245_v24 = vpop.xlane.xlu1 %1244 }
 0x294   : > { %7778 = vpow2.f32 %v1284_v20  ;;  %v1294_v42 = vmul.f32 1.442695, %v1268_v25  ;;  %v1269_v40 = vsub.f32 %v8476_v31, %v1245_v24 }
 0x295   : > { %v1236_v43 = vpop.xlane.xlu0 %1235 }
 0x296   : > { %7780 = vpow2.f32 %v1294_v42  ;;  %v1296_v48 = vmul.f32 1.442695, %v1269_v40  ;;  %v1266_v51 = vsub.f32 %v8473_v30, %v1236_v43 }
 0x297   : > { %v1239_v0 = vpop.xlane.xlu1 %1238 }
 0x298   : > { %v8536_v27 = vpop.eup %7772  ;;  %7782 = vpow2.f32 %v1296_v48  ;;  %v1290_v54 = vmul.f32 1.442695, %v1266_v51  ;;  %v1267_v55 = vsub.f32 %v8481_v35, %v1239_v0 }
 0x299   : > { %v1254_v57 = vpop.xlane.xlu0 %1253  ;;  %v1324_v10 = vsel %vm1209_vm3, %v8536_v27, 0.0 }
 0x29a   : > { %v8541_v59 = vpop.eup %7774  ;;  %7784 = vpow2.f32 %v1290_v54  ;;  %v1292_v31 = vmul.f32 1.442695, %v1267_v55  ;;  %v1272_v61 = vsub.f32 %v8488_v36, %v1254_v57  ;;  %1325 = vadd.xlane.f32.xlu0 %v1324_v10 }
 0x29b   : > { %v1257_v3 = vpop.xlane.xlu1 %1256  ;;  %v1327_v30 = vsel %vm1209_vm3, %v8541_v59, 0.0 }
 0x29c   : > { %v8546_v5 = vpop.eup %7776  ;;  %7786 = vpow2.f32 %v1292_v31  ;;  %v1302_v29 = vmul.f32 1.442695, %v1272_v61  ;;  %v1273_v35 = vsub.f32 %v8496_v22, %v1257_v3  ;;  %1328 = vadd.xlane.f32.xlu1 %v1327_v30 }
 0x29d   : > { %v1248_v13 = vpop.xlane.xlu0 %1247  ;;  %v1318_v32 = vsel %vm1209_vm3, %v8546_v5, 0.0 }
 0x29e   : > { %v8551_v16 = vpop.eup %7778  ;;  %7788 = vpow2.f32 %v1302_v29  ;;  %v1304_v36 = vmul.f32 1.442695, %v1273_v35  ;;  %v1270_v47 = vsub.f32 %v8493_v53, %v1248_v13  ;;  %1319 = vadd.xlane.f32.xlu0 %v1318_v32 }
 0x29f   : > { %v1251_v33 = vpop.xlane.xlu1 %1250  ;;  %v1321_v34 = vsel %vm1209_vm3, %v8551_v16, 0.0 }
 0x2a0   : > { %v8556_v37 = vpop.eup %7780  ;;  %7790 = vpow2.f32 %v1304_v36  ;;  %v1298_v22 = vmul.f32 1.442695, %v1270_v47  ;;  %v1271_v41 = vsub.f32 %v8501_v19, %v1251_v33  ;;  %1322 = vadd.xlane.f32.xlu1 %v1321_v34 }
 0x2a1   : > { %v1336_v49 = vsel %vm1209_vm3, %v8556_v37, 0.0 }
 0x2a2   : > { %v8561_v46 = vpop.eup %7782  ;;  %7792 = vpow2.f32 %v1298_v22  ;;  %v1300_v50 = vmul.f32 1.442695, %v1271_v41  ;;  %1337 = vadd.xlane.f32.xlu0 %v1336_v49 }
 0x2a3   : > { %v1339_v53 = vsel %vm1209_vm3, %v8561_v46, 0.0 }
 0x2a4   : > { %v8565_v52 = vpop.eup %7784  ;;  %7794 = vpow2.f32 %v1300_v50  ;;  %1340 = vadd.xlane.f32.xlu1 %v1339_v53 }
 0x2a5   : > { %v1330_v45 = vsel %vm1209_vm3, %v8565_v52, 0.0 }
 0x2a6   : > { %v8569_v19 = vpop.eup %7786  ;;  %1331 = vadd.xlane.f32.xlu0 %v1330_v45 }
 0x2a7   : > { %v1333_v23 = vsel %vm1209_vm3, %v8569_v19, 0.0 }
 0x2a8   : > { %v8573_v28 = vpop.eup %7788  ;;  %1334 = vadd.xlane.f32.xlu1 %v1333_v23 }
 0x2a9   : > { %v1348_v20 = vsel %vm1209_vm3, %v8573_v28, 0.0 }
 0x2aa   : > { %v8577_v25 = vpop.eup %7790  ;;  %1349 = vadd.xlane.f32.xlu0 %v1348_v20 }
 0x2ab   : > { %v1351_v24 = vsel %vm1209_vm3, %v8577_v25, 0.0 }
 0x2ac   : > { %v8581_v42 = vpop.eup %7792  ;;  %1352 = vadd.xlane.f32.xlu1 %v1351_v24 }
 0x2ad   : > { %v1342_v40 = vsel %vm1209_vm3, %v8581_v42, 0.0 }
 0x2ae   : > { %v8585_v43 = vpop.eup %7794  ;;  %1343 = vadd.xlane.f32.xlu0 %v1342_v40 }
 0x2af   : > { %v1345_v48 = vsel %vm1209_vm3, %v8585_v43, 0.0 }
 0x2b0   : > { %1346 = vadd.xlane.f32.xlu1 %v1345_v48 }
 0x317   : > { %v1314_v51 = vpop.xlane.xlu0 %1313 }
 0x318   : > { %7796 = vrcp.f32 %v1314_v51  ;;  %v8023_v51 = vld [vmem:[%s8229_s21 + $0x18] sm:$0xff]  }
 0x31b   : > { %v1308_v0 = vpop.xlane.xlu0 %1307  ;;  %v1317_v54 = vpop.xlane.xlu1 %1316 }
 0x31c   : > { %7798 = vrcp.f32 %v1317_v54  ;;  %v8025_v54 = vld [vmem:[%s8229_s21 + $0x28] sm:$0xff]  }
 0x31d   : > { %7800 = vrcp.f32 %v1308_v0  ;;  %v8024_v0 = vld [vmem:[%s8229_s21 + $0x20] sm:$0xff]  }
 0x31f   : > { %v1311_v55 = vpop.xlane.xlu1 %1310 }
 0x320   : > { %7802 = vrcp.f32 %v1311_v55  ;;  %v8026_v55 = vld [vmem:[%s8229_s21 + $0x30] sm:$0xff]  }
 0x322   : > { %v7797_v57 = vpop.eup %7796 }
 0x323   : > { %v1372_v3 = vmul.f32 %v7797_v57, %v8513_v7  ;;  %v8027_v57 = vld [vmem:[%s8229_s21 + $0x38] sm:$0xff]  }
 0x326   : > { %v7799_v10 = vpop.eup %7798 }
 0x327   : > { %v1326_v31 = vpop.xlane.xlu0 %1325  ;;  %v7801_v61 = vpop.eup %7800  ;;  %v1373_v30 = vmul.f32 %v7799_v10, %v8520_v26  ;;  %v7750_v10 = vld [vmem:[%s10332_s5 + $0x10] sm:$0xff]  }
 0x328   : > { %7804 = vrcp.f32 %v1326_v31  ;;  %v1370_v32 = vmul.f32 %v7801_v61, %v8517_v38  ;;  %v7751_v31 = vld [vmem:[%s10332_s5 + $0x18] sm:$0xff]  }
 0x329   : > { %v1329_v29 = vpop.xlane.xlu1 %1328  ;;  %v1387_v13 = vpack.c.bf16 %v1373_v30, %v1372_v3 }
 0x32a   : > { %v7803_v35 = vpop.eup %7802  ;;  %7806 = vrcp.f32 %v1329_v29 }
 0x32b   : > { %v1371_v36 = vmul.f32 %v7803_v35, %v8527_v44  ;;  %v1320_v47 = vpop.xlane.xlu0 %1319  ;;  %7054 = vmatmul.mubr.msk.bf16.vlgmr.msra.gmra.mrb[48].mxu1 %vm1209_vm3, %v1387_v13 }
 0x32c   : > { %7808 = vrcp.f32 %v1320_v47  ;;  %7064 = vmatpush3.bf16.msra.mxu1 %v825_v62  ;;  %7065 = vmatprep.mubr.msk.bf16.mxu1 %vm8109_vm1, %v8108_v14 }
 0x32d   : > { %v1323_v7 = vpop.xlane.xlu1 %1322  ;;  %v1386_v33 = vpack.c.bf16 %v1371_v36, %v1370_v32  ;;  %7075 = vmatprep.subr.bf16.mxu1 %v8108_v14 }
 0x32e   : > { %7810 = vrcp.f32 %v1323_v7 }
 0x32f   : > { %v1338_v26 = vpop.xlane.xlu0 %1337  ;;  %7048 = vmatmul.mubr.msk.bf16.vlgmr.msra.gmra.mrb[32].mxu0 %vm1209_vm3, %v1386_v33 }
 0x330   : > { %7812 = vrcp.f32 %v1338_v26  ;;  %7058 = vmatpush3.bf16.msra.mxu0 %v824_v1  ;;  %7059 = vmatprep.mubr.msk.bf16.mxu0 %vm8109_vm1, %v8108_v14 }
 0x331   : > { %v1341_v39 = vpop.xlane.xlu1 %1340  ;;  %7069 = vmatprep.subr.bf16.mxu0 %v8108_v14 }
 0x332   : > { %v7805_v58 = vpop.eup %7804  ;;  %7814 = vrcp.f32 %v1341_v39 }
 0x333   : > { %v1332_v62 = vpop.xlane.xlu0 %1331  ;;  %v1376_v44 = vmul.f32 %v7805_v58, %v8536_v27 }
 0x334   : > { %v7807_v38 = vpop.eup %7806  ;;  %7816 = vrcp.f32 %v1332_v62 }
 0x335   : > { %v1377_v34 = vmul.f32 %v7807_v38, %v8541_v59  ;;  %v1335_v22 = vpop.xlane.xlu1 %1334 }
 0x336   : > { %v7809_v41 = vpop.eup %7808  ;;  %7818 = vrcp.f32 %v1335_v22 }
 0x337   : > { %v1350_v56 = vpop.xlane.xlu0 %1349  ;;  %v1389_v60 = vpack.c.bf16 %v1377_v34, %v1376_v44  ;;  %v1374_v49 = vmul.f32 %v7809_v41, %v8546_v5 }
 0x338   : > { %v7811_v1 = vpop.eup %7810  ;;  %7820 = vrcp.f32 %v1350_v56 }
 0x339   : > { %v1375_v50 = vmul.f32 %v7811_v1, %v8551_v16  ;;  %7066 = vmatmul.mubr.msk.bf16.vlgmr.msra.gmra.mrb[52].mxu1 %vm1209_vm3, %v1389_v60  ;;  %v1353_v53 = vpop.xlane.xlu1 %1352 }
 0x33a   : > { %v7813_v45 = vpop.eup %7812  ;;  %7076 = vmatpush3.bf16.msra.mxu1 %v827_v8  ;;  %7822 = vrcp.f32 %v1353_v53  ;;  %7077 = vmatprep.mubr.msk.bf16.mxu1 %vm8109_vm1, %v8108_v14 }
 0x33b   : > { %v1344_v27 = vpop.xlane.xlu0 %1343  ;;  %v1388_v59 = vpack.c.bf16 %v1375_v50, %v1374_v49  ;;  %7087 = vmatprep.subr.bf16.mxu1 %v8108_v14  ;;  %v1380_v5 = vmul.f32 %v7813_v45, %v8556_v37 }
 0x33c   : > { %v7815_v23 = vpop.eup %7814  ;;  %7824 = vrcp.f32 %v1344_v27 }
 0x33d   : > { %v1381_v16 = vmul.f32 %v7815_v23, %v8561_v46  ;;  %7060 = vmatmul.mubr.msk.bf16.vlgmr.msra.gmra.mrb[36].mxu0 %vm1209_vm3, %v1388_v59  ;;  %v1347_v20 = vpop.xlane.xlu1 %1346 }
 0x33e   : > { %v7817_v24 = vpop.eup %7816  ;;  %7070 = vmatpush3.bf16.msra.mxu0 %v826_v11  ;;  %7826 = vrcp.f32 %v1347_v20  ;;  %7071 = vmatprep.mubr.msk.bf16.mxu0 %vm8109_vm1, %v8108_v14  ;;  %v7748_v11 = vld [vmem:[%s10328_s1 + $0x10] sm:$0xff]  }
 0x33f   : > { %v1391_v63 = vpack.c.bf16 %v1381_v16, %v1380_v5  ;;  %7081 = vmatprep.subr.bf16.mxu0 %v8108_v14  ;;  %v1378_v37 = vmul.f32 %v7817_v24, %v8565_v52 }
 0x340   : > { %v7819_v8 = vpop.eup %7818 }
 0x341   : > { %v1379_v46 = vmul.f32 %v7819_v8, %v8569_v19  ;;  %7078 = vmatmul.mubr.msk.bf16.vlgmr.msra.gmra.mrb[56].mxu1 %vm1209_vm3, %v1391_v63 }
 0x342   : > { %v7821_v2 = vpop.eup %7820  ;;  %7088 = vmatpush3.bf16.msra.mxu1 %v829_v18  ;;  %7089 = vmatprep.mubr.msk.bf16.mxu1 %vm8109_vm1, %v8108_v14 }
 0x343   : > { %v1390_v6 = vpack.c.bf16 %v1379_v46, %v1378_v37  ;;  %7113 = vmatprep.subr.bf16.mxu1 %v7746_v4  ;;  %v1384_v19 = vmul.f32 %v7821_v2, %v8573_v28 }
 0x344   : > { %v7823_v52 = vpop.eup %7822 }
 0x345   : > { %v1385_v40 = vmul.f32 %v7823_v52, %v8577_v25  ;;  %7072 = vmatmul.mubr.msk.bf16.vlgmr.msra.gmra.mrb[40].mxu0 %vm1209_vm3, %v1390_v6 }
 0x346   : > { %v7825_v48 = vpop.eup %7824  ;;  %7082 = vmatpush3.bf16.msra.mxu0 %v828_v21  ;;  %7083 = vmatprep.mubr.msk.bf16.mxu0 %vm8109_vm1, %v8108_v14  ;;  %v7749_v21 = vld [vmem:[%s10328_s1 + $0x18] sm:$0xff]  }
 0x347   : > { %v1393_v9 = vpack.c.bf16 %v1385_v40, %v1384_v19  ;;  %7093 = vmatprep.subr.bf16.mxu0 %v7748_v11  ;;  %v1382_v28 = vmul.f32 %v7825_v48, %v8581_v42  ;;  %v8021_v42 = vld [vmem:[%s8229_s21 + $0x8] sm:$0xff]   ;;  %v8759_v40 = vld [vmem:[%s10329_s2 + $0x1] ss:$0 sm:$0xff] }
 0x348   : > { %v7827_v18 = vpop.eup %7826 }
 0x349   : > { %v1383_v25 = vmul.f32 %v7827_v18, %v8585_v43  ;;  %7090 = vmatmul.mubr.msk.bf16.vlgmr.msra.gmra.mrb[60].mxu1 %vm1209_vm3, %v1393_v9  ;;  %v8022_v43 = vld [vmem:[%s8229_s21 + $0x10] sm:$0xff]  }
 0x34a   : > { %7114 = vmatpush3.bf16.msra.mxu1 %v7746_v4  ;;  %7117 = vmatprep.mubr.msk.bf16.mxu1 %vm444_vm0, %v8020_v12 }
 0x34b   : > { %v1392_v17 = vpack.c.bf16 %v1383_v25, %v1382_v28  ;;  %7115 = vmatprep.subr.bf16.mxu1 %v7747_v15 }
 0x34d   : > { %7084 = vmatmul.mubr.msk.bf16.vlgmr.msra.gmra.mrb[44].mxu0 %vm1209_vm3, %v1392_v17 }
 0x34e   : > { %7116 = vmatpush3.bf16.msra.mxu1 %v7747_v15  ;;  %7094 = vmatpush3.bf16.msra.mxu0 %v7748_v11  ;;  %v8754_v11 = vld [vmem:[%s10331_s4 + $0x1] ss:$0 sm:$0xff] }
 0x34f   : > { %7095 = vmatprep.subr.bf16.mxu0 %v7749_v21  ;;  %7097 = vmatprep.mubr.msk.bf16.mxu0 %vm444_vm0, %v8020_v12 }
 0x350   : > { %7153 = vmatprep.subr.bf16.mxu1 %v8108_v14 }
 0x351   : > { %7118 = vmatmul.mubr.msk.bf16.vlgmr.msra.gmra.mrb[64].mxu1 %vm444_vm0, %v8021_v42 }
 0x352   : > { %7096 = vmatpush3.bf16.msra.mxu0 %v7749_v21  ;;  %7121 = vmatprep.mubr.msk.bf16.mxu1 %vm444_vm0, %v8022_v43 }
 0x353   : > { %7133 = vmatprep.subr.bf16.mxu0 %v7750_v10 }
 0x355   : > { %7098 = vmatmul.mubr.msk.bf16.vlgmr.msra.gmra.mrb[48].mxu0 %vm444_vm0, %v8021_v42 }
 0x356   : > { %7101 = vmatprep.mubr.msk.bf16.mxu0 %vm444_vm0, %v8022_v43  ;;  %7134 = vmatpush3.bf16.msra.mxu0 %v7750_v10 }
 0x357   : > { %7135 = vmatprep.subr.bf16.mxu0 %v7751_v31 }
 0x359   : > { %7122 = vmatmul.mubr.msk.bf16.gmra.mrb[68].mxu1 %vm444_vm0, %v8023_v51 }
 0x35a   : > { %7125 = vmatprep.mubr.msk.bf16.mxu1 %vm444_vm0, %v8024_v0  ;;  %7136 = vmatpush3.bf16.msra.mxu0 %v7751_v31 }
 0x35b   : > { %7177 = vmatprep.subr.bf16.mxu0 %v8108_v14 }
 0x35d   : > { %7102 = vmatmul.mubr.msk.bf16.gmra.mrb[52].mxu0 %vm444_vm0, %v8023_v51 }
 0x35e   : > { %7105 = vmatprep.mubr.msk.bf16.mxu0 %vm444_vm0, %v8024_v0 }
 0x361   : > { %7126 = vmatmul.mubr.msk.bf16.gmra.mrb[72].mxu1 %vm444_vm0, %v8025_v54 }
 0x362   : > { %7129 = vmatprep.mubr.msk.bf16.mxu1 %vm444_vm0, %v8026_v55 }
 0x365   : > { %7106 = vmatmul.mubr.msk.bf16.gmra.mrb[56].mxu0 %vm444_vm0, %v8025_v54 }
 0x366   : > { %7109 = vmatprep.mubr.msk.bf16.mxu0 %vm444_vm0, %v8026_v55 }
 0x369   : > { %7130 = vmatmul.mubr.msk.bf16.gmra.mrb[76].mxu1 %vm444_vm0, %v8027_v57 }
 0x36a   : > { %7155 = vmatprep.mubr.msk.bf16.mxu1 %vm8109_vm1, %v8108_v14 }
 0x36d   : > { %7110 = vmatmul.mubr.msk.bf16.gmra.mrb[60].mxu0 %vm444_vm0, %v8027_v57 }
 0x36e   : > { %7137 = vmatprep.mubr.msk.bf16.mxu0 %vm444_vm0, %v8020_v12 }
 0x375   : > { %7138 = vmatmul.mubr.msk.bf16.vlgmr.msra.gmra.mrb[64].mxu0 %vm444_vm0, %v8021_v42 }
 0x376   : > { %7141 = vmatprep.mubr.msk.bf16.mxu0 %vm444_vm0, %v8022_v43 }
 0x37d   : > { %7142 = vmatmul.mubr.msk.bf16.gmra.mrb[68].mxu0 %vm444_vm0, %v8023_v51 }
 0x37e   : > { %7145 = vmatprep.mubr.msk.bf16.mxu0 %vm444_vm0, %v8024_v0 }
 0x385   : > { %7146 = vmatmul.mubr.msk.bf16.gmra.mrb[72].mxu0 %vm444_vm0, %v8025_v54 }
 0x386   : > { %7149 = vmatprep.mubr.msk.bf16.mxu0 %vm444_vm0, %v8026_v55 }
 0x38d   : > { %7150 = vmatmul.mubr.msk.bf16.gmra.mrb[76].mxu0 %vm444_vm0, %v8027_v57 }
 0x38e   : > { %7179 = vmatprep.mubr.msk.bf16.mxu0 %vm8109_vm1, %v8108_v14 }
 0x3fe   : > { %v8703_v61 = vpop.f32.mrb[48].mxu1 }
 0x3ff   : > { %v7055_v3 = vpop.f32.mrb[49].mxu1 }
 0x400   : > { %v8705_v30 = vpop.f32.mrb[50].mxu1 }
 0x401   : > { %v7056_v35 = vpop.f32.mrb[51].mxu1 }
 0x402   : > { %v8709_v13 = vpop.f32.mrb[32].mxu0 }
 0x403   : > { %v7049_v32 = vpop.f32.mrb[33].mxu0 }
 0x404   : > { %v8711_v36 = vpop.f32.mrb[34].mxu0 }
 0x405   : > { %v7050_v7 = vpop.f32.mrb[35].mxu0 }
 0x40c   : > { %v8715_v33 = vpop.f32.mrb[52].mxu1 }
 0x40d   : > { %v7067_v26 = vpop.f32.mrb[53].mxu1 }
 0x40e   : > { %v8717_v39 = vpop.f32.mrb[54].mxu1 }
 0x40f   : > { %v7068_v62 = vpop.f32.mrb[55].mxu1 }
 0x410   : > { %v8721_v38 = vpop.f32.mrb[36].mxu0 }
 0x411   : > { %v7061_v44 = vpop.f32.mrb[37].mxu0 }
 0x412   : > { %v8723_v34 = vpop.f32.mrb[38].mxu0 }
 0x413   : > { %v7062_v41 = vpop.f32.mrb[39].mxu0 }
 0x414   : > { %v8727_v56 = vpop.f32.mrb[56].mxu1 }
 0x415   : > { %v7079_v60 = vpop.f32.mrb[57].mxu1 }
 0x416   : > { %v8729_v1 = vpop.f32.mrb[58].mxu1 }
 0x417   : > { %v7080_v50 = vpop.f32.mrb[59].mxu1 }
 0x418   : > { %v8733_v53 = vpop.f32.mrb[40].mxu0 }
 0x419   : > { %v7073_v45 = vpop.f32.mrb[41].mxu0 }
 0x41a   : > { %v8735_v27 = vpop.f32.mrb[42].mxu0 }
 0x41b   : > { %v7074_v23 = vpop.f32.mrb[43].mxu0 }
 0x41c   : > { %v8739_v5 = vpop.f32.mrb[60].mxu1 }
 0x41d   : > { %v7091_v16 = vpop.f32.mrb[61].mxu1 }
 0x41e   : > { %v8741_v20 = vpop.f32.mrb[62].mxu1 }
 0x41f   : > { %v7092_v63 = vpop.f32.mrb[63].mxu1 }
 0x420   : > { %v8745_v4 = vpop.f32.mrb[44].mxu0 }
 0x421   : > { %v7085_v8 = vpop.f32.mrb[45].mxu0 }
 0x422   : > { %v8747_v37 = vpop.f32.mrb[46].mxu0 }
 0x423   : > { %v7086_v2 = vpop.f32.mrb[47].mxu0 }
 0x424   : > { %v7119_v6 = vpop.f32.mrb[64].mxu1 }
 0x425   : > { %v1936_v52 = vpop.f32.mrb[65].mxu1  ;;  %v1945_v48 = vadd.f32 %v7119_v6, %v8754_v11 }
 0x426   : > { %v7120_v19 = vpop.f32.mrb[66].mxu1  ;;  %v1937_v18 = vadd.f32 %v8754_v11, %v1936_v52 }
 0x427   : > { %v1948_v9 = vadd.f32 %v7120_v19, %v8754_v11  ;;  %v1939_v15 = vpop.f32.mrb[67].mxu1 }
 0x428   : > { %v1940_v28 = vadd.f32 %v8754_v11, %v1939_v15  ;;  %v7099_v25 = vpop.f32.mrb[48].mxu0 }
 0x429   : > { %v2130_v12 = vpack.c.bf16 %v1948_v9, %v1945_v48  ;;  %v1823_v17 = vadd.f32 %v7099_v25, %v8759_v40  ;;  %v1814_v21 = vpop.f32.mrb[49].mxu0 }
 0x42a   : > { %v2129_v42 = vpack.c.bf16 %v1940_v28, %v1937_v18  ;;  %v1815_v43 = vadd.f32 %v8759_v40, %v1814_v21  ;;  %v7100_v51 = vpop.f32.mrb[50].mxu0 }
 0x42b   : > { %v1826_v0 = vadd.f32 %v7100_v51, %v8759_v40  ;;  %v1817_v54 = vpop.f32.mrb[51].mxu0  ;;  %v2199_v52 = vsel %vm832_vm2, %v2130_v12, 0 }
 0x42c   : > { %v1818_v55 = vadd.f32 %v8759_v40, %v1817_v54  ;;  %v2152_v57 = vsel %vm832_vm2, %v2129_v42, 0  ;;  %v7123_v10 = vpop.f32.mrb[68].mxu1 }
 0x42d   : > { %v2122_v31 = vpack.c.bf16 %v1826_v0, %v1823_v17  ;;  %7154 = vmatpush3.bf16.xpose.msra.mxu1 %v2152_v57  ;;  %v8771_v3 = vadd.f32 %v7123_v10, %v8754_v11  ;;  %v1952_v35 = vpop.f32.mrb[69].mxu1 }
 0x42e   : > { %v2121_v32 = vpack.c.bf16 %v1818_v55, %v1815_v43  ;;  %v1953_v7 = vadd.f32 %v8754_v11, %v1952_v35  ;;  %v7124_v26 = vpop.f32.mrb[70].mxu1  ;;  %7159 = vmatprep.subr.bf16.mxu1 %v8108_v14 }
 0x42f   : > { %v8776_v62 = vadd.f32 %v7124_v26, %v8754_v11  ;;  %v1955_v44 = vpop.f32.mrb[71].mxu1 }
 0x430   : > { %v1956_v41 = vadd.f32 %v8754_v11, %v1955_v44  ;;  %v7103_v60 = vpop.f32.mrb[52].mxu0 }
 0x431   : > { %v2132_v50 = vpack.c.bf16 %v8776_v62, %v8771_v3  ;;  %v8782_v45 = vadd.f32 %v7103_v60, %v8759_v40  ;;  %v1830_v23 = vpop.f32.mrb[53].mxu0 }
 0x432   : > { %v2131_v16 = vpack.c.bf16 %v1956_v41, %v1953_v7  ;;  %v1831_v63 = vadd.f32 %v8759_v40, %v1830_v23  ;;  %v7104_v8 = vpop.f32.mrb[54].mxu0 }
 0x433   : > { %v8786_v2 = vadd.f32 %v7104_v8, %v8759_v40  ;;  %v1833_v6 = vpop.f32.mrb[55].mxu0 }
 0x434   : > { %7156 = vmatmul.mubr.msk.bf16.vlgmr.msra.gmra.mrb[80].mxu1 %vm832_vm2, %v2121_v32  ;;  %v1834_v19 = vadd.f32 %v8759_v40, %v1833_v6  ;;  %v7127_v48 = vpop.f32.mrb[72].mxu1  ;;  %v2246_v32 = vsel %vm832_vm2, %v2131_v16, 0 }
 0x435   : > { %7160 = vmatpush3.bf16.xpose.msra.mxu1 %v2199_v52  ;;  %v2124_v9 = vpack.c.bf16 %v8786_v2, %v8782_v45  ;;  %7161 = vmatprep.mubr.msk.bf16.mxu1 %vm8109_vm1, %v8108_v14  ;;  %v1977_v15 = vadd.f32 %v7127_v48, %v8754_v11  ;;  %v1968_v18 = vpop.f32.mrb[73].mxu1 }
 0x436   : > { %v2123_v28 = vpack.c.bf16 %v1834_v19, %v1831_v63  ;;  %7165 = vmatprep.subr.bf16.mxu1 %v8108_v14  ;;  %v1969_v25 = vadd.f32 %v8754_v11, %v1968_v18  ;;  %v7128_v17 = vpop.f32.mrb[74].mxu1 }
 0x437   : > { %v1980_v12 = vadd.f32 %v7128_v17, %v8754_v11  ;;  %v1971_v21 = vpop.f32.mrb[75].mxu1 }
 0x438   : > { %v1972_v42 = vadd.f32 %v8754_v11, %v1971_v21  ;;  %v7107_v43 = vpop.f32.mrb[56].mxu0 }
 0x439   : > { %v2134_v51 = vpack.c.bf16 %v1980_v12, %v1977_v15  ;;  %v1855_v0 = vadd.f32 %v7107_v43, %v8759_v40  ;;  %v1846_v54 = vpop.f32.mrb[57].mxu0  ;;  %v2293_v12 = vsel %vm832_vm2, %v2132_v50, 0 }
 0x43a   : > { %v2133_v55 = vpack.c.bf16 %v1972_v42, %v1969_v25  ;;  %v1847_v57 = vadd.f32 %v8759_v40, %v1846_v54  ;;  %v7108_v10 = vpop.f32.mrb[58].mxu0 }
 0x43b   : > { %v1858_v3 = vadd.f32 %v7108_v10, %v8759_v40  ;;  %v1849_v35 = vpop.f32.mrb[59].mxu0 }
 0x43c   : > { %7162 = vmatmul.mubr.msk.bf16.vlgmr.msra.gmra.mrb[84].mxu1 %vm832_vm2, %v2122_v31  ;;  %v7131_v7 = vpop.f32.mrb[76].mxu1  ;;  %v2340_v26 = vsel %vm832_vm2, %v2133_v55, 0  ;;  %v1850_v62 = vadd.f32 %v8759_v40, %v1849_v35 }
 0x43d   : > { %7166 = vmatpush3.bf16.xpose.msra.mxu1 %v2246_v32  ;;  %7167 = vmatprep.mubr.msk.bf16.mxu1 %vm8109_vm1, %v8108_v14  ;;  %v1993_v44 = vadd.f32 %v7131_v7, %v8754_v11  ;;  %v1984_v41 = vpop.f32.mrb[77].mxu1  ;;  %v2126_v60 = vpack.c.bf16 %v1858_v3, %v1855_v0 }
 0x43e   : > { %7171 = vmatprep.subr.bf16.mxu1 %v8108_v14  ;;  %v1985_v45 = vadd.f32 %v8754_v11, %v1984_v41  ;;  %7178 = vmatpush3.bf16.xpose.msra.mxu0 %v2340_v26  ;;  %v7132_v31 = vpop.f32.mrb[78].mxu1  ;;  %v2125_v23 = vpack.c.bf16 %v1850_v62, %v1847_v57 }
 0x43f   : > { %v1996_v16 = vadd.f32 %v7132_v31, %v8754_v11  ;;  %v1987_v63 = vpop.f32.mrb[79].mxu1  ;;  %7189 = vmatprep.subr.bf16.mxu0 %v8108_v14 }
 0x440   : > { %v1988_v8 = vadd.f32 %v8754_v11, %v1987_v63  ;;  %v7111_v2 = vpop.f32.mrb[60].mxu0 }
 0x441   : > { %v2136_v6 = vpack.c.bf16 %v1996_v16, %v1993_v44  ;;  %v1871_v52 = vadd.f32 %v7111_v2, %v8759_v40  ;;  %v1862_v19 = vpop.f32.mrb[61].mxu0 }
 0x442   : > { %v2135_v48 = vpack.c.bf16 %v1988_v8, %v1985_v45  ;;  %v1863_v15 = vadd.f32 %v8759_v40, %v1862_v19  ;;  %v7112_v18 = vpop.f32.mrb[62].mxu0 }
 0x443   : > { %v1874_v25 = vadd.f32 %v7112_v18, %v8759_v40  ;;  %v1865_v17 = vpop.f32.mrb[63].mxu0  ;;  %v2481_v50 = vsel %vm832_vm2, %v2136_v6, 0 }
 0x444   : > { %7168 = vmatmul.mubr.msk.bf16.vlgmr.msra.gmra.mrb[88].mxu1 %vm832_vm2, %v2123_v28  ;;  %v2434_v21 = vsel %vm832_vm2, %v2135_v48, 0  ;;  %v1866_v11 = vadd.f32 %v8759_v40, %v1865_v17  ;;  %v2387_v40 = vsel %vm832_vm2, %v2134_v51, 0  ;;  %v6447_v28 = vld [vmem:[%s10333_s6 + $0x1] ss:$0 sm:$0xff] }
 0x445   : > { %7172 = vmatpush3.bf16.xpose.msra.mxu1 %v2293_v12  ;;  %7173 = vmatprep.mubr.msk.bf16.mxu1 %vm8109_vm1, %v8108_v14  ;;  %v2128_v42 = vpack.c.bf16 %v1874_v25, %v1871_v52 }
 0x446   : > { %7183 = vmatprep.subr.bf16.mxu1 %v8108_v14  ;;  %7180 = vmatmul.mubr.msk.bf16.vlgmr.msra.gmra.mrb[80].mxu0 %vm832_vm2, %v2125_v23  ;;  %v2127_v43 = vpack.c.bf16 %v1866_v11, %v1863_v15 }
 0x447   : > { %7190 = vmatpush3.bf16.xpose.msra.mxu0 %v2434_v21  ;;  %7191 = vmatprep.mubr.msk.bf16.mxu0 %vm8109_vm1, %v8108_v14 }
 0x448   : > { %7201 = vmatprep.subr.bf16.mxu0 %v8108_v14 }
 0x44c   : > { %7174 = vmatmul.mubr.msk.bf16.vlgmr.msra.gmra.mrb[92].mxu1 %vm832_vm2, %v2124_v9  ;;  %v7139_v9 = vpop.f32.mrb[64].mxu0 }
 0x44d   : > { %7184 = vmatpush3.bf16.xpose.msra.mxu1 %v2387_v40  ;;  %7185 = vmatprep.mubr.msk.bf16.mxu1 %vm8109_vm1, %v8108_v14  ;;  %v2067_v51 = vadd.f32 %v7139_v9, %v6447_v28  ;;  %v2058_v0 = vpop.f32.mrb[65].mxu0 }
 0x44e   : > { %7195 = vmatprep.subr.bf16.mxu1 %v8108_v14  ;;  %7192 = vmatmul.mubr.msk.bf16.vlgmr.msra.gmra.mrb[84].mxu0 %vm832_vm2, %v2127_v43  ;;  %v2059_v54 = vadd.f32 %v6447_v28, %v2058_v0  ;;  %v7140_v55 = vpop.f32.mrb[66].mxu0 }
 0x44f   : > { %7203 = vmatprep.mubr.msk.bf16.mxu0 %vm8109_vm1, %v8108_v14  ;;  %v2070_v57 = vadd.f32 %v7140_v55, %v6447_v28  ;;  %v2061_v10 = vpop.f32.mrb[67].mxu0 }
 0x450   : > { %v2062_v3 = vadd.f32 %v6447_v28, %v2061_v10  ;;  %v7143_v32 = vpop.f32.mrb[68].mxu0  ;;  %v8889_v10 = vld [vmem:[%s10334_s7 + $0x10] sm:$0xff] }
 0x451   : > { %v2138_v35 = vpack.c.bf16 %v2070_v57, %v2067_v51  ;;  %v8848_v26 = vadd.f32 %v7143_v32, %v6447_v28  ;;  %v2074_v62 = vpop.f32.mrb[69].mxu0  ;;  %v8897_v32 = vld [vmem:[%s10334_s7 + $0x18] sm:$0xff] }
 0x452   : > { %v2137_v7 = vpack.c.bf16 %v2062_v3, %v2059_v54  ;;  %v8850_v44 = vadd.f32 %v6447_v28, %v2074_v62  ;;  %v7144_v41 = vpop.f32.mrb[70].mxu0 }
 0x453   : > { %v2077_v45 = vpop.f32.mrb[71].mxu0 }
 0x454   : > { %7186 = vmatmul.mubr.msk.bf16.vlgmr.msra.gmra.mrb[96].mxu1 %vm832_vm2, %v2126_v60  ;;  %7202 = vmatpush3.bf16.msra.mxu0 %v2137_v7  ;;  %v8853_v60 = vadd.f32 %v7144_v41, %v6447_v28  ;;  %v8856_v31 = vadd.f32 %v6447_v28, %v2077_v45 }
 0x455   : > { %7196 = vmatpush3.bf16.xpose.msra.mxu1 %v2481_v50  ;;  %7197 = vmatprep.mubr.msk.bf16.mxu1 %vm8109_vm1, %v8108_v14 }
 0x456   : > { %7207 = vmatprep.subr.bf16.mxu1 %v8108_v14  ;;  %7213 = vmatprep.subr.bf16.mxu0 %v8108_v14  ;;  %v2140_v16 = vpack.c.bf16 %v8853_v60, %v8848_v26  ;;  %v2139_v2 = vpack.c.bf16 %v8856_v31, %v8850_v44 }
 0x458   : > { %v7147_v23 = vpop.f32.mrb[72].mxu0 }
 0x459   : > { %v8860_v63 = vadd.f32 %v7147_v23, %v6447_v28  ;;  %v2090_v8 = vpop.f32.mrb[73].mxu0 }
 0x45a   : > { %v8864_v6 = vadd.f32 %v6447_v28, %v2090_v8  ;;  %v7148_v52 = vpop.f32.mrb[74].mxu0 }
 0x45b   : > { %v8866_v19 = vadd.f32 %v7148_v52, %v6447_v28  ;;  %v2093_v48 = vpop.f32.mrb[75].mxu0 }
 0x45c   : > { %7198 = vmatmul.mubr.msk.bf16.vlgmr.msra.gmra.mrb[100].mxu1 %vm832_vm2, %v2128_v42  ;;  %v8868_v15 = vadd.f32 %v6447_v28, %v2093_v48 }
 0x45d   : > { %7209 = vmatprep.mubr.msk.bf16.mxu1 %vm8109_vm1, %v8108_v14  ;;  %7208 = vmatpush3.bf16.msra.mxu1 %v2138_v35  ;;  %v2142_v25 = vpack.c.bf16 %v8866_v19, %v8860_v63  ;;  %v7752_v19 = vld [vmem:[%s10328_s1 + $0x20] sm:$0xff]  }
 0x45e   : > { %7219 = vmatprep.subr.bf16.mxu1 %v8108_v14  ;;  %v2141_v21 = vpack.c.bf16 %v8868_v15, %v8864_v6  ;;  %v9112_v6 = vld [vmem:[%s8229_s21] sm:$0xff]  }
 0x460   : > { %v7151_v18 = vpop.f32.mrb[76].mxu0 }
 0x461   : > { %v8872_v17 = vadd.f32 %v7151_v18, %v6447_v28  ;;  %v2106_v12 = vpop.f32.mrb[77].mxu0 }
 0x462   : > { %v8876_v11 = vadd.f32 %v6447_v28, %v2106_v12  ;;  %v7152_v42 = vpop.f32.mrb[78].mxu0 }
 0x463   : > { %v8878_v43 = vadd.f32 %v7152_v42, %v6447_v28  ;;  %v2109_v40 = vpop.f32.mrb[79].mxu0 }
 0x464   : > { %v8880_v50 = vadd.f32 %v6447_v28, %v2109_v40 }
 0x465   : > { %v2144_v9 = vpack.c.bf16 %v8878_v43, %v8872_v17  ;;  %v7753_v43 = vld [vmem:[%s10328_s1 + $0x28] sm:$0xff]  }
 0x507   : > { %v2188_v0 = vpop.f32.mrb[80].mxu1 }
 0x508   : > { %v7157_v54 = vpop.f32.mrb[81].mxu1 }
 0x509   : > { %v2191_v55 = vpop.f32.mrb[82].mxu1 }
 0x50a   : > { %v7158_v57 = vpop.f32.mrb[83].mxu1  ;;  %v8918_v24 = vadd.f32 %v8897_v32, %v2191_v55 }
 0x50f   : > { %v2235_v3 = vpop.f32.mrb[84].mxu1 }
 0x510   : > { %v8892_v35 = vadd.f32 %v8889_v10, %v2235_v3  ;;  %v7163_v28 = vpop.f32.mrb[85].mxu1 }
 0x511   : > { %v2238_v7 = vpop.f32.mrb[86].mxu1 }
 0x512   : > { %v8900_v62 = vadd.f32 %v8897_v32, %v2238_v7  ;;  %v7164_v41 = vpop.f32.mrb[87].mxu1  ;;  %v2530_v45 = vsel %vm1209_vm3, %v8892_v35, -inf }
 0x513   : > { %2531 = vmax.xlane.f32.xlu0 %v2530_v45  ;;  %v8910_v45 = vadd.f32 %v8889_v10, %v2188_v0 }
 0x514   : > { %v2533_v23 = vsel %vm1209_vm3, %v8900_v62, -inf }
 0x515   : > { %2534 = vmax.xlane.f32.xlu1 %v2533_v23  ;;  %v2524_v0 = vsel %vm1209_vm3, %v8910_v45, -inf }
 0x517   : > { %v2282_v8 = vpop.f32.mrb[88].mxu1 }
 0x518   : > { %v7169_v52 = vpop.f32.mrb[89].mxu1 }
 0x519   : > { %v2285_v48 = vpop.f32.mrb[90].mxu1  ;;  %v2376_v18 = vpop.f32.mrb[80].mxu0 }
 0x51a   : > { %v7170_v12 = vpop.f32.mrb[91].mxu1  ;;  %v7181_v42 = vpop.f32.mrb[81].mxu0 }
 0x51b   : > { %v2379_v40 = vpop.f32.mrb[82].mxu0 }
 0x51c   : > { %v7182_v54 = vpop.f32.mrb[83].mxu0 }
 0x51f   : > { %v2329_v57 = vpop.f32.mrb[92].mxu1 }
 0x520   : > { %v8907_v3 = vadd.f32 %v8889_v10, %v2329_v57  ;;  %v7175_v28 = vpop.f32.mrb[93].mxu1 }
 0x521   : > { %v2332_v7 = vpop.f32.mrb[94].mxu1  ;;  %v2470_v41 = vpop.f32.mrb[84].mxu0 }
 0x522   : > { %v8913_v23 = vadd.f32 %v8897_v32, %v2332_v7  ;;  %v7176_v52 = vpop.f32.mrb[95].mxu1  ;;  %v2542_v12 = vsel %vm1209_vm3, %v8907_v3, -inf  ;;  %v7193_v42 = vpop.f32.mrb[85].mxu0 }
 0x523   : > { %2543 = vmax.xlane.f32.xlu0 %v2542_v12  ;;  %v2473_v54 = vpop.f32.mrb[86].mxu0  ;;  %v2527_v12 = vsel %vm1209_vm3, %v8918_v24, -inf  ;;  %v8930_v42 = vadd.f32 %v8889_v10, %v2282_v8 }
 0x524   : > { %v2545_v57 = vsel %vm1209_vm3, %v8913_v23, -inf  ;;  %v7194_v28 = vpop.f32.mrb[87].mxu0 }
 0x525   : > { %2546 = vmax.xlane.f32.xlu1 %v2545_v57 }
 0x527   : > { %2525 = vmax.xlane.f32.xlu0 %v2524_v0  ;;  %v2423_v7 = vpop.f32.mrb[96].mxu1 }
 0x528   : > { %v8925_v52 = vadd.f32 %v8889_v10, %v2423_v7  ;;  %v7187_v46 = vpop.f32.mrb[97].mxu1  ;;  %v8938_v7 = vadd.f32 %v8897_v32, %v2285_v48  ;;  %v8950_v48 = vadd.f32 %v8889_v10, %v2376_v18 }
 0x529   : > { %2528 = vmax.xlane.f32.xlu1 %v2527_v12  ;;  %v2426_v55 = vpop.f32.mrb[98].mxu1  ;;  %v2536_v12 = vsel %vm1209_vm3, %v8930_v42, -inf }
 0x52a   : > { %v8933_v28 = vadd.f32 %v8897_v32, %v2426_v55  ;;  %v7188_v57 = vpop.f32.mrb[99].mxu1  ;;  %v2554_v0 = vsel %vm1209_vm3, %v8925_v52, -inf  ;;  %v2539_v49 = vsel %vm1209_vm3, %v8938_v7, -inf  ;;  %v2548_v18 = vsel %vm1209_vm3, %v8950_v48, -inf }
 0x52b   : > { %2555 = vmax.xlane.f32.xlu0 %v2554_v0 }
 0x52c   : > { %v2557_v46 = vsel %vm1209_vm3, %v8933_v28, -inf }
 0x52d   : > { %2558 = vmax.xlane.f32.xlu1 %v2557_v46 }
 0x52f   : > { %2537 = vmax.xlane.f32.xlu0 %v2536_v12  ;;  %v2517_v8 = vpop.f32.mrb[100].mxu1 }
 0x530   : > { %v8945_v55 = vadd.f32 %v8889_v10, %v2517_v8  ;;  %v7199_v57 = vpop.f32.mrb[101].mxu1  ;;  %v8958_v8 = vadd.f32 %v8897_v32, %v2379_v40 }
 0x531   : > { %2540 = vmax.xlane.f32.xlu1 %v2539_v49  ;;  %v2520_v0 = vpop.f32.mrb[102].mxu1  ;;  %v8963_v49 = vadd.f32 %v8889_v10, %v2470_v41 }
 0x532   : > { %v8953_v59 = vadd.f32 %v8897_v32, %v2520_v0  ;;  %v7200_v46 = vpop.f32.mrb[103].mxu1  ;;  %v2566_v12 = vsel %vm1209_vm3, %v8945_v55, -inf  ;;  %v8968_v0 = vadd.f32 %v8897_v32, %v2473_v54 }
 0x533   : > { %2567 = vmax.xlane.f32.xlu0 %v2566_v12  ;;  %v2551_v46 = vsel %vm1209_vm3, %v8958_v8, -inf  ;;  %v2560_v40 = vsel %vm1209_vm3, %v8963_v49, -inf }
 0x534   : > { %v2569_v57 = vsel %vm1209_vm3, %v8953_v59, -inf  ;;  %v2563_v12 = vsel %vm1209_vm3, %v8968_v0, -inf }
 0x535   : > { %2570 = vmax.xlane.f32.xlu1 %v2569_v57 }
 0x537   : > { %2549 = vmax.xlane.f32.xlu0 %v2548_v18 }
 0x539   : > { %2552 = vmax.xlane.f32.xlu1 %v2551_v46 }
 0x53b   : > { %2561 = vmax.xlane.f32.xlu0 %v2560_v40 }
 0x53d   : > { %2564 = vmax.xlane.f32.xlu1 %v2563_v12 }
 0x5a0   : > { %v2532_v10 = vpop.xlane.xlu0 %2531 }
 0x5a1   : > { %v2574_v41 = vsub.f32 %v8892_v35, %v2532_v10 }
 0x5a2   : > { %v2535_v57 = vpop.xlane.xlu1 %2534 }
 0x5a3   : > { %v2592_v18 = vmul.f32 1.442695, %v2574_v41  ;;  %v2575_v32 = vsub.f32 %v8900_v62, %v2535_v57 }
 0x5a5   : > { %7828 = vpow2.f32 %v2592_v18  ;;  %v2594_v54 = vmul.f32 1.442695, %v2575_v32 }
 0x5a7   : > { %7830 = vpow2.f32 %v2594_v54 }
 0x5af   : > { %v8978_v58 = vpop.eup %7828 }
 0x5b0   : > { %v2544_v46 = vpop.xlane.xlu0 %2543  ;;  %v2626_v40 = vsel %vm1209_vm3, %v8978_v58, 0.0 }
 0x5b1   : > { %v8982_v22 = vpop.eup %7830  ;;  %v2578_v12 = vsub.f32 %v8907_v3, %v2544_v46  ;;  %2627 = vadd.xlane.f32.xlu0 %v2626_v40 }
 0x5b2   : > { %v2547_v29 = vpop.xlane.xlu1 %2546  ;;  %v2629_v35 = vsel %vm1209_vm3, %v8982_v22, 0.0 }
 0x5b3   : > { %v2600_v10 = vmul.f32 1.442695, %v2578_v12  ;;  %v2579_v62 = vsub.f32 %v8913_v23, %v2547_v29  ;;  %2630 = vadd.xlane.f32.xlu1 %v2629_v35 }
 0x5b4   : > { %v2526_v41 = vpop.xlane.xlu0 %2525 }
 0x5b5   : > { %7832 = vpow2.f32 %v2600_v10  ;;  %v2602_v57 = vmul.f32 1.442695, %v2579_v62  ;;  %v2572_v18 = vsub.f32 %v8910_v45, %v2526_v41 }
 0x5b6   : > { %v2529_v32 = vpop.xlane.xlu1 %2528 }
 0x5b7   : > { %7834 = vpow2.f32 %v2602_v57  ;;  %v2588_v54 = vmul.f32 1.442695, %v2572_v18  ;;  %v2573_v47 = vsub.f32 %v8918_v24, %v2529_v32 }
 0x5b8   : > { %v2556_v3 = vpop.xlane.xlu0 %2555 }
 0x5b9   : > { %7836 = vpow2.f32 %v2588_v54  ;;  %v2590_v46 = vmul.f32 1.442695, %v2573_v47  ;;  %v2582_v40 = vsub.f32 %v8925_v52, %v2556_v3 }
 0x5ba   : > { %v2559_v51 = vpop.xlane.xlu1 %2558 }
 0x5bb   : > { %7838 = vpow2.f32 %v2590_v46  ;;  %v2608_v12 = vmul.f32 1.442695, %v2582_v40  ;;  %v2583_v29 = vsub.f32 %v8933_v28, %v2559_v51 }
 0x5bc   : > { %v2538_v23 = vpop.xlane.xlu0 %2537 }
 0x5bd   : > { %7840 = vpow2.f32 %v2608_v12  ;;  %v2610_v35 = vmul.f32 1.442695, %v2583_v29  ;;  %v2576_v45 = vsub.f32 %v8930_v42, %v2538_v23 }
 0x5be   : > { %v2541_v10 = vpop.xlane.xlu1 %2540 }
 0x5bf   : > { %v8993_v62 = vpop.eup %7832  ;;  %7842 = vpow2.f32 %v2610_v35  ;;  %v2596_v24 = vmul.f32 1.442695, %v2576_v45  ;;  %v2577_v41 = vsub.f32 %v8938_v7, %v2541_v10 }
 0x5c0   : > { %v2568_v47 = vpop.xlane.xlu0 %2567  ;;  %v2638_v52 = vsel %vm1209_vm3, %v8993_v62, 0.0 }
 0x5c1   : > { %v8998_v57 = vpop.eup %7834  ;;  %7844 = vpow2.f32 %v2596_v24  ;;  %v2598_v51 = vmul.f32 1.442695, %v2577_v41  ;;  %v2586_v28 = vsub.f32 %v8945_v55, %v2568_v47  ;;  %2639 = vadd.xlane.f32.xlu0 %v2638_v52 }
 0x5c2   : > { %v2571_v18 = vpop.xlane.xlu1 %2570  ;;  %v2641_v42 = vsel %vm1209_vm3, %v8998_v57, 0.0 }
 0x5c3   : > { %v9003_v32 = vpop.eup %7836  ;;  %7846 = vpow2.f32 %v2598_v51  ;;  %v2616_v54 = vmul.f32 1.442695, %v2586_v28  ;;  %v2587_v7 = vsub.f32 %v8953_v59, %v2571_v18  ;;  %2642 = vadd.xlane.f32.xlu1 %v2641_v42 }
 0x5c4   : > { %v2550_v3 = vpop.xlane.xlu0 %2549  ;;  %v2620_v46 = vsel %vm1209_vm3, %v9003_v32, 0.0 }
 0x5c5   : > { %v9008_v40 = vpop.eup %7838  ;;  %7848 = vpow2.f32 %v2616_v54  ;;  %v2618_v55 = vmul.f32 1.442695, %v2587_v7  ;;  %v2580_v12 = vsub.f32 %v8950_v48, %v2550_v3  ;;  %2621 = vadd.xlane.f32.xlu0 %v2620_v46 }
 0x5c6   : > { %v2553_v29 = vpop.xlane.xlu1 %2552  ;;  %v2623_v23 = vsel %vm1209_vm3, %v9008_v40, 0.0 }
 0x5c7   : > { %v9013_v35 = vpop.eup %7840  ;;  %7850 = vpow2.f32 %v2618_v55  ;;  %v2604_v59 = vmul.f32 1.442695, %v2580_v12  ;;  %v2581_v45 = vsub.f32 %v8958_v8, %v2553_v29  ;;  %2624 = vadd.xlane.f32.xlu1 %v2623_v23 }
 0x5c8   : > { %v2562_v10 = vpop.xlane.xlu0 %2561  ;;  %v2650_v24 = vsel %vm1209_vm3, %v9013_v35, 0.0 }
 0x5c9   : > { %v9018_v41 = vpop.eup %7842  ;;  %7852 = vpow2.f32 %v2604_v59  ;;  %v2606_v48 = vmul.f32 1.442695, %v2581_v45  ;;  %v2584_v47 = vsub.f32 %v8963_v49, %v2562_v10  ;;  %2651 = vadd.xlane.f32.xlu0 %v2650_v24 }
 0x5ca   : > { %v2565_v52 = vpop.xlane.xlu1 %2564  ;;  %v2653_v51 = vsel %vm1209_vm3, %v9018_v41, 0.0 }
 0x5cb   : > { %v9023_v28 = vpop.eup %7844  ;;  %7854 = vpow2.f32 %v2606_v48  ;;  %v2612_v8 = vmul.f32 1.442695, %v2584_v47  ;;  %v2585_v18 = vsub.f32 %v8968_v0, %v2565_v52  ;;  %2654 = vadd.xlane.f32.xlu1 %v2653_v51 }
 0x5cc   : > { %v2632_v42 = vsel %vm1209_vm3, %v9023_v28, 0.0 }
 0x5cd   : > { %v9028_v54 = vpop.eup %7846  ;;  %7856 = vpow2.f32 %v2612_v8  ;;  %v2614_v7 = vmul.f32 1.442695, %v2585_v18  ;;  %2633 = vadd.xlane.f32.xlu0 %v2632_v42 }
 0x5ce   : > { %v2635_v49 = vsel %vm1209_vm3, %v9028_v54, 0.0 }
 0x5cf   : > { %v9032_v3 = vpop.eup %7848  ;;  %7858 = vpow2.f32 %v2614_v7  ;;  %2636 = vadd.xlane.f32.xlu1 %v2635_v49 }
 0x5d0   : > { %v2662_v46 = vsel %vm1209_vm3, %v9032_v3, 0.0 }
 0x5d1   : > { %v9036_v0 = vpop.eup %7850  ;;  %2663 = vadd.xlane.f32.xlu0 %v2662_v46 }
 0x5d2   : > { %v2665_v55 = vsel %vm1209_vm3, %v9036_v0, 0.0 }
 0x5d3   : > { %v9040_v12 = vpop.eup %7852  ;;  %2666 = vadd.xlane.f32.xlu1 %v2665_v55 }
 0x5d4   : > { %v2644_v29 = vsel %vm1209_vm3, %v9040_v12, 0.0 }
 0x5d5   : > { %v9044_v23 = vpop.eup %7854  ;;  %2645 = vadd.xlane.f32.xlu0 %v2644_v29 }
 0x5d6   : > { %v2647_v59 = vsel %vm1209_vm3, %v9044_v23, 0.0 }
 0x5d7   : > { %v9048_v45 = vpop.eup %7856  ;;  %2648 = vadd.xlane.f32.xlu1 %v2647_v59 }
 0x5d8   : > { %v2656_v10 = vsel %vm1209_vm3, %v9048_v45, 0.0 }
 0x5d9   : > { %v9052_v24 = vpop.eup %7858  ;;  %2657 = vadd.xlane.f32.xlu0 %v2656_v10 }
 0x5da   : > { %v2659_v48 = vsel %vm1209_vm3, %v9052_v24, 0.0 }
 0x5db   : > { %2660 = vadd.xlane.f32.xlu1 %v2659_v48 }
 0x63e   : > { %v2628_v47 = vpop.xlane.xlu0 %2627 }
 0x63f   : > { %7860 = vrcp.f32 %v2628_v47 }
 0x640   : > { %v2631_v52 = vpop.xlane.xlu1 %2630 }
 0x641   : > { %7862 = vrcp.f32 %v2631_v52 }
 0x649   : > { %v7861_v51 = vpop.eup %7860 }
 0x64a   : > { %v2686_v18 = vmul.f32 %v7861_v51, %v8978_v58 }
 0x64b   : > { %v7863_v8 = vpop.eup %7862 }
 0x64c   : > { %v2687_v42 = vmul.f32 %v7863_v8, %v8982_v22 }
 0x64e   : > { %v2640_v7 = vpop.xlane.xlu0 %2639  ;;  %v2701_v49 = vpack.c.bf16 %v2687_v42, %v2686_v18 }
 0x64f   : > { %7864 = vrcp.f32 %v2640_v7 }
 0x650   : > { %7210 = vmatmul.mubr.msk.bf16.vlgmr.msra.gmra.mrb[104].mxu1 %vm1209_vm3, %v2701_v49  ;;  %v2643_v46 = vpop.xlane.xlu1 %2642 }
 0x651   : > { %7220 = vmatpush3.bf16.msra.mxu1 %v2140_v16  ;;  %7866 = vrcp.f32 %v2643_v46  ;;  %7221 = vmatprep.mubr.msk.bf16.mxu1 %vm8109_vm1, %v8108_v14 }
 0x652   : > { %v2622_v55 = vpop.xlane.xlu0 %2621  ;;  %7231 = vmatprep.subr.bf16.mxu1 %v8108_v14 }
 0x653   : > { %7868 = vrcp.f32 %v2622_v55 }
 0x654   : > { %v2625_v58 = vpop.xlane.xlu1 %2624 }
 0x655   : > { %7870 = vrcp.f32 %v2625_v58 }
 0x656   : > { %v2652_v22 = vpop.xlane.xlu0 %2651 }
 0x657   : > { %7872 = vrcp.f32 %v2652_v22 }
 0x658   : > { %v2655_v29 = vpop.xlane.xlu1 %2654 }
 0x659   : > { %v7865_v59 = vpop.eup %7864  ;;  %7874 = vrcp.f32 %v2655_v29 }
 0x65a   : > { %v2634_v10 = vpop.xlane.xlu0 %2633  ;;  %v2690_v26 = vmul.f32 %v7865_v59, %v8993_v62 }
 0x65b   : > { %v7867_v48 = vpop.eup %7866  ;;  %7876 = vrcp.f32 %v2634_v10 }
 0x65c   : > { %v2691_v60 = vmul.f32 %v7867_v48, %v8998_v57  ;;  %v2637_v16 = vpop.xlane.xlu1 %2636 }
 0x65d   : > { %v7869_v47 = vpop.eup %7868  ;;  %7878 = vrcp.f32 %v2637_v16  ;;  %v9131_v16 = vld [vmem:[%s8229_s21 + $0x8] sm:$0xff]  }
 0x65e   : > { %v2664_v52 = vpop.xlane.xlu0 %2663  ;;  %v2703_v51 = vpack.c.bf16 %v2691_v60, %v2690_v26  ;;  %v2684_v18 = vmul.f32 %v7869_v47, %v9003_v32  ;;  %v7755_v26 = vld [vmem:[%s10330_s3 + $0x28] sm:$0xff]  }
 0x65f   : > { %v7871_v8 = vpop.eup %7870  ;;  %7880 = vrcp.f32 %v2664_v52  ;;  %v9153_v47 = vld [vmem:[%s8229_s21 + $0x28] sm:$0xff]   ;;  %v9158_v52 = vld [vmem:[%s8229_s21 + $0x30] sm:$0xff]  }
 0x660   : > { %v2685_v42 = vmul.f32 %v7871_v8, %v9008_v40  ;;  %7222 = vmatmul.mubr.msk.bf16.vlgmr.msra.gmra.mrb[108].mxu1 %vm1209_vm3, %v2703_v51  ;;  %v2667_v7 = vpop.xlane.xlu1 %2666  ;;  %v9163_v51 = vld [vmem:[%s8229_s21 + $0x38] sm:$0xff]   ;;  %v6476_v8 = vld [vmem:[%s10335_s8 + $0x4] sm:$0xf] }
 0x661   : > { %v7873_v49 = vpop.eup %7872  ;;  %7232 = vmatpush3.bf16.msra.mxu1 %v2142_v25  ;;  %7882 = vrcp.f32 %v2667_v7  ;;  %7233 = vmatprep.mubr.msk.bf16.mxu1 %vm8109_vm1, %v8108_v14 }
 0x662   : > { %v2646_v62 = vpop.xlane.xlu0 %2645  ;;  %v2700_v57 = vpack.c.bf16 %v2685_v42, %v2684_v18  ;;  %7243 = vmatprep.subr.bf16.mxu1 %v8108_v14  ;;  %v2694_v32 = vmul.f32 %v7873_v49, %v9013_v35  ;;  %v3096_v18 = vsel %vm3094_vm4, %v6476_v8, 0  ;;  %v1754_v42 = vld [vmem:[%s10335_s8] sm:$0xf] }
 0x663   : > { %v7875_v46 = vpop.eup %7874  ;;  %7884 = vrcp.f32 %v2646_v62 }
 0x664   : > { %v2695_v40 = vmul.f32 %v7875_v46, %v9018_v41  ;;  %7204 = vmatmul.mubr.msk.bf16.vlgmr.msra.gmra.mrb[88].mxu0 %vm1209_vm3, %v2700_v57  ;;  %v2649_v55 = vpop.xlane.xlu1 %2648 }
 0x665   : > { %v7877_v58 = vpop.eup %7876  ;;  %7214 = vmatpush3.bf16.msra.mxu0 %v2139_v2  ;;  %7886 = vrcp.f32 %v2649_v55  ;;  %7215 = vmatprep.mubr.msk.bf16.mxu0 %vm8109_vm1, %v8108_v14 }
 0x666   : > { %v2705_v63 = vpack.c.bf16 %v2695_v40, %v2694_v32  ;;  %7225 = vmatprep.subr.bf16.mxu0 %v8108_v14  ;;  %v2688_v35 = vmul.f32 %v7877_v58, %v9023_v28  ;;  %v2658_v22 = vpop.xlane.xlu0 %2657 }
 0x667   : > { %v7879_v25 = vpop.eup %7878 }
 0x668   : > { %v2689_v41 = vmul.f32 %v7879_v25, %v9028_v54  ;;  %7234 = vmatmul.mubr.msk.bf16.vlgmr.msra.gmra.mrb[112].mxu1 %vm1209_vm3, %v2705_v63  ;;  %v2661_v44 = vpop.xlane.xlu1 %2660 }
 0x669   : > { %v7881_v31 = vpop.eup %7880  ;;  %7244 = vmatpush3.bf16.msra.mxu1 %v2144_v9  ;;  %7888 = vrcp.f32 %v2661_v44  ;;  %7245 = vmatprep.mubr.msk.bf16.mxu1 %vm8109_vm1, %v8108_v14 }
 0x66a   : > { %v2702_v2 = vpack.c.bf16 %v2689_v41, %v2688_v35  ;;  %7285 = vmatprep.subr.bf16.mxu1 %v7752_v19  ;;  %7890 = vrcp.f32 %v2658_v22  ;;  %v2698_v28 = vmul.f32 %v7881_v31, %v9032_v3  ;;  %v3220_v31 = vsel %vm3094_vm4, %v1754_v42, 0 }
 0x66b   : > { %v7883_v29 = vpop.eup %7882 }
 0x66c   : > { %v2699_v54 = vmul.f32 %v7883_v29, %v9036_v0  ;;  %7216 = vmatmul.mubr.msk.bf16.vlgmr.msra.gmra.mrb[92].mxu0 %vm1209_vm3, %v2702_v2  ;;  %v9198_v2 = vld [vmem:[%s10332_s5 + $0x20] sm:$0xff]  }
 0x66d   : > { %v7885_v59 = vpop.eup %7884  ;;  %7226 = vmatpush3.bf16.msra.mxu0 %v2141_v21  ;;  %7227 = vmatprep.mubr.msk.bf16.mxu0 %vm8109_vm1, %v8108_v14  ;;  %v7754_v21 = vld [vmem:[%s10330_s3 + $0x20] sm:$0xff]  }
 0x66e   : > { %v2707_v17 = vpack.c.bf16 %v2699_v54, %v2698_v28  ;;  %7237 = vmatprep.subr.bf16.mxu0 %v8108_v14  ;;  %v2692_v3 = vmul.f32 %v7885_v59, %v9040_v12 }
 0x66f   : > { %v7887_v9 = vpop.eup %7886 }
 0x670   : > { %v2693_v0 = vmul.f32 %v7887_v9, %v9044_v23  ;;  %7246 = vmatmul.mubr.msk.bf16.vlgmr.msra.gmra.mrb[116].mxu1 %vm1209_vm3, %v2707_v17  ;;  %v10340_v23 = vpack.c.bf16 %v8880_v50, %v8876_v11  ;;  %v9136_v11 = vld [vmem:[%s8229_s21 + $0x10] sm:$0xff]  }
 0x671   : > { %7286 = vmatpush3.bf16.msra.mxu1 %v7752_v19  ;;  %7289 = vmatprep.mubr.msk.bf16.mxu1 %vm444_vm0, %v9112_v6 }
 0x672   : > { %v2704_v15 = vpack.c.bf16 %v2693_v0, %v2692_v3  ;;  %7287 = vmatprep.subr.bf16.mxu1 %v7753_v43 }
 0x673   : > { %v7889_v10 = vpop.eup %7888 }
 0x674   : > { %7228 = vmatmul.mubr.msk.bf16.vlgmr.msra.gmra.mrb[96].mxu0 %vm1209_vm3, %v2704_v15  ;;  %v7891_v12 = vpop.eup %7890  ;;  %v2697_v48 = vmul.f32 %v7889_v10, %v9052_v24  ;;  %v9148_v24 = vld [vmem:[%s8229_s21 + $0x20] sm:$0xff]  }
 0x675   : > { %7238 = vmatpush3.bf16.msra.mxu0 %v10340_v23  ;;  %7288 = vmatpush3.bf16.msra.mxu1 %v7753_v43  ;;  %v2696_v60 = vmul.f32 %v7891_v12, %v9048_v45  ;;  %v9143_v45 = vld [vmem:[%s8229_s21 + $0x18] sm:$0xff]  }
 0x676   : > { %7239 = vmatprep.mubr.msk.bf16.mxu0 %vm8109_vm1, %v8108_v14  ;;  %7305 = vmatprep.subr.bf16.mxu1 %v7754_v21 }
 0x677   : > { %v2706_v50 = vpack.c.bf16 %v2697_v48, %v2696_v60  ;;  %7685 = vmatprep.subr.msk.bf16.mxu0 %vm3094_vm4, %v6476_v8 }
 0x678   : > { %7290 = vmatmul.mubr.msk.bf16.vlgmr.msra.gmra.mrb[120].mxu1 %vm444_vm0, %v9131_v16 }
 0x679   : > { %7293 = vmatprep.mubr.msk.bf16.mxu1 %vm444_vm0, %v9136_v11  ;;  %7306 = vmatpush3.bf16.msra.mxu1 %v7754_v21 }
 0x67a   : > { %7307 = vmatprep.subr.bf16.mxu1 %v7755_v26 }
 0x67c   : > { %7240 = vmatmul.mubr.msk.bf16.vlgmr.msra.gmra.mrb[100].mxu0 %vm1209_vm3, %v2706_v50  ;;  %v6498_v50 = vld [vmem:[%s10329_s2 + $0x2] ss:$0 sm:$0xff] }
 0x67d   : > { %7308 = vmatpush3.bf16.msra.mxu1 %v7755_v26  ;;  %7250 = vmatpush3.bf16.msra.mxu0 %v3096_v18 }
 0x67e   : > { %7345 = vmatprep.subr.bf16.mxu1 %v8108_v14  ;;  %7686 = vmatprep.subr.msk.bf16.mxu0 %vm3094_vm4, %v1754_v42 }
 0x680   : > { %7294 = vmatmul.mubr.msk.bf16.gmra.mrb[124].mxu1 %vm444_vm0, %v9143_v45 }
 0x681   : > { %7297 = vmatprep.mubr.msk.bf16.mxu1 %vm444_vm0, %v9148_v24 }
 0x688   : > { %7298 = vmatmul.mubr.msk.bf16.gmra.mrb[128].mxu1 %vm444_vm0, %v9153_v47 }
 0x689   : > { %7301 = vmatprep.mubr.msk.bf16.mxu1 %vm444_vm0, %v9158_v52 }
 0x690   : > { %7302 = vmatmul.mubr.msk.bf16.gmra.mrb[132].mxu1 %vm444_vm0, %v9163_v51 }
 0x691   : > { %7309 = vmatprep.mubr.msk.bf16.mxu1 %vm444_vm0, %v9112_v6 }
 0x698   : > { %7310 = vmatmul.mubr.msk.bf16.vlgmr.msra.gmra.mrb[136].mxu1 %vm444_vm0, %v9131_v16 }
 0x699   : > { %7313 = vmatprep.mubr.msk.bf16.mxu1 %vm444_vm0, %v9136_v11 }
 0x6a0   : > { %7314 = vmatmul.mubr.msk.bf16.gmra.mrb[140].mxu1 %vm444_vm0, %v9143_v45 }
 0x6a1   : > { %7317 = vmatprep.mubr.msk.bf16.mxu1 %vm444_vm0, %v9148_v24 }
 0x6a8   : > { %7318 = vmatmul.mubr.msk.bf16.gmra.mrb[144].mxu1 %vm444_vm0, %v9153_v47 }
 0x6a9   : > { %7321 = vmatprep.mubr.msk.bf16.mxu1 %vm444_vm0, %v9158_v52 }
 0x6b0   : > { %7322 = vmatmul.mubr.msk.bf16.gmra.mrb[148].mxu1 %vm444_vm0, %v9163_v51 }
 0x6b1   : > { %7347 = vmatprep.mubr.msk.bf16.mxu1 %vm8109_vm1, %v8108_v14 }
 0x723   : > { %v2789_v7 = vpop.f32.mrb[104].mxu1 }
 0x724   : > { %v7211_v49 = vpop.f32.mrb[105].mxu1 }
 0x725   : > { %v2792_v62 = vpop.f32.mrb[106].mxu1 }
 0x726   : > { %v3061_v57 = vpack.c.bf16 %v2792_v62, %v2789_v7  ;;  %v7212_v46 = vpop.f32.mrb[107].mxu1 }
 0x733   : > { %v2877_v32 = vpop.f32.mrb[108].mxu1 }
 0x734   : > { %v7223_v40 = vpop.f32.mrb[109].mxu1 }
 0x735   : > { %v2880_v55 = vpop.f32.mrb[110].mxu1 }
 0x736   : > { %v3063_v58 = vpack.c.bf16 %v2880_v55, %v2877_v32  ;;  %v7224_v63 = vpop.f32.mrb[111].mxu1 }
 0x737   : > { %v2745_v19 = vpop.f32.mrb[88].mxu0 }
 0x738   : > { %v7205_v25 = vpop.f32.mrb[89].mxu0 }
 0x739   : > { %v2748_v35 = vpop.f32.mrb[90].mxu0 }
 0x73a   : > { %v3060_v41 = vpack.c.bf16 %v2748_v35, %v2745_v19  ;;  %v7206_v22 = vpop.f32.mrb[91].mxu0 }
 0x73b   : > { %v2965_v44 = vpop.f32.mrb[112].mxu1 }
 0x73c   : > { %v7235_v29 = vpop.f32.mrb[113].mxu1  ;;  %7251 = vmatprep.mubr.msk.bf16.mxu0 %vm832_vm2, %v3060_v41 }
 0x73d   : > { %v2968_v28 = vpop.f32.mrb[114].mxu1  ;;  %7252 = vmatmul.mubr.msk.bf16.vlgmr.msra.gmra.mrb[104].mxu0 %vm832_vm2, %v3061_v57 }
 0x73e   : > { %v3065_v54 = vpack.c.bf16 %v2968_v28, %v2965_v44  ;;  %v7236_v59 = vpop.f32.mrb[115].mxu1  ;;  %7268 = vmatpush3.bf16.msra.mxu0 %v3220_v31 }
 0x73f   : > { %v2833_v17 = vpop.f32.mrb[92].mxu0  ;;  %7325 = vmatprep.subr.bf16.mxu0 %v9198_v2 }
 0x740   : > { %v7217_v43 = vpop.f32.mrb[93].mxu0 }
 0x741   : > { %v2836_v9 = vpop.f32.mrb[94].mxu0 }
 0x742   : > { %v3062_v3 = vpack.c.bf16 %v2836_v9, %v2833_v17  ;;  %v7218_v0 = vpop.f32.mrb[95].mxu0 }
 0x743   : > { %v3053_v15 = vpop.f32.mrb[116].mxu1 }
 0x744   : > { %v7247_v21 = vpop.f32.mrb[117].mxu1  ;;  %7255 = vmatprep.mubr.msk.bf16.mxu0 %vm832_vm2, %v3062_v3 }
 0x745   : > { %v3056_v10 = vpop.f32.mrb[118].mxu1  ;;  %7256 = vmatmul.mubr.msk.bf16.gmra.mrb[108].mxu0 %vm832_vm2, %v3063_v58 }
 0x746   : > { %v3067_v12 = vpack.c.bf16 %v3056_v10, %v3053_v15  ;;  %v7248_v23 = vpop.f32.mrb[119].mxu1  ;;  %v7757_v15 = vld [vmem:[%s10332_s5 + $0x28] sm:$0xff]  }
 0x747   : > { %v2921_v48 = vpop.f32.mrb[96].mxu0  ;;  %v10343_v23 = vpack.c.bf16 %v8723_v34, %v8721_v38 }
 0x748   : > { %v7229_v26 = vpop.f32.mrb[97].mxu0 }
 0x749   : > { %v2924_v60 = vpop.f32.mrb[98].mxu0 }
 0x74a   : > { %v3064_v8 = vpack.c.bf16 %v2924_v60, %v2921_v48  ;;  %v7230_v18 = vpop.f32.mrb[99].mxu0 }
 0x74b   : > { %v7291_v42 = vpop.f32.mrb[120].mxu1  ;;  %v10344_v18 = vpack.c.bf16 %v8717_v39, %v8715_v33  ;;  %v6514_v39 = vld [vmem:[%s10331_s4 + $0x2] ss:$0 sm:$0xff] }
 0x74c   : > { %7259 = vmatprep.mubr.msk.bf16.mxu0 %vm832_vm2, %v3064_v8  ;;  %v9209_v7 = vadd.f32 %v7291_v42, %v6498_v50  ;;  %v3378_v49 = vpop.f32.mrb[121].mxu1 }
 0x74d   : > { %7260 = vmatmul.mubr.msk.bf16.gmra.mrb[112].mxu0 %vm832_vm2, %v3065_v54  ;;  %v9212_v62 = vadd.f32 %v6498_v50, %v3378_v49  ;;  %v7292_v57 = vpop.f32.mrb[122].mxu1  ;;  %v10341_v54 = vpack.c.bf16 %v8711_v36, %v8709_v13  ;;  %v10342_v36 = vpack.c.bf16 %v8705_v30, %v8703_v61  ;;  %v10345_v49 = vpack.c.bf16 %v8735_v27, %v8733_v53 }
 0x74e   : > { %v9214_v46 = vadd.f32 %v7292_v57, %v6498_v50  ;;  %v3381_v32 = vpop.f32.mrb[123].mxu1 }
 0x74f   : > { %v3009_v40 = vpop.f32.mrb[100].mxu0  ;;  %v9216_v55 = vadd.f32 %v6498_v50, %v3381_v32 }
 0x750   : > { %v7241_v58 = vpop.f32.mrb[101].mxu0  ;;  %v3686_v63 = vpack.c.bf16 %v9214_v46, %v9209_v7 }
 0x751   : > { %v3012_v19 = vpop.f32.mrb[102].mxu0  ;;  %v3685_v25 = vpack.c.bf16 %v9216_v55, %v9212_v62 }
 0x752   : > { %v3066_v35 = vpack.c.bf16 %v3012_v19, %v3009_v40  ;;  %v7242_v41 = vpop.f32.mrb[103].mxu0 }
 0x753   : > { %v7295_v22 = vpop.f32.mrb[124].mxu1  ;;  %v10346_v41 = vpack.c.bf16 %v8729_v1, %v8727_v56  ;;  %v10348_v56 = vpack.c.bf16 %v8741_v20, %v8739_v5 }
 0x754   : > { %7263 = vmatprep.mubr.msk.bf16.mxu0 %vm832_vm2, %v3066_v35  ;;  %v9223_v44 = vadd.f32 %v7295_v22, %v6498_v50  ;;  %v3394_v31 = vpop.f32.mrb[125].mxu1 }
 0x755   : > { %7264 = vmatmul.mubr.msk.bf16.gmra.mrb[116].mxu0 %vm832_vm2, %v3067_v12  ;;  %v9226_v29 = vadd.f32 %v6498_v50, %v3394_v31  ;;  %v7296_v28 = vpop.f32.mrb[126].mxu1  ;;  %v10347_v31 = vpack.c.bf16 %v8747_v37, %v8745_v4 }
 0x756   : > { %7269 = vmatprep.mubr.msk.bf16.mxu0 %vm832_vm2, %v10341_v54  ;;  %v9232_v59 = vadd.f32 %v7296_v28, %v6498_v50  ;;  %v3397_v17 = vpop.f32.mrb[127].mxu1 }
 0x757   : > { %v9234_v43 = vadd.f32 %v6498_v50, %v3397_v17 }
 0x758   : > { %v3688_v9 = vpack.c.bf16 %v9232_v59, %v9223_v44 }
 0x759   : > { %v3687_v3 = vpack.c.bf16 %v9234_v43, %v9226_v29  ;;  %v9390_v29 = vld [vmem:[%s10334_s7 + $0x28] sm:$0xff] }
 0x75b   : > { %v7299_v0 = vpop.f32.mrb[128].mxu1 }
 0x75c   : > { %v9243_v21 = vadd.f32 %v7299_v0, %v6498_v50  ;;  %v3410_v13 = vpop.f32.mrb[129].mxu1 }
 0x75d   : > { %7270 = vmatmul.mubr.msk.bf16.vlgmr.msra.gmra.mrb[104].mxu0 %vm832_vm2, %v10342_v36  ;;  %v9249_v10 = vadd.f32 %v6498_v50, %v3410_v13  ;;  %v7300_v12 = vpop.f32.mrb[130].mxu1 }
 0x75e   : > { %7273 = vmatprep.mubr.msk.bf16.mxu0 %vm832_vm2, %v10343_v23  ;;  %v9255_v48 = vadd.f32 %v7300_v12, %v6498_v50  ;;  %v3413_v26 = vpop.f32.mrb[131].mxu1  ;;  %7326 = vmatpush3.bf16.msra.mxu0 %v9198_v2 }
 0x75f   : > { %v9258_v60 = vadd.f32 %v6498_v50, %v3413_v26  ;;  %7327 = vmatprep.subr.bf16.mxu0 %v7757_v15 }
 0x760   : > { %v3690_v61 = vpack.c.bf16 %v9255_v48, %v9243_v21 }
 0x761   : > { %v3689_v30 = vpack.c.bf16 %v9258_v60, %v9249_v10 }
 0x762   : > { %7328 = vmatpush3.bf16.msra.mxu0 %v7757_v15 }
 0x763   : > { %v7303_v8 = vpop.f32.mrb[132].mxu1  ;;  %7369 = vmatprep.subr.bf16.mxu0 %v8108_v14 }
 0x764   : > { %v9265_v38 = vadd.f32 %v7303_v8, %v6498_v50  ;;  %v3426_v34 = vpop.f32.mrb[133].mxu1 }
 0x765   : > { %7274 = vmatmul.mubr.msk.bf16.gmra.mrb[108].mxu0 %vm832_vm2, %v10344_v18  ;;  %v9271_v2 = vadd.f32 %v6498_v50, %v3426_v34  ;;  %v7304_v42 = vpop.f32.mrb[134].mxu1 }
 0x766   : > { %7277 = vmatprep.mubr.msk.bf16.mxu0 %vm832_vm2, %v10345_v49  ;;  %v9277_v57 = vadd.f32 %v7304_v42, %v6498_v50  ;;  %v3429_v32 = vpop.f32.mrb[135].mxu1 }
 0x767   : > { %v9279_v40 = vadd.f32 %v6498_v50, %v3429_v32 }
 0x768   : > { %v3692_v58 = vpack.c.bf16 %v9277_v57, %v9265_v38 }
 0x769   : > { %v3691_v33 = vpack.c.bf16 %v9279_v40, %v9271_v2 }
 0x76b   : > { %v7311_v19 = vpop.f32.mrb[136].mxu1 }
 0x76c   : > { %v3509_v35 = vadd.f32 %v7311_v19, %v6514_v39  ;;  %v3500_v53 = vpop.f32.mrb[137].mxu1 }
 0x76d   : > { %v3501_v27 = vadd.f32 %v6514_v39, %v3500_v53  ;;  %7278 = vmatmul.mubr.msk.bf16.gmra.mrb[112].mxu0 %vm832_vm2, %v10346_v41  ;;  %v7312_v50 = vpop.f32.mrb[138].mxu1 }
 0x76e   : > { %v3512_v22 = vadd.f32 %v7312_v50, %v6514_v39  ;;  %7281 = vmatprep.mubr.msk.bf16.mxu0 %vm832_vm2, %v10347_v31  ;;  %v3503_v28 = vpop.f32.mrb[139].mxu1 }
 0x76f   : > { %v3504_v54 = vadd.f32 %v6514_v39, %v3503_v28 }
 0x770   : > { %v3694_v17 = vpack.c.bf16 %v3512_v22, %v3509_v35 }
 0x771   : > { %v3693_v0 = vpack.c.bf16 %v3504_v54, %v3501_v27 }
 0x772   : > { %v3763_v5 = vsel %vm832_vm2, %v3694_v17, 0 }
 0x773   : > { %v3716_v15 = vsel %vm832_vm2, %v3693_v0, 0  ;;  %v7315_v13 = vpop.f32.mrb[140].mxu1 }
 0x774   : > { %7346 = vmatpush3.bf16.xpose.msra.mxu1 %v3716_v15  ;;  %v3525_v36 = vadd.f32 %v7315_v13, %v6514_v39  ;;  %v3516_v12 = vpop.f32.mrb[141].mxu1 }
 0x775   : > { %7282 = vmatmul.mubr.msk.bf16.gmra.mrb[116].mxu0 %vm832_vm2, %v10348_v56  ;;  %7351 = vmatprep.subr.bf16.mxu1 %v8108_v14  ;;  %v3517_v1 = vadd.f32 %v6514_v39, %v3516_v12  ;;  %v7316_v4 = vpop.f32.mrb[142].mxu1 }
 0x776   : > { %7329 = vmatprep.mubr.msk.bf16.mxu0 %vm444_vm0, %v9112_v6  ;;  %v3528_v37 = vadd.f32 %v7316_v4, %v6514_v39  ;;  %v3519_v23 = vpop.f32.mrb[143].mxu1 }
 0x777   : > { %v3520_v26 = vadd.f32 %v6514_v39, %v3519_v23 }
 0x778   : > { %v3696_v8 = vpack.c.bf16 %v3528_v37, %v3525_v36 }
 0x779   : > { %v3695_v34 = vpack.c.bf16 %v3520_v26, %v3517_v1 }
 0x77b   : > { %7348 = vmatmul.mubr.msk.bf16.vlgmr.msra.gmra.mrb[152].mxu1 %vm832_vm2, %v3685_v25  ;;  %v7319_v20 = vpop.f32.mrb[144].mxu1  ;;  %v3810_v19 = vsel %vm832_vm2, %v3695_v34, 0 }
 0x77c   : > { %7352 = vmatpush3.bf16.xpose.msra.mxu1 %v3763_v5  ;;  %7353 = vmatprep.mubr.msk.bf16.mxu1 %vm8109_vm1, %v8108_v14  ;;  %v3541_v18 = vadd.f32 %v7319_v20, %v6514_v39  ;;  %v3532_v42 = vpop.f32.mrb[145].mxu1 }
 0x77d   : > { %7330 = vmatmul.mubr.msk.bf16.vlgmr.msra.gmra.mrb[120].mxu0 %vm444_vm0, %v9131_v16  ;;  %7357 = vmatprep.subr.bf16.mxu1 %v8108_v14  ;;  %v3533_v6 = vadd.f32 %v6514_v39, %v3532_v42  ;;  %v7320_v49 = vpop.f32.mrb[146].mxu1 }
 0x77e   : > { %7333 = vmatprep.mubr.msk.bf16.mxu0 %vm444_vm0, %v9136_v11  ;;  %v3544_v62 = vadd.f32 %v7320_v49, %v6514_v39  ;;  %v3535_v55 = vpop.f32.mrb[147].mxu1 }
 0x77f   : > { %v3536_v25 = vadd.f32 %v6514_v39, %v3535_v55 }
 0x780   : > { %v3698_v32 = vpack.c.bf16 %v3544_v62, %v3541_v18 }
 0x781   : > { %v3697_v35 = vpack.c.bf16 %v3536_v25, %v3533_v6 }
 0x783   : > { %7354 = vmatmul.mubr.msk.bf16.vlgmr.msra.gmra.mrb[156].mxu1 %vm832_vm2, %v3686_v63  ;;  %v7323_v16 = vpop.f32.mrb[148].mxu1  ;;  %v3904_v53 = vsel %vm832_vm2, %v3697_v35, 0 }
 0x784   : > { %7358 = vmatpush3.bf16.xpose.msra.mxu1 %v3810_v19  ;;  %7359 = vmatprep.mubr.msk.bf16.mxu1 %vm8109_vm1, %v8108_v14  ;;  %v3557_v11 = vadd.f32 %v7323_v16, %v6514_v39  ;;  %v3548_v27 = vpop.f32.mrb[149].mxu1 }
 0x785   : > { %7334 = vmatmul.mubr.msk.bf16.gmra.mrb[124].mxu0 %vm444_vm0, %v9143_v45  ;;  %7363 = vmatprep.subr.bf16.mxu1 %v8108_v14  ;;  %v3549_v41 = vadd.f32 %v6514_v39, %v3548_v27  ;;  %v7324_v50 = vpop.f32.mrb[150].mxu1  ;;  %v3857_v45 = vsel %vm832_vm2, %v3696_v8, 0 }
 0x786   : > { %7337 = vmatprep.mubr.msk.bf16.mxu0 %vm444_vm0, %v9148_v24  ;;  %7370 = vmatpush3.bf16.xpose.msra.mxu0 %v3904_v53  ;;  %v3560_v7 = vadd.f32 %v7324_v50, %v6514_v39  ;;  %v3551_v46 = vpop.f32.mrb[151].mxu1  ;;  %v3951_v24 = vsel %vm832_vm2, %v3698_v32, 0 }
 0x787   : > { %v3552_v63 = vadd.f32 %v6514_v39, %v3551_v46  ;;  %7381 = vmatprep.subr.bf16.mxu0 %v8108_v14 }
 0x788   : > { %v3700_v22 = vpack.c.bf16 %v3560_v7, %v3557_v11 }
 0x789   : > { %v3699_v31 = vpack.c.bf16 %v3552_v63, %v3549_v41 }
 0x78b   : > { %7360 = vmatmul.mubr.msk.bf16.vlgmr.msra.gmra.mrb[160].mxu1 %vm832_vm2, %v3687_v3  ;;  %v9398_v3 = vld [vmem:[%s10333_s6 + $0x2] ss:$0 sm:$0xff] }
 0x78c   : > { %7364 = vmatpush3.bf16.xpose.msra.mxu1 %v3857_v45  ;;  %7365 = vmatprep.mubr.msk.bf16.mxu1 %vm8109_vm1, %v8108_v14 }
 0x78d   : > { %7338 = vmatmul.mubr.msk.bf16.gmra.mrb[128].mxu0 %vm444_vm0, %v9153_v47  ;;  %7375 = vmatprep.subr.bf16.mxu1 %v8108_v14  ;;  %v4045_v47 = vsel %vm832_vm2, %v3700_v22, 0 }
 0x78e   : > { %7341 = vmatprep.mubr.msk.bf16.mxu0 %vm444_vm0, %v9158_v52  ;;  %v3998_v52 = vsel %vm832_vm2, %v3699_v31, 0 }
 0x793   : > { %7366 = vmatmul.mubr.msk.bf16.vlgmr.msra.gmra.mrb[164].mxu1 %vm832_vm2, %v3688_v9 }
 0x794   : > { %7376 = vmatpush3.bf16.xpose.msra.mxu1 %v3951_v24  ;;  %7377 = vmatprep.mubr.msk.bf16.mxu1 %vm8109_vm1, %v8108_v14 }
 0x795   : > { %7342 = vmatmul.mubr.msk.bf16.gmra.mrb[132].mxu0 %vm444_vm0, %v9163_v51  ;;  %7387 = vmatprep.subr.bf16.mxu1 %v8108_v14  ;;  %v9385_v51 = vld [vmem:[%s10334_s7 + $0x20] sm:$0xff] }
 0x796   : > { %7371 = vmatprep.mubr.msk.bf16.mxu0 %vm8109_vm1, %v8108_v14 }
 0x79b   : > { %7378 = vmatmul.mubr.msk.bf16.vlgmr.msra.gmra.mrb[168].mxu1 %vm832_vm2, %v3690_v61 }
 0x79c   : > { %7388 = vmatpush3.bf16.xpose.msra.mxu1 %v4045_v47  ;;  %7389 = vmatprep.mubr.msk.bf16.mxu1 %vm8109_vm1, %v8108_v14 }
 0x79d   : > { %7372 = vmatmul.mubr.msk.bf16.vlgmr.msra.gmra.mrb[136].mxu0 %vm832_vm2, %v3689_v30  ;;  %7399 = vmatprep.subr.bf16.mxu1 %v8108_v14 }
 0x79e   : > { %7382 = vmatpush3.bf16.xpose.msra.mxu0 %v3998_v52  ;;  %7383 = vmatprep.mubr.msk.bf16.mxu0 %vm8109_vm1, %v8108_v14 }
 0x79f   : > { %7393 = vmatprep.subr.bf16.mxu0 %v8108_v14 }
 0x7a3   : > { %7390 = vmatmul.mubr.msk.bf16.vlgmr.msra.gmra.mrb[172].mxu1 %vm832_vm2, %v3692_v58 }
 0x7a4   : > { %7401 = vmatprep.mubr.msk.bf16.mxu1 %vm8109_vm1, %v8108_v14 }
 0x7a5   : > { %7384 = vmatmul.mubr.msk.bf16.vlgmr.msra.gmra.mrb[140].mxu0 %vm832_vm2, %v3691_v33 }
 0x7a6   : > { %7395 = vmatprep.mubr.msk.bf16.mxu0 %vm8109_vm1, %v8108_v14 }
 0x84e   : > { %v3752_v44 = vpop.f32.mrb[152].mxu1 }
 0x84f   : > { %v9393_v59 = vadd.f32 %v9385_v51, %v3752_v44  ;;  %v7349_v43 = vpop.f32.mrb[153].mxu1 }
 0x850   : > { %v7331_v9 = vpop.f32.mrb[120].mxu0  ;;  %v3755_v21 = vpop.f32.mrb[154].mxu1 }
 0x851   : > { %v9401_v10 = vadd.f32 %v9390_v29, %v3755_v21  ;;  %v3622_v48 = vpop.f32.mrb[121].mxu0  ;;  %v7350_v60 = vpop.f32.mrb[155].mxu1  ;;  %v4088_v61 = vsel %vm1209_vm3, %v9393_v59, -inf  ;;  %v3631_v38 = vadd.f32 %v7331_v9, %v9398_v3 }
 0x852   : > { %v7332_v30 = vpop.f32.mrb[122].mxu0  ;;  %4089 = vmax.xlane.f32.xlu0 %v4088_v61  ;;  %v3623_v58 = vadd.f32 %v9398_v3, %v3622_v48 }
 0x853   : > { %v3634_v2 = vadd.f32 %v7332_v30, %v9398_v3  ;;  %v3625_v57 = vpop.f32.mrb[123].mxu0  ;;  %v4091_v40 = vsel %vm1209_vm3, %v9401_v10, -inf }
 0x854   : > { %v3626_v33 = vadd.f32 %v9398_v3, %v3625_v57  ;;  %4092 = vmax.xlane.f32.xlu1 %v4091_v40 }
 0x855   : > { %v3702_v39 = vpack.c.bf16 %v3634_v2, %v3631_v38 }
 0x856   : > { %v3701_v28 = vpack.c.bf16 %v3626_v33, %v3623_v58  ;;  %v3799_v54 = vpop.f32.mrb[156].mxu1 }
 0x857   : > { %v9412_v17 = vadd.f32 %v9385_v51, %v3799_v54  ;;  %v7355_v0 = vpop.f32.mrb[157].mxu1  ;;  %7400 = vmatpush3.bf16.msra.mxu1 %v3702_v39 }
 0x858   : > { %v7335_v15 = vpop.f32.mrb[124].mxu0  ;;  %v3802_v13 = vpop.f32.mrb[158].mxu1  ;;  %7394 = vmatpush3.bf16.msra.mxu0 %v3701_v28  ;;  %7411 = vmatprep.subr.bf16.mxu1 %v8108_v14 }
 0x859   : > { %v9416_v36 = vadd.f32 %v7335_v15, %v9398_v3  ;;  %v9419_v12 = vadd.f32 %v9390_v29, %v3802_v13  ;;  %v3638_v56 = vpop.f32.mrb[125].mxu0  ;;  %v7356_v1 = vpop.f32.mrb[159].mxu1  ;;  %v4094_v4 = vsel %vm1209_vm3, %v9412_v17, -inf  ;;  %7405 = vmatprep.subr.bf16.mxu0 %v8108_v14 }
 0x85a   : > { %v9425_v37 = vadd.f32 %v9398_v3, %v3638_v56  ;;  %v7336_v23 = vpop.f32.mrb[126].mxu0  ;;  %4095 = vmax.xlane.f32.xlu0 %v4094_v4 }
 0x85b   : > { %v9428_v26 = vadd.f32 %v7336_v23, %v9398_v3  ;;  %v3641_v8 = vpop.f32.mrb[127].mxu0  ;;  %v4097_v34 = vsel %vm1209_vm3, %v9419_v12, -inf }
 0x85c   : > { %v9433_v5 = vadd.f32 %v9398_v3, %v3641_v8  ;;  %4098 = vmax.xlane.f32.xlu1 %v4097_v34 }
 0x85d   : > { %v3704_v20 = vpack.c.bf16 %v9428_v26, %v9416_v36 }
 0x85e   : > { %v3703_v18 = vpack.c.bf16 %v9433_v5, %v9425_v37  ;;  %v3846_v42 = vpop.f32.mrb[160].mxu1 }
 0x85f   : > { %v9440_v6 = vadd.f32 %v9385_v51, %v3846_v42  ;;  %v7361_v49 = vpop.f32.mrb[161].mxu1 }
 0x860   : > { %v7339_v62 = vpop.f32.mrb[128].mxu0  ;;  %v3849_v55 = vpop.f32.mrb[162].mxu1 }
 0x861   : > { %v9443_v25 = vadd.f32 %v7339_v62, %v9398_v3  ;;  %v9446_v32 = vadd.f32 %v9390_v29, %v3849_v55  ;;  %v3654_v19 = vpop.f32.mrb[129].mxu0  ;;  %v7362_v35 = vpop.f32.mrb[163].mxu1  ;;  %v4100_v16 = vsel %vm1209_vm3, %v9440_v6, -inf }
 0x862   : > { %v9451_v53 = vadd.f32 %v9398_v3, %v3654_v19  ;;  %v7340_v11 = vpop.f32.mrb[130].mxu0  ;;  %4101 = vmax.xlane.f32.xlu0 %v4100_v16 }
 0x863   : > { %v9454_v27 = vadd.f32 %v7340_v11, %v9398_v3  ;;  %v3657_v41 = vpop.f32.mrb[131].mxu0  ;;  %v4103_v50 = vsel %vm1209_vm3, %v9446_v32, -inf }
 0x864   : > { %v9459_v7 = vadd.f32 %v9398_v3, %v3657_v41  ;;  %4104 = vmax.xlane.f32.xlu1 %v4103_v50 }
 0x865   : > { %v3706_v46 = vpack.c.bf16 %v9454_v27, %v9443_v25 }
 0x866   : > { %v3705_v63 = vpack.c.bf16 %v9459_v7, %v9451_v53  ;;  %v3893_v22 = vpop.f32.mrb[164].mxu1 }
 0x867   : > { %v9466_v31 = vadd.f32 %v9385_v51, %v3893_v22  ;;  %v7367_v45 = vpop.f32.mrb[165].mxu1 }
 0x868   : > { %v7343_v24 = vpop.f32.mrb[132].mxu0  ;;  %v3896_v47 = vpop.f32.mrb[166].mxu1 }
 0x869   : > { %v9469_v52 = vadd.f32 %v7343_v24, %v9398_v3  ;;  %v9472_v44 = vadd.f32 %v9390_v29, %v3896_v47  ;;  %v3670_v43 = vpop.f32.mrb[133].mxu0  ;;  %v7368_v9 = vpop.f32.mrb[167].mxu1  ;;  %v4106_v21 = vsel %vm1209_vm3, %v9466_v31, -inf }
 0x86a   : > { %v9477_v48 = vadd.f32 %v9398_v3, %v3670_v43  ;;  %v7344_v60 = vpop.f32.mrb[134].mxu0  ;;  %4107 = vmax.xlane.f32.xlu0 %v4106_v21 }
 0x86b   : > { %v9480_v61 = vadd.f32 %v7344_v60, %v9398_v3  ;;  %v3673_v30 = vpop.f32.mrb[135].mxu0  ;;  %v4109_v38 = vsel %vm1209_vm3, %v9472_v44, -inf }
 0x86c   : > { %v9485_v2 = vadd.f32 %v9398_v3, %v3673_v30  ;;  %4110 = vmax.xlane.f32.xlu1 %v4109_v38 }
 0x86d   : > { %v3708_v57 = vpack.c.bf16 %v9480_v61, %v9469_v52  ;;  %v6559_v52 = vld [vmem:[%s10335_s8 + $0x8] sm:$0xf] }
 0x86e   : > { %v3707_v40 = vpack.c.bf16 %v9485_v2, %v9477_v48  ;;  %v3987_v58 = vpop.f32.mrb[168].mxu1  ;;  %v4659_v61 = vsel %vm3094_vm4, %v6559_v52, 0 }
 0x86f   : > { %v7379_v33 = vpop.f32.mrb[169].mxu1  ;;  %v9495_v3 = vadd.f32 %v9385_v51, %v3987_v58 }
 0x870   : > { %v3940_v39 = vpop.f32.mrb[136].mxu0  ;;  %v3990_v28 = vpop.f32.mrb[170].mxu1 }
 0x871   : > { %v9492_v54 = vadd.f32 %v9385_v51, %v3940_v39  ;;  %v7373_v0 = vpop.f32.mrb[137].mxu0  ;;  %v7380_v15 = vpop.f32.mrb[171].mxu1  ;;  %v9503_v23 = vadd.f32 %v9390_v29, %v3990_v28  ;;  %v4118_v49 = vsel %vm1209_vm3, %v9495_v3, -inf }
 0x872   : > { %v3943_v13 = vpop.f32.mrb[138].mxu0 }
 0x873   : > { %v9498_v56 = vadd.f32 %v9390_v29, %v3943_v13  ;;  %v7374_v1 = vpop.f32.mrb[139].mxu0  ;;  %v4112_v4 = vsel %vm1209_vm3, %v9492_v54, -inf  ;;  %v4121_v11 = vsel %vm1209_vm3, %v9503_v23, -inf }
 0x874   : > { %4113 = vmax.xlane.f32.xlu0 %v4112_v4 }
 0x875   : > { %v4115_v8 = vsel %vm1209_vm3, %v9498_v56, -inf }
 0x876   : > { %4116 = vmax.xlane.f32.xlu1 %v4115_v8  ;;  %v4081_v34 = vpop.f32.mrb[172].mxu1 }
 0x877   : > { %v7391_v42 = vpop.f32.mrb[173].mxu1  ;;  %v9515_v50 = vadd.f32 %v9385_v51, %v4081_v34 }
 0x878   : > { %v4034_v62 = vpop.f32.mrb[140].mxu0  ;;  %4119 = vmax.xlane.f32.xlu0 %v4118_v49  ;;  %v4084_v55 = vpop.f32.mrb[174].mxu1 }
 0x879   : > { %v9510_v19 = vadd.f32 %v9385_v51, %v4034_v62  ;;  %v7385_v35 = vpop.f32.mrb[141].mxu0  ;;  %v7392_v16 = vpop.f32.mrb[175].mxu1  ;;  %v9523_v47 = vadd.f32 %v9390_v29, %v4084_v55  ;;  %v4130_v9 = vsel %vm1209_vm3, %v9515_v50, -inf }
 0x87a   : > { %v4037_v41 = vpop.f32.mrb[142].mxu0  ;;  %4122 = vmax.xlane.f32.xlu1 %v4121_v11 }
 0x87b   : > { %v9518_v22 = vadd.f32 %v9390_v29, %v4037_v41  ;;  %v7386_v45 = vpop.f32.mrb[143].mxu0  ;;  %v4124_v24 = vsel %vm1209_vm3, %v9510_v19, -inf  ;;  %v4133_v51 = vsel %vm1209_vm3, %v9523_v47, -inf }
 0x87c   : > { %4125 = vmax.xlane.f32.xlu0 %v4124_v24 }
 0x87d   : > { %v4127_v43 = vsel %vm1209_vm3, %v9518_v22, -inf }
 0x87e   : > { %4128 = vmax.xlane.f32.xlu1 %v4127_v43 }
 0x880   : > { %4131 = vmax.xlane.f32.xlu0 %v4130_v9 }
 0x882   : > { %4134 = vmax.xlane.f32.xlu1 %v4133_v51 }
 0x8df   : > { %v4090_v21 = vpop.xlane.xlu0 %4089 }
 0x8e0   : > { %v4136_v60 = vsub.f32 %v9393_v59, %v4090_v21 }
 0x8e1   : > { %v4093_v30 = vpop.xlane.xlu1 %4092 }
 0x8e2   : > { %v4152_v38 = vmul.f32 1.442695, %v4136_v60  ;;  %v4137_v29 = vsub.f32 %v9401_v10, %v4093_v30 }
 0x8e4   : > { %7892 = vpow2.f32 %v4152_v38  ;;  %v4154_v58 = vmul.f32 1.442695, %v4137_v29 }
 0x8e6   : > { %7894 = vpow2.f32 %v4154_v58 }
 0x8e7   : > { %v4096_v33 = vpop.xlane.xlu0 %4095 }
 0x8e8   : > { %v4138_v39 = vsub.f32 %v9412_v17, %v4096_v33 }
 0x8e9   : > { %v4099_v28 = vpop.xlane.xlu1 %4098 }
 0x8ea   : > { %v4156_v0 = vmul.f32 1.442695, %v4138_v39  ;;  %v4139_v15 = vsub.f32 %v9419_v12, %v4099_v28 }
 0x8ec   : > { %7896 = vpow2.f32 %v4156_v0  ;;  %v4158_v13 = vmul.f32 1.442695, %v4139_v15 }
 0x8ee   : > { %v9535_v1 = vpop.eup %7892  ;;  %7898 = vpow2.f32 %v4158_v13 }
 0x8ef   : > { %v4102_v59 = vpop.xlane.xlu0 %4101  ;;  %v4184_v4 = vsel %vm1209_vm3, %v9535_v1, 0.0 }
 0x8f0   : > { %v9539_v10 = vpop.eup %7894  ;;  %v4140_v8 = vsub.f32 %v9440_v6, %v4102_v59  ;;  %4185 = vadd.xlane.f32.xlu0 %v4184_v4 }
 0x8f1   : > { %v4105_v34 = vpop.xlane.xlu1 %4104  ;;  %v4187_v17 = vsel %vm1209_vm3, %v9539_v10, 0.0 }
 0x8f2   : > { %v4160_v42 = vmul.f32 1.442695, %v4140_v8  ;;  %v4141_v12 = vsub.f32 %v9446_v32, %v4105_v34  ;;  %4188 = vadd.xlane.f32.xlu1 %v4187_v17 }
 0x8f4   : > { %7900 = vpow2.f32 %v4160_v42  ;;  %v4162_v49 = vmul.f32 1.442695, %v4141_v12 }
 0x8f6   : > { %v9545_v62 = vpop.eup %7896  ;;  %7902 = vpow2.f32 %v4162_v49 }
 0x8f7   : > { %v4108_v55 = vpop.xlane.xlu0 %4107  ;;  %v4190_v35 = vsel %vm1209_vm3, %v9545_v62, 0.0 }
 0x8f8   : > { %v9549_v16 = vpop.eup %7898  ;;  %v4142_v6 = vsub.f32 %v9466_v31, %v4108_v55  ;;  %4191 = vadd.xlane.f32.xlu0 %v4190_v35 }
 0x8f9   : > { %v4111_v11 = vpop.xlane.xlu1 %4110  ;;  %v4193_v41 = vsel %vm1209_vm3, %v9549_v16, 0.0 }
 0x8fa   : > { %v4164_v32 = vmul.f32 1.442695, %v4142_v6  ;;  %v4143_v45 = vsub.f32 %v9472_v44, %v4111_v11  ;;  %4194 = vadd.xlane.f32.xlu1 %v4193_v41 }
 0x8fc   : > { %7904 = vpow2.f32 %v4164_v32  ;;  %v4166_v24 = vmul.f32 1.442695, %v4143_v45 }
 0x8fe   : > { %v9555_v43 = vpop.eup %7900  ;;  %7906 = vpow2.f32 %v4166_v24 }
 0x8ff   : > { %v4196_v9 = vsel %vm1209_vm3, %v9555_v43, 0.0 }
 0x900   : > { %v9559_v51 = vpop.eup %7902  ;;  %4197 = vadd.xlane.f32.xlu0 %v4196_v9 }
 0x901   : > { %v4114_v31 = vpop.xlane.xlu0 %4113  ;;  %v4199_v21 = vsel %vm1209_vm3, %v9559_v51, 0.0 }
 0x902   : > { %v4144_v60 = vsub.f32 %v9492_v54, %v4114_v31  ;;  %4200 = vadd.xlane.f32.xlu1 %v4199_v21 }
 0x903   : > { %v4117_v44 = vpop.xlane.xlu1 %4116 }
 0x904   : > { %v4168_v30 = vmul.f32 1.442695, %v4144_v60  ;;  %v4145_v38 = vsub.f32 %v9498_v56, %v4117_v44 }
 0x905   : > { %v4120_v29 = vpop.xlane.xlu0 %4119 }
 0x906   : > { %v9565_v58 = vpop.eup %7904  ;;  %7908 = vpow2.f32 %v4168_v30  ;;  %v4170_v33 = vmul.f32 1.442695, %v4145_v38  ;;  %v4146_v39 = vsub.f32 %v9495_v3, %v4120_v29 }
 0x907   : > { %v4123_v28 = vpop.xlane.xlu1 %4122  ;;  %v4202_v0 = vsel %vm1209_vm3, %v9565_v58, 0.0 }
 0x908   : > { %v9570_v15 = vpop.eup %7906  ;;  %7910 = vpow2.f32 %v4170_v33  ;;  %v4172_v54 = vmul.f32 1.442695, %v4146_v39  ;;  %v4147_v13 = vsub.f32 %v9503_v23, %v4123_v28  ;;  %4203 = vadd.xlane.f32.xlu0 %v4202_v0 }
 0x909   : > { %v4126_v59 = vpop.xlane.xlu0 %4125  ;;  %v4205_v56 = vsel %vm1209_vm3, %v9570_v15, 0.0 }
 0x90a   : > { %7912 = vpow2.f32 %v4172_v54  ;;  %v4174_v4 = vmul.f32 1.442695, %v4147_v13  ;;  %v4148_v8 = vsub.f32 %v9510_v19, %v4126_v59  ;;  %4206 = vadd.xlane.f32.xlu1 %v4205_v56 }
 0x90b   : > { %v4129_v3 = vpop.xlane.xlu1 %4128 }
 0x90c   : > { %7914 = vpow2.f32 %v4174_v4  ;;  %v4176_v34 = vmul.f32 1.442695, %v4148_v8  ;;  %v4149_v17 = vsub.f32 %v9518_v22, %v4129_v3 }
 0x90d   : > { %v4132_v42 = vpop.xlane.xlu0 %4131 }
 0x90e   : > { %7916 = vpow2.f32 %v4176_v34  ;;  %v4178_v12 = vmul.f32 1.442695, %v4149_v17  ;;  %v4150_v23 = vsub.f32 %v9515_v50, %v4132_v42 }
 0x90f   : > { %v4135_v49 = vpop.xlane.xlu1 %4134 }
 0x910   : > { %v9578_v55 = vpop.eup %7908  ;;  %7918 = vpow2.f32 %v4178_v12  ;;  %v4180_v35 = vmul.f32 1.442695, %v4150_v23  ;;  %v4151_v6 = vsub.f32 %v9523_v47, %v4135_v49 }
 0x911   : > { %v4208_v19 = vsel %vm1209_vm3, %v9578_v55, 0.0 }
 0x912   : > { %v9583_v11 = vpop.eup %7910  ;;  %7920 = vpow2.f32 %v4180_v35  ;;  %v4182_v41 = vmul.f32 1.442695, %v4151_v6  ;;  %4209 = vadd.xlane.f32.xlu0 %v4208_v19 }
 0x913   : > { %v4211_v22 = vsel %vm1209_vm3, %v9583_v11, 0.0 }
 0x914   : > { %v9587_v32 = vpop.eup %7912  ;;  %7922 = vpow2.f32 %v4182_v41  ;;  %4212 = vadd.xlane.f32.xlu1 %v4211_v22 }
 0x915   : > { %v4214_v50 = vsel %vm1209_vm3, %v9587_v32, 0.0 }
 0x916   : > { %v9591_v45 = vpop.eup %7914  ;;  %4215 = vadd.xlane.f32.xlu0 %v4214_v50 }
 0x917   : > { %v4217_v47 = vsel %vm1209_vm3, %v9591_v45, 0.0 }
 0x918   : > { %v9595_v24 = vpop.eup %7916  ;;  %4218 = vadd.xlane.f32.xlu1 %v4217_v47 }
 0x919   : > { %v4220_v9 = vsel %vm1209_vm3, %v9595_v24, 0.0 }
 0x91a   : > { %v9599_v31 = vpop.eup %7918  ;;  %4221 = vadd.xlane.f32.xlu0 %v4220_v9 }
 0x91b   : > { %v4223_v21 = vsel %vm1209_vm3, %v9599_v31, 0.0 }
 0x91c   : > { %v9603_v60 = vpop.eup %7920  ;;  %4224 = vadd.xlane.f32.xlu1 %v4223_v21 }
 0x91d   : > { %v4226_v44 = vsel %vm1209_vm3, %v9603_v60, 0.0 }
 0x91e   : > { %v9607_v30 = vpop.eup %7922  ;;  %4227 = vadd.xlane.f32.xlu0 %v4226_v44 }
 0x91f   : > { %v4229_v38 = vsel %vm1209_vm3, %v9607_v30, 0.0 }
 0x920   : > { %4230 = vadd.xlane.f32.xlu1 %v4229_v38  ;;  %v9689_v38 = vld [vmem:[%s8229_s21 + $0x8] sm:$0xff]  }
 0x97d   : > { %v4186_v29 = vpop.xlane.xlu0 %4185 }
 0x97e   : > { %7924 = vrcp.f32 %v4186_v29  ;;  %v9694_v29 = vld [vmem:[%s8229_s21 + $0x10] sm:$0xff]  }
 0x97f   : > { %v4189_v33 = vpop.xlane.xlu1 %4188 }
 0x980   : > { %7926 = vrcp.f32 %v4189_v33  ;;  %v9699_v33 = vld [vmem:[%s8229_s21 + $0x18] sm:$0xff]  }
 0x985   : > { %v4192_v39 = vpop.xlane.xlu0 %4191 }
 0x986   : > { %7928 = vrcp.f32 %v4192_v39  ;;  %v9704_v39 = vld [vmem:[%s8229_s21 + $0x20] sm:$0xff]  }
 0x987   : > { %v4195_v28 = vpop.xlane.xlu1 %4194 }
 0x988   : > { %v7925_v0 = vpop.eup %7924  ;;  %7930 = vrcp.f32 %v4195_v28  ;;  %v9709_v28 = vld [vmem:[%s8229_s21 + $0x28] sm:$0xff]  }
 0x989   : > { %v4248_v13 = vmul.f32 %v7925_v0, %v9535_v1  ;;  %v9714_v0 = vld [vmem:[%s8229_s21 + $0x30] sm:$0xff]  }
 0x98a   : > { %v7927_v54 = vpop.eup %7926 }
 0x98b   : > { %v4249_v59 = vmul.f32 %v7927_v54, %v9539_v10  ;;  %v7762_v54 = vld [vmem:[%s10332_s5 + $0x30] sm:$0xff]  }
 0x98d   : > { %v4198_v56 = vpop.xlane.xlu0 %4197  ;;  %v4264_v4 = vpack.c.bf16 %v4249_v59, %v4248_v13  ;;  %v7763_v13 = vld [vmem:[%s10332_s5 + $0x38] sm:$0xff]  }
 0x98e   : > { %7932 = vrcp.f32 %v4198_v56  ;;  %v9725_v59 = vld [vmem:[%s8229_s21 + $0x38] sm:$0xff]  }
 0x98f   : > { %7396 = vmatmul.mubr.msk.bf16.vlgmr.msra.gmra.mrb[144].mxu0 %vm1209_vm3, %v4264_v4  ;;  %v4201_v8 = vpop.xlane.xlu1 %4200 }
 0x990   : > { %v7929_v3 = vpop.eup %7928  ;;  %7406 = vmatpush3.bf16.msra.mxu0 %v3703_v18  ;;  %7934 = vrcp.f32 %v4201_v8  ;;  %7407 = vmatprep.mubr.msk.bf16.mxu0 %vm8109_vm1, %v8108_v14 }
 0x991   : > { %7417 = vmatprep.subr.bf16.mxu0 %v8108_v14  ;;  %v4250_v10 = vmul.f32 %v7929_v3, %v9545_v62 }
 0x992   : > { %v7931_v1 = vpop.eup %7930 }
 0x993   : > { %v4251_v34 = vmul.f32 %v7931_v1, %v9549_v16 }
 0x995   : > { %v4204_v17 = vpop.xlane.xlu0 %4203  ;;  %v4265_v42 = vpack.c.bf16 %v4251_v34, %v4250_v10 }
 0x996   : > { %7936 = vrcp.f32 %v4204_v17 }
 0x997   : > { %7402 = vmatmul.mubr.msk.bf16.vlgmr.msra.gmra.mrb[176].mxu1 %vm1209_vm3, %v4265_v42  ;;  %v4207_v12 = vpop.xlane.xlu1 %4206 }
 0x998   : > { %v7933_v23 = vpop.eup %7932  ;;  %7412 = vmatpush3.bf16.msra.mxu1 %v3704_v20  ;;  %7938 = vrcp.f32 %v4207_v12  ;;  %7413 = vmatprep.mubr.msk.bf16.mxu1 %vm8109_vm1, %v8108_v14 }
 0x999   : > { %7423 = vmatprep.subr.bf16.mxu1 %v8108_v14  ;;  %v4252_v5 = vmul.f32 %v7933_v23, %v9555_v43  ;;  %v7759_v23 = vld [vmem:[%s10330_s3 + $0x38] sm:$0xff]  }
 0x99a   : > { %v7935_v37 = vpop.eup %7934 }
 0x99b   : > { %v4253_v18 = vmul.f32 %v7935_v37, %v9559_v51 }
 0x99d   : > { %v4266_v62 = vpack.c.bf16 %v4253_v18, %v4252_v5 }
 0x99f   : > { %v4210_v16 = vpop.xlane.xlu0 %4209  ;;  %7408 = vmatmul.mubr.msk.bf16.vlgmr.msra.gmra.mrb[148].mxu0 %vm1209_vm3, %v4266_v62 }
 0x9a0   : > { %v7937_v49 = vpop.eup %7936  ;;  %7940 = vrcp.f32 %v4210_v16  ;;  %7418 = vmatpush3.bf16.msra.mxu0 %v3705_v63  ;;  %7419 = vmatprep.mubr.msk.bf16.mxu0 %vm8109_vm1, %v8108_v14 }
 0x9a1   : > { %v4213_v36 = vpop.xlane.xlu1 %4212  ;;  %7429 = vmatprep.subr.bf16.mxu0 %v8108_v14  ;;  %v4254_v20 = vmul.f32 %v7937_v49, %v9565_v58 }
 0x9a2   : > { %v7939_v26 = vpop.eup %7938  ;;  %7942 = vrcp.f32 %v4213_v36 }
 0x9a3   : > { %v4255_v43 = vmul.f32 %v7939_v26, %v9570_v15  ;;  %v4216_v51 = vpop.xlane.xlu0 %4215 }
 0x9a4   : > { %7944 = vrcp.f32 %v4216_v51 }
 0x9a5   : > { %v4219_v35 = vpop.xlane.xlu1 %4218  ;;  %v4267_v6 = vpack.c.bf16 %v4255_v43, %v4254_v20 }
 0x9a6   : > { %7946 = vrcp.f32 %v4219_v35 }
 0x9a7   : > { %v4222_v19 = vpop.xlane.xlu0 %4221  ;;  %7414 = vmatmul.mubr.msk.bf16.vlgmr.msra.gmra.mrb[180].mxu1 %vm1209_vm3, %v4267_v6 }
 0x9a8   : > { %7948 = vrcp.f32 %v4222_v19  ;;  %7424 = vmatpush3.bf16.msra.mxu1 %v3706_v46  ;;  %7425 = vmatprep.mubr.msk.bf16.mxu1 %vm8109_vm1, %v8108_v14 }
 0x9a9   : > { %v4225_v53 = vpop.xlane.xlu1 %4224  ;;  %7435 = vmatprep.subr.bf16.mxu1 %v8108_v14 }
 0x9aa   : > { %v7941_v7 = vpop.eup %7940  ;;  %7950 = vrcp.f32 %v4225_v53 }
 0x9ab   : > { %v4228_v63 = vpop.xlane.xlu0 %4227  ;;  %v4256_v15 = vmul.f32 %v7941_v7, %v9578_v55 }
 0x9ac   : > { %v7943_v58 = vpop.eup %7942  ;;  %7952 = vrcp.f32 %v4228_v63 }
 0x9ad   : > { %v4257_v41 = vmul.f32 %v7943_v58, %v9583_v11  ;;  %v4231_v22 = vpop.xlane.xlu1 %4230 }
 0x9ae   : > { %v7945_v50 = vpop.eup %7944  ;;  %7954 = vrcp.f32 %v4231_v22 }
 0x9af   : > { %v4268_v25 = vpack.c.bf16 %v4257_v41, %v4256_v15  ;;  %v4258_v46 = vmul.f32 %v7945_v50, %v9587_v32 }
 0x9b0   : > { %v7947_v27 = vpop.eup %7946 }
 0x9b1   : > { %v4259_v47 = vmul.f32 %v7947_v27, %v9591_v45  ;;  %7420 = vmatmul.mubr.msk.bf16.vlgmr.msra.gmra.mrb[152].mxu0 %vm1209_vm3, %v4268_v25 }
 0x9b2   : > { %v7949_v9 = vpop.eup %7948  ;;  %7430 = vmatpush3.bf16.msra.mxu0 %v3707_v40  ;;  %7431 = vmatprep.mubr.msk.bf16.mxu0 %vm8109_vm1, %v8108_v14 }
 0x9b3   : > { %v4269_v55 = vpack.c.bf16 %v4259_v47, %v4258_v46  ;;  %v4260_v21 = vmul.f32 %v7949_v9, %v9595_v24  ;;  %7687 = vmatprep.subr.msk.bf16.mxu0 %vm3094_vm4, %v6559_v52 }
 0x9b4   : > { %v7951_v11 = vpop.eup %7950 }
 0x9b5   : > { %v4261_v44 = vmul.f32 %v7951_v11, %v9599_v31  ;;  %7426 = vmatmul.mubr.msk.bf16.vlgmr.msra.gmra.mrb[184].mxu1 %vm1209_vm3, %v4269_v55  ;;  %v9670_v31 = vld [vmem:[%s8229_s21] sm:$0xff]  }
 0x9b6   : > { %v7953_v32 = vpop.eup %7952  ;;  %7436 = vmatpush3.bf16.msra.mxu1 %v3708_v57  ;;  %7437 = vmatprep.mubr.msk.bf16.mxu1 %vm8109_vm1, %v8108_v14  ;;  %v7758_v57 = vld [vmem:[%s10330_s3 + $0x30] sm:$0xff]  }
 0x9b7   : > { %v4270_v48 = vpack.c.bf16 %v4261_v44, %v4260_v21  ;;  %v4262_v40 = vmul.f32 %v7953_v32, %v9603_v60  ;;  %v7760_v60 = vld [vmem:[%s10328_s1 + $0x30] sm:$0xff]   ;;  %v6573_v32 = vld [vmem:[%s10329_s2 + $0x3] ss:$0 sm:$0xff] }
 0x9b8   : > { %v7955_v2 = vpop.eup %7954  ;;  %7459 = vmatprep.subr.bf16.mxu1 %v7760_v60 }
 0x9b9   : > { %v4263_v45 = vmul.f32 %v7955_v2, %v9607_v30  ;;  %7432 = vmatmul.mubr.msk.bf16.vlgmr.msra.gmra.mrb[156].mxu0 %vm1209_vm3, %v4270_v48  ;;  %v7761_v30 = vld [vmem:[%s10328_s1 + $0x38] sm:$0xff]  }
 0x9ba   : > { %7442 = vmatpush3.bf16.msra.mxu0 %v4659_v61 }
 0x9bb   : > { %v4271_v24 = vpack.c.bf16 %v4263_v45, %v4262_v40  ;;  %7479 = vmatprep.subr.bf16.mxu0 %v7758_v57 }
 0x9bd   : > { %7438 = vmatmul.mubr.msk.bf16.vlgmr.msra.gmra.mrb[188].mxu1 %vm1209_vm3, %v4271_v24 }
 0x9be   : > { %7463 = vmatprep.mubr.msk.bf16.mxu1 %vm444_vm0, %v9670_v31  ;;  %7460 = vmatpush3.bf16.msra.mxu1 %v7760_v60 }
 0x9bf   : > { %7461 = vmatprep.subr.bf16.mxu1 %v7761_v30 }
 0x9c2   : > { %7462 = vmatpush3.bf16.msra.mxu1 %v7761_v30 }
 0x9c3   : > { %7499 = vmatprep.subr.bf16.mxu1 %v7762_v54 }
 0x9c5   : > { %7464 = vmatmul.mubr.msk.bf16.vlgmr.msra.gmra.mrb[192].mxu1 %vm444_vm0, %v9689_v38 }
 0x9c6   : > { %7467 = vmatprep.mubr.msk.bf16.mxu1 %vm444_vm0, %v9694_v29  ;;  %7500 = vmatpush3.bf16.msra.mxu1 %v7762_v54 }
 0x9c7   : > { %7501 = vmatprep.subr.bf16.mxu1 %v7763_v13 }
 0x9ca   : > { %7502 = vmatpush3.bf16.msra.mxu1 %v7763_v13 }
 0x9cb   : > { %7525 = vmatprep.subr.bf16.mxu1 %v8108_v14 }
 0x9cd   : > { %7468 = vmatmul.mubr.msk.bf16.gmra.mrb[196].mxu1 %vm444_vm0, %v9699_v33 }
 0x9ce   : > { %7471 = vmatprep.mubr.msk.bf16.mxu1 %vm444_vm0, %v9704_v39 }
 0x9d5   : > { %7472 = vmatmul.mubr.msk.bf16.gmra.mrb[200].mxu1 %vm444_vm0, %v9709_v28 }
 0x9d6   : > { %7475 = vmatprep.mubr.msk.bf16.mxu1 %vm444_vm0, %v9714_v0 }
 0x9dd   : > { %7476 = vmatmul.mubr.msk.bf16.gmra.mrb[204].mxu1 %vm444_vm0, %v9725_v59 }
 0x9de   : > { %7503 = vmatprep.mubr.msk.bf16.mxu1 %vm444_vm0, %v9670_v31 }
 0x9e5   : > { %7504 = vmatmul.mubr.msk.bf16.vlgmr.msra.gmra.mrb[208].mxu1 %vm444_vm0, %v9689_v38 }
 0x9e6   : > { %7507 = vmatprep.mubr.msk.bf16.mxu1 %vm444_vm0, %v9694_v29 }
 0x9ed   : > { %7508 = vmatmul.mubr.msk.bf16.gmra.mrb[212].mxu1 %vm444_vm0, %v9699_v33 }
 0x9ee   : > { %7511 = vmatprep.mubr.msk.bf16.mxu1 %vm444_vm0, %v9704_v39 }
 0x9f5   : > { %7512 = vmatmul.mubr.msk.bf16.gmra.mrb[216].mxu1 %vm444_vm0, %v9709_v28 }
 0x9f6   : > { %7515 = vmatprep.mubr.msk.bf16.mxu1 %vm444_vm0, %v9714_v0 }
 0x9fd   : > { %7516 = vmatmul.mubr.msk.bf16.gmra.mrb[220].mxu1 %vm444_vm0, %v9725_v59 }
 0x9fe   : > { %7527 = vmatprep.mubr.msk.bf16.mxu1 %vm8109_vm1, %v8108_v14 }
 0xa62   : > { %v4309_v56 = vpop.f32.mrb[144].mxu0 }
 0xa63   : > { %v7397_v4 = vpop.f32.mrb[145].mxu0 }
 0xa64   : > { %v4312_v8 = vpop.f32.mrb[146].mxu0 }
 0xa65   : > { %v4624_v3 = vpack.c.bf16 %v4312_v8, %v4309_v56  ;;  %v7398_v1 = vpop.f32.mrb[147].mxu0 }
 0xa67   : > { %7443 = vmatprep.mubr.msk.bf16.mxu0 %vm832_vm2, %v4624_v3 }
 0xa6a   : > { %v4353_v10 = vpop.f32.mrb[176].mxu1 }
 0xa6b   : > { %v7403_v34 = vpop.f32.mrb[177].mxu1 }
 0xa6c   : > { %v4356_v17 = vpop.f32.mrb[178].mxu1 }
 0xa6d   : > { %v4625_v42 = vpack.c.bf16 %v4356_v17, %v4353_v10  ;;  %v7404_v12 = vpop.f32.mrb[179].mxu1 }
 0xa6f   : > { %7444 = vmatmul.mubr.msk.bf16.vlgmr.msra.gmra.mrb[104].mxu0 %vm832_vm2, %v4625_v42 }
 0xa70   : > { %7480 = vmatpush3.bf16.msra.mxu0 %v7758_v57 }
 0xa71   : > { %7481 = vmatprep.subr.bf16.mxu0 %v7759_v23 }
 0xa72   : > { %v4397_v37 = vpop.f32.mrb[148].mxu0 }
 0xa73   : > { %v7409_v5 = vpop.f32.mrb[149].mxu0 }
 0xa74   : > { %v4400_v18 = vpop.f32.mrb[150].mxu0  ;;  %7482 = vmatpush3.bf16.msra.mxu0 %v7759_v23 }
 0xa75   : > { %v4626_v62 = vpack.c.bf16 %v4400_v18, %v4397_v37  ;;  %v7410_v16 = vpop.f32.mrb[151].mxu0  ;;  %7519 = vmatprep.subr.bf16.mxu0 %v8108_v14 }
 0xa77   : > { %7447 = vmatprep.mubr.msk.bf16.mxu0 %vm832_vm2, %v4626_v62 }
 0xa7a   : > { %v4441_v49 = vpop.f32.mrb[180].mxu1 }
 0xa7b   : > { %v7415_v36 = vpop.f32.mrb[181].mxu1 }
 0xa7c   : > { %v4444_v26 = vpop.f32.mrb[182].mxu1 }
 0xa7d   : > { %v4627_v20 = vpack.c.bf16 %v4444_v26, %v4441_v49  ;;  %v7416_v43 = vpop.f32.mrb[183].mxu1 }
 0xa7e   : > { %v9832_v43 = vld [vmem:[%s10333_s6 + $0x3] ss:$0 sm:$0xff] }
 0xa7f   : > { %7448 = vmatmul.mubr.msk.bf16.gmra.mrb[108].mxu0 %vm832_vm2, %v4627_v20 }
 0xa84   : > { %v4485_v51 = vpop.f32.mrb[152].mxu0 }
 0xa85   : > { %v7421_v35 = vpop.f32.mrb[153].mxu0 }
 0xa86   : > { %v4488_v6 = vpop.f32.mrb[154].mxu0 }
 0xa87   : > { %v4628_v19 = vpack.c.bf16 %v4488_v6, %v4485_v51  ;;  %v7422_v53 = vpop.f32.mrb[155].mxu0 }
 0xa88   : > { %v4529_v7 = vpop.f32.mrb[184].mxu1 }
 0xa89   : > { %v7427_v63 = vpop.f32.mrb[185].mxu1  ;;  %7451 = vmatprep.mubr.msk.bf16.mxu0 %vm832_vm2, %v4628_v19 }
 0xa8a   : > { %v4532_v58 = vpop.f32.mrb[186].mxu1 }
 0xa8b   : > { %v4629_v15 = vpack.c.bf16 %v4532_v58, %v4529_v7  ;;  %v7428_v41 = vpop.f32.mrb[187].mxu1 }
 0xa8c   : > { %v4573_v22 = vpop.f32.mrb[156].mxu0 }
 0xa8d   : > { %v7433_v50 = vpop.f32.mrb[157].mxu0  ;;  %7452 = vmatmul.mubr.msk.bf16.gmra.mrb[112].mxu0 %vm832_vm2, %v4629_v15 }
 0xa8e   : > { %v4576_v25 = vpop.f32.mrb[158].mxu0 }
 0xa8f   : > { %v4630_v27 = vpack.c.bf16 %v4576_v25, %v4573_v22  ;;  %v7434_v46 = vpop.f32.mrb[159].mxu0 }
 0xa90   : > { %v4617_v47 = vpop.f32.mrb[188].mxu1 }
 0xa91   : > { %v7439_v9 = vpop.f32.mrb[189].mxu1  ;;  %7455 = vmatprep.mubr.msk.bf16.mxu0 %vm832_vm2, %v4630_v27 }
 0xa92   : > { %v4620_v55 = vpop.f32.mrb[190].mxu1 }
 0xa93   : > { %v4631_v11 = vpack.c.bf16 %v4620_v55, %v4617_v47  ;;  %v7440_v21 = vpop.f32.mrb[191].mxu1 }
 0xa95   : > { %7456 = vmatmul.mubr.msk.bf16.gmra.mrb[116].mxu0 %vm832_vm2, %v4631_v11 }
 0xa96   : > { %7483 = vmatprep.mubr.msk.bf16.mxu0 %vm444_vm0, %v9670_v31 }
 0xa98   : > { %v7465_v44 = vpop.f32.mrb[192].mxu1 }
 0xa99   : > { %v9781_v48 = vadd.f32 %v7465_v44, %v6573_v32  ;;  %v4833_v2 = vpop.f32.mrb[193].mxu1 }
 0xa9a   : > { %v9783_v40 = vadd.f32 %v6573_v32, %v4833_v2  ;;  %v7466_v45 = vpop.f32.mrb[194].mxu1 }
 0xa9b   : > { %v9785_v24 = vadd.f32 %v7466_v45, %v6573_v32  ;;  %v4836_v31 = vpop.f32.mrb[195].mxu1 }
 0xa9c   : > { %v9787_v52 = vadd.f32 %v6573_v32, %v4836_v31 }
 0xa9d   : > { %7484 = vmatmul.mubr.msk.bf16.vlgmr.msra.gmra.mrb[160].mxu0 %vm444_vm0, %v9689_v38  ;;  %v5141_v61 = vpack.c.bf16 %v9785_v24, %v9781_v48 }
 0xa9e   : > { %7487 = vmatprep.mubr.msk.bf16.mxu0 %vm444_vm0, %v9694_v29  ;;  %v5140_v57 = vpack.c.bf16 %v9787_v52, %v9783_v40 }
 0xaa0   : > { %v7469_v60 = vpop.f32.mrb[196].mxu1 }
 0xaa1   : > { %v9793_v30 = vadd.f32 %v7469_v60, %v6573_v32  ;;  %v4849_v38 = vpop.f32.mrb[197].mxu1 }
 0xaa2   : > { %v9795_v29 = vadd.f32 %v6573_v32, %v4849_v38 }
 0xaa5   : > { %7488 = vmatmul.mubr.msk.bf16.gmra.mrb[164].mxu0 %vm444_vm0, %v9699_v33  ;;  %v7470_v33 = vpop.f32.mrb[198].mxu1 }
 0xaa6   : > { %7491 = vmatprep.mubr.msk.bf16.mxu0 %vm444_vm0, %v9704_v39  ;;  %v9797_v39 = vadd.f32 %v7470_v33, %v6573_v32 }
 0xaa8   : > { %v5143_v54 = vpack.c.bf16 %v9797_v39, %v9793_v30 }
 0xaad   : > { %7492 = vmatmul.mubr.msk.bf16.gmra.mrb[168].mxu0 %vm444_vm0, %v9709_v28  ;;  %v4852_v28 = vpop.f32.mrb[199].mxu1 }
 0xaae   : > { %7495 = vmatprep.mubr.msk.bf16.mxu0 %vm444_vm0, %v9714_v0  ;;  %v9799_v0 = vadd.f32 %v6573_v32, %v4852_v28 }
 0xab0   : > { %v5142_v13 = vpack.c.bf16 %v9799_v0, %v9795_v29 }
 0xab5   : > { %7496 = vmatmul.mubr.msk.bf16.gmra.mrb[172].mxu0 %vm444_vm0, %v9725_v59  ;;  %v7473_v59 = vpop.f32.mrb[200].mxu1 }
 0xab6   : > { %7521 = vmatprep.mubr.msk.bf16.mxu0 %vm8109_vm1, %v8108_v14  ;;  %v9805_v56 = vadd.f32 %v7473_v59, %v6573_v32  ;;  %v4865_v4 = vpop.f32.mrb[201].mxu1 }
 0xab7   : > { %v9807_v8 = vadd.f32 %v6573_v32, %v4865_v4  ;;  %v7474_v3 = vpop.f32.mrb[202].mxu1 }
 0xab8   : > { %v9809_v1 = vadd.f32 %v7474_v3, %v6573_v32  ;;  %v4868_v10 = vpop.f32.mrb[203].mxu1  ;;  %v9887_v3 = vld [vmem:[%s10331_s4 + $0x3] ss:$0 sm:$0xff] }
 0xab9   : > { %v9811_v34 = vadd.f32 %v6573_v32, %v4868_v10  ;;  %v7477_v12 = vpop.f32.mrb[204].mxu1 }
 0xaba   : > { %v5145_v17 = vpack.c.bf16 %v9809_v1, %v9805_v56  ;;  %v9817_v23 = vadd.f32 %v7477_v12, %v6573_v32  ;;  %v4881_v37 = vpop.f32.mrb[205].mxu1 }
 0xabb   : > { %v5144_v42 = vpack.c.bf16 %v9811_v34, %v9807_v8  ;;  %v9819_v5 = vadd.f32 %v6573_v32, %v4881_v37  ;;  %v7478_v18 = vpop.f32.mrb[206].mxu1 }
 0xabc   : > { %v9821_v62 = vadd.f32 %v7478_v18, %v6573_v32  ;;  %v4884_v16 = vpop.f32.mrb[207].mxu1 }
 0xabd   : > { %v9823_v49 = vadd.f32 %v6573_v32, %v4884_v16  ;;  %v7505_v20 = vpop.f32.mrb[208].mxu1 }
 0xabe   : > { %v5147_v36 = vpack.c.bf16 %v9821_v62, %v9817_v23  ;;  %v9835_v51 = vadd.f32 %v7505_v20, %v9832_v43  ;;  %v5077_v35 = vpop.f32.mrb[209].mxu1 }
 0xabf   : > { %v5146_v26 = vpack.c.bf16 %v9823_v49, %v9819_v5  ;;  %v9838_v6 = vadd.f32 %v9832_v43, %v5077_v35  ;;  %v7506_v19 = vpop.f32.mrb[210].mxu1  ;;  %v9997_v49 = vld [vmem:[%s10334_s7 + $0x30] sm:$0xff] }
 0xac0   : > { %v9841_v53 = vadd.f32 %v7506_v19, %v9832_v43  ;;  %v5080_v7 = vpop.f32.mrb[211].mxu1 }
 0xac1   : > { %v9844_v63 = vadd.f32 %v9832_v43, %v5080_v7  ;;  %v7509_v41 = vpop.f32.mrb[212].mxu1 }
 0xac2   : > { %v5157_v58 = vpack.c.bf16 %v9841_v53, %v9835_v51  ;;  %v9851_v22 = vadd.f32 %v7509_v41, %v9832_v43  ;;  %v5093_v50 = vpop.f32.mrb[213].mxu1  ;;  %v10002_v51 = vld [vmem:[%s10334_s7 + $0x38] sm:$0xff] }
 0xac3   : > { %v5156_v15 = vpack.c.bf16 %v9844_v63, %v9838_v6  ;;  %v9854_v25 = vadd.f32 %v9832_v43, %v5093_v50  ;;  %v7510_v27 = vpop.f32.mrb[214].mxu1 }
 0xac4   : > { %v9857_v46 = vadd.f32 %v7510_v27, %v9832_v43  ;;  %v5096_v47 = vpop.f32.mrb[215].mxu1 }
 0xac5   : > { %v9860_v9 = vadd.f32 %v9832_v43, %v5096_v47 }
 0xac6   : > { %v5159_v55 = vpack.c.bf16 %v9857_v46, %v9851_v22 }
 0xac7   : > { %v5158_v11 = vpack.c.bf16 %v9860_v9, %v9854_v25 }
 0xac8   : > { %v7513_v21 = vpop.f32.mrb[216].mxu1 }
 0xac9   : > { %v9867_v44 = vadd.f32 %v7513_v21, %v9832_v43  ;;  %v5109_v32 = vpop.f32.mrb[217].mxu1 }
 0xaca   : > { %v9870_v2 = vadd.f32 %v9832_v43, %v5109_v32  ;;  %v7514_v45 = vpop.f32.mrb[218].mxu1 }
 0xacb   : > { %v9873_v31 = vadd.f32 %v7514_v45, %v9832_v43  ;;  %v5112_v60 = vpop.f32.mrb[219].mxu1 }
 0xacc   : > { %v9876_v38 = vadd.f32 %v9832_v43, %v5112_v60 }
 0xacd   : > { %v5161_v33 = vpack.c.bf16 %v9873_v31, %v9867_v44 }
 0xace   : > { %v5160_v28 = vpack.c.bf16 %v9876_v38, %v9870_v2 }
 0xad0   : > { %v9882_v59 = vpop.f32.mrb[220].mxu1 }
 0xad1   : > { %v5125_v56 = vpop.f32.mrb[221].mxu1  ;;  %v9979_v8 = vadd.f32 %v9882_v59, %v9832_v43 }
 0xad2   : > { %v7518_v1 = vpop.f32.mrb[222].mxu1 }
 0xad3   : > { %v5128_v34 = vpop.f32.mrb[223].mxu1 }
 0xad4   : > { %v9988_v23 = vadd.f32 %v9832_v43, %v5128_v34 }
 0xb70   : > { %v7485_v4 = vpop.f32.mrb[160].mxu0 }
 0xb71   : > { %v4955_v10 = vpop.f32.mrb[161].mxu0  ;;  %v4964_v37 = vadd.f32 %v7485_v4, %v9887_v3 }
 0xb72   : > { %v7486_v12 = vpop.f32.mrb[162].mxu0  ;;  %v4956_v20 = vadd.f32 %v9887_v3, %v4955_v10 }
 0xb73   : > { %v4967_v18 = vadd.f32 %v7486_v12, %v9887_v3  ;;  %v4958_v16 = vpop.f32.mrb[163].mxu0 }
 0xb74   : > { %v4959_v35 = vadd.f32 %v9887_v3, %v4958_v16 }
 0xb75   : > { %v5149_v19 = vpack.c.bf16 %v4967_v18, %v4964_v37 }
 0xb76   : > { %v5148_v7 = vpack.c.bf16 %v4959_v35, %v4956_v20 }
 0xb77   : > { %v5218_v41 = vsel %vm832_vm2, %v5149_v19, 0 }
 0xb78   : > { %v7489_v50 = vpop.f32.mrb[164].mxu0  ;;  %7526 = vmatpush3.bf16.xpose.msra.mxu1 %v5218_v41  ;;  %v5171_v27 = vsel %vm832_vm2, %v5148_v7, 0 }
 0xb79   : > { %v4971_v47 = vpop.f32.mrb[165].mxu0  ;;  %7520 = vmatpush3.bf16.xpose.msra.mxu0 %v5171_v27  ;;  %7537 = vmatprep.subr.bf16.mxu1 %v8108_v14  ;;  %v4980_v32 = vadd.f32 %v7489_v50, %v9887_v3 }
 0xb7a   : > { %v7490_v21 = vpop.f32.mrb[166].mxu0  ;;  %7531 = vmatprep.subr.bf16.mxu0 %v8108_v14  ;;  %v4972_v4 = vadd.f32 %v9887_v3, %v4971_v47 }
 0xb7b   : > { %v4983_v45 = vadd.f32 %v7490_v21, %v9887_v3  ;;  %v4974_v60 = vpop.f32.mrb[167].mxu0 }
 0xb7c   : > { %v4975_v10 = vadd.f32 %v9887_v3, %v4974_v60 }
 0xb7d   : > { %v5151_v12 = vpack.c.bf16 %v4983_v45, %v4980_v32 }
 0xb7e   : > { %v5150_v37 = vpack.c.bf16 %v4975_v10, %v4972_v4 }
 0xb7f   : > { %7528 = vmatmul.mubr.msk.bf16.vlgmr.msra.gmra.mrb[224].mxu1 %vm832_vm2, %v5141_v61  ;;  %v5312_v18 = vsel %vm832_vm2, %v5151_v12, 0 }
 0xb80   : > { %v7493_v16 = vpop.f32.mrb[168].mxu0  ;;  %7522 = vmatmul.mubr.msk.bf16.vlgmr.msra.gmra.mrb[176].mxu0 %vm832_vm2, %v5140_v57  ;;  %v5265_v20 = vsel %vm832_vm2, %v5150_v37, 0  ;;  %7538 = vmatpush3.bf16.xpose.msra.mxu1 %v5312_v18 }
 0xb81   : > { %v4987_v35 = vpop.f32.mrb[169].mxu0  ;;  %7532 = vmatpush3.bf16.xpose.msra.mxu0 %v5265_v20  ;;  %7533 = vmatprep.mubr.msk.bf16.mxu0 %vm8109_vm1, %v8108_v14  ;;  %v4996_v48 = vadd.f32 %v7493_v16, %v9887_v3 }
 0xb82   : > { %v7494_v19 = vpop.f32.mrb[170].mxu0  ;;  %7543 = vmatprep.subr.bf16.mxu0 %v8108_v14  ;;  %7539 = vmatprep.mubr.msk.bf16.mxu1 %vm8109_vm1, %v8108_v14  ;;  %v4988_v52 = vadd.f32 %v9887_v3, %v4987_v35 }
 0xb83   : > { %v4999_v40 = vadd.f32 %v7494_v19, %v9887_v3  ;;  %v4990_v24 = vpop.f32.mrb[171].mxu0  ;;  %7549 = vmatprep.subr.bf16.mxu1 %v8108_v14 }
 0xb84   : > { %v4991_v61 = vadd.f32 %v9887_v3, %v4990_v24 }
 0xb85   : > { %v5153_v57 = vpack.c.bf16 %v4999_v40, %v4996_v48 }
 0xb86   : > { %v5152_v7 = vpack.c.bf16 %v4991_v61, %v4988_v52 }
 0xb87   : > { %7540 = vmatmul.mubr.msk.bf16.vlgmr.msra.gmra.mrb[228].mxu1 %vm832_vm2, %v5143_v54  ;;  %v5406_v41 = vsel %vm832_vm2, %v5153_v57, 0 }
 0xb88   : > { %v7497_v50 = vpop.f32.mrb[172].mxu0  ;;  %7534 = vmatmul.mubr.msk.bf16.vlgmr.msra.gmra.mrb[180].mxu0 %vm832_vm2, %v5142_v13  ;;  %v5359_v27 = vsel %vm832_vm2, %v5152_v7, 0  ;;  %7550 = vmatpush3.bf16.xpose.msra.mxu1 %v5406_v41 }
 0xb89   : > { %v5003_v47 = vpop.f32.mrb[173].mxu0  ;;  %7544 = vmatpush3.bf16.xpose.msra.mxu0 %v5359_v27  ;;  %7545 = vmatprep.mubr.msk.bf16.mxu0 %vm8109_vm1, %v8108_v14  ;;  %v5012_v30 = vadd.f32 %v7497_v50, %v9887_v3 }
 0xb8a   : > { %v7498_v21 = vpop.f32.mrb[174].mxu0  ;;  %7555 = vmatprep.subr.bf16.mxu0 %v8108_v14  ;;  %7551 = vmatprep.mubr.msk.bf16.mxu1 %vm8109_vm1, %v8108_v14  ;;  %v5004_v0 = vadd.f32 %v9887_v3, %v5003_v47 }
 0xb8b   : > { %v5015_v29 = vadd.f32 %v7498_v21, %v9887_v3  ;;  %v5006_v39 = vpop.f32.mrb[175].mxu0  ;;  %7561 = vmatprep.subr.bf16.mxu1 %v8108_v14 }
 0xb8c   : > { %v5007_v54 = vadd.f32 %v9887_v3, %v5006_v39 }
 0xb8d   : > { %v5155_v13 = vpack.c.bf16 %v5015_v29, %v5012_v30 }
 0xb8e   : > { %v5154_v32 = vpack.c.bf16 %v5007_v54, %v5004_v0 }
 0xb8f   : > { %7552 = vmatmul.mubr.msk.bf16.vlgmr.msra.gmra.mrb[232].mxu1 %vm832_vm2, %v5145_v17  ;;  %v5500_v45 = vsel %vm832_vm2, %v5155_v13, 0  ;;  %v9982_v17 = vadd.f32 %v9832_v43, %v5125_v56 }
 0xb90   : > { %7546 = vmatmul.mubr.msk.bf16.vlgmr.msra.gmra.mrb[184].mxu0 %vm832_vm2, %v5144_v42  ;;  %v5453_v60 = vsel %vm832_vm2, %v5154_v32, 0  ;;  %7562 = vmatpush3.bf16.xpose.msra.mxu1 %v5500_v45  ;;  %v9985_v42 = vadd.f32 %v7518_v1, %v9832_v43 }
 0xb91   : > { %7556 = vmatpush3.bf16.xpose.msra.mxu0 %v5453_v60  ;;  %7557 = vmatprep.mubr.msk.bf16.mxu0 %vm8109_vm1, %v8108_v14  ;;  %v5162_v62 = vpack.c.bf16 %v9988_v23, %v9982_v17 }
 0xb92   : > { %7563 = vmatprep.mubr.msk.bf16.mxu1 %vm8109_vm1, %v8108_v14  ;;  %7567 = vmatprep.subr.bf16.mxu0 %v8108_v14  ;;  %v5163_v5 = vpack.c.bf16 %v9985_v42, %v9979_v8 }
 0xb93   : > { %7573 = vmatprep.subr.bf16.mxu1 %v8108_v14 }
 0xb97   : > { %7564 = vmatmul.mubr.msk.bf16.vlgmr.msra.gmra.mrb[236].mxu1 %vm832_vm2, %v5147_v36 }
 0xb98   : > { %7558 = vmatmul.mubr.msk.bf16.vlgmr.msra.gmra.mrb[188].mxu0 %vm832_vm2, %v5146_v26  ;;  %7574 = vmatpush3.bf16.msra.mxu1 %v5157_v58 }
 0xb99   : > { %7568 = vmatpush3.bf16.msra.mxu0 %v5156_v15  ;;  %7569 = vmatprep.mubr.msk.bf16.mxu0 %vm8109_vm1, %v8108_v14 }
 0xb9a   : > { %7579 = vmatprep.subr.bf16.mxu0 %v8108_v14  ;;  %7575 = vmatprep.mubr.msk.bf16.mxu1 %vm8109_vm1, %v8108_v14 }
 0xb9b   : > { %7585 = vmatprep.subr.bf16.mxu1 %v8108_v14 }
 0xc52   : > { %v5254_v36 = vpop.f32.mrb[224].mxu1 }
 0xc53   : > { %v5207_v26 = vpop.f32.mrb[176].mxu0  ;;  %v7529_v43 = vpop.f32.mrb[225].mxu1  ;;  %v10011_v3 = vadd.f32 %v9997_v49, %v5254_v36 }
 0xc54   : > { %v10005_v6 = vadd.f32 %v9997_v49, %v5207_v26  ;;  %v7523_v53 = vpop.f32.mrb[177].mxu0  ;;  %v5257_v63 = vpop.f32.mrb[226].mxu1 }
 0xc55   : > { %v5210_v58 = vpop.f32.mrb[178].mxu0  ;;  %v7530_v15 = vpop.f32.mrb[227].mxu1  ;;  %v10016_v12 = vadd.f32 %v10002_v51, %v5257_v63  ;;  %v5549_v18 = vsel %vm1209_vm3, %v10011_v3, -inf }
 0xc56   : > { %v10008_v59 = vadd.f32 %v10002_v51, %v5210_v58  ;;  %v5543_v4 = vsel %vm1209_vm3, %v10005_v6, -inf  ;;  %v7524_v10 = vpop.f32.mrb[179].mxu0 }
 0xc57   : > { %5544 = vmax.xlane.f32.xlu0 %v5543_v4  ;;  %v5552_v40 = vsel %vm1209_vm3, %v10016_v12, -inf }
 0xc58   : > { %v5546_v37 = vsel %vm1209_vm3, %v10008_v59, -inf }
 0xc59   : > { %5547 = vmax.xlane.f32.xlu1 %v5546_v37 }
 0xc5a   : > { %v5348_v16 = vpop.f32.mrb[228].mxu1 }
 0xc5b   : > { %5550 = vmax.xlane.f32.xlu0 %v5549_v18  ;;  %v5301_v20 = vpop.f32.mrb[180].mxu0  ;;  %v7541_v35 = vpop.f32.mrb[229].mxu1  ;;  %v10031_v7 = vadd.f32 %v9997_v49, %v5348_v16 }
 0xc5c   : > { %v10023_v19 = vadd.f32 %v9997_v49, %v5301_v20  ;;  %v7535_v48 = vpop.f32.mrb[181].mxu0  ;;  %v5351_v24 = vpop.f32.mrb[230].mxu1 }
 0xc5d   : > { %5553 = vmax.xlane.f32.xlu1 %v5552_v40  ;;  %v5304_v52 = vpop.f32.mrb[182].mxu0  ;;  %v7542_v61 = vpop.f32.mrb[231].mxu1  ;;  %v10036_v27 = vadd.f32 %v10002_v51, %v5351_v24  ;;  %v5561_v21 = vsel %vm1209_vm3, %v10031_v7, -inf }
 0xc5e   : > { %v10028_v57 = vadd.f32 %v10002_v51, %v5304_v52  ;;  %v5555_v41 = vsel %vm1209_vm3, %v10023_v19, -inf  ;;  %v7536_v50 = vpop.f32.mrb[183].mxu0 }
 0xc5f   : > { %5556 = vmax.xlane.f32.xlu0 %v5555_v41  ;;  %v5564_v13 = vsel %vm1209_vm3, %v10036_v27, -inf }
 0xc60   : > { %v5558_v47 = vsel %vm1209_vm3, %v10028_v57, -inf }
 0xc61   : > { %5559 = vmax.xlane.f32.xlu1 %v5558_v47 }
 0xc62   : > { %v5442_v30 = vpop.f32.mrb[232].mxu1 }
 0xc63   : > { %5562 = vmax.xlane.f32.xlu0 %v5561_v21  ;;  %v5395_v29 = vpop.f32.mrb[184].mxu0  ;;  %v7553_v39 = vpop.f32.mrb[233].mxu1  ;;  %v10051_v1 = vadd.f32 %v9997_v49, %v5442_v30 }
 0xc64   : > { %v10043_v0 = vadd.f32 %v9997_v49, %v5395_v29  ;;  %v7547_v54 = vpop.f32.mrb[185].mxu0  ;;  %v5445_v32 = vpop.f32.mrb[234].mxu1 }
 0xc65   : > { %5565 = vmax.xlane.f32.xlu1 %v5564_v13  ;;  %v5398_v45 = vpop.f32.mrb[186].mxu0  ;;  %v7554_v60 = vpop.f32.mrb[235].mxu1  ;;  %v10056_v26 = vadd.f32 %v10002_v51, %v5445_v32  ;;  %v5573_v53 = vsel %vm1209_vm3, %v10051_v1, -inf }
 0xc66   : > { %v10048_v56 = vadd.f32 %v10002_v51, %v5398_v45  ;;  %v5567_v34 = vsel %vm1209_vm3, %v10043_v0, -inf  ;;  %v7548_v36 = vpop.f32.mrb[187].mxu0 }
 0xc67   : > { %5568 = vmax.xlane.f32.xlu0 %v5567_v34  ;;  %v5576_v37 = vsel %vm1209_vm3, %v10056_v26, -inf }
 0xc68   : > { %v5570_v43 = vsel %vm1209_vm3, %v10048_v56, -inf }
 0xc69   : > { %5571 = vmax.xlane.f32.xlu1 %v5570_v43 }
 0xc6a   : > { %v5536_v63 = vpop.f32.mrb[236].mxu1 }
 0xc6b   : > { %5574 = vmax.xlane.f32.xlu0 %v5573_v53  ;;  %v5489_v58 = vpop.f32.mrb[188].mxu0  ;;  %v7565_v15 = vpop.f32.mrb[237].mxu1  ;;  %v10071_v48 = vadd.f32 %v9997_v49, %v5536_v63 }
 0xc6c   : > { %v10063_v4 = vadd.f32 %v9997_v49, %v5489_v58  ;;  %v7559_v10 = vpop.f32.mrb[189].mxu0  ;;  %v5539_v18 = vpop.f32.mrb[238].mxu1 }
 0xc6d   : > { %5577 = vmax.xlane.f32.xlu1 %v5576_v37  ;;  %v5492_v16 = vpop.f32.mrb[190].mxu0  ;;  %v7566_v20 = vpop.f32.mrb[239].mxu1  ;;  %v10076_v52 = vadd.f32 %v10002_v51, %v5539_v18  ;;  %v5585_v41 = vsel %vm1209_vm3, %v10071_v48, -inf }
 0xc6e   : > { %v10068_v35 = vadd.f32 %v10002_v51, %v5492_v16  ;;  %v5579_v40 = vsel %vm1209_vm3, %v10063_v4, -inf  ;;  %v7560_v24 = vpop.f32.mrb[191].mxu0 }
 0xc6f   : > { %5580 = vmax.xlane.f32.xlu0 %v5579_v40  ;;  %v5588_v49 = vsel %vm1209_vm3, %v10076_v52, -inf }
 0xc70   : > { %v5582_v61 = vsel %vm1209_vm3, %v10068_v35, -inf }
 0xc71   : > { %5583 = vmax.xlane.f32.xlu1 %v5582_v61 }
 0xc73   : > { %5586 = vmax.xlane.f32.xlu0 %v5585_v41 }
 0xc75   : > { %5589 = vmax.xlane.f32.xlu1 %v5588_v49 }
 0xce4   : > { %v5545_v50 = vpop.xlane.xlu0 %5544 }
 0xce5   : > { %v5591_v47 = vsub.f32 %v10005_v6, %v5545_v50 }
 0xce6   : > { %v5548_v21 = vpop.xlane.xlu1 %5547 }
 0xce7   : > { %v5607_v30 = vmul.f32 1.442695, %v5591_v47  ;;  %v5592_v51 = vsub.f32 %v10008_v59, %v5548_v21 }
 0xce8   : > { %v5551_v29 = vpop.xlane.xlu0 %5550 }
 0xce9   : > { %7956 = vpow2.f32 %v5607_v30  ;;  %v5609_v39 = vmul.f32 1.442695, %v5592_v51  ;;  %v5593_v54 = vsub.f32 %v10011_v3, %v5551_v29 }
 0xcea   : > { %v5554_v13 = vpop.xlane.xlu1 %5553 }
 0xceb   : > { %7958 = vpow2.f32 %v5609_v39  ;;  %v5611_v32 = vmul.f32 1.442695, %v5593_v54  ;;  %v5594_v45 = vsub.f32 %v10016_v12, %v5554_v13 }
 0xcec   : > { %v5557_v60 = vpop.xlane.xlu0 %5556 }
 0xced   : > { %7960 = vpow2.f32 %v5611_v32  ;;  %v5613_v34 = vmul.f32 1.442695, %v5594_v45  ;;  %v5595_v36 = vsub.f32 %v10023_v19, %v5557_v60 }
 0xcee   : > { %v5560_v6 = vpop.xlane.xlu1 %5559 }
 0xcef   : > { %7962 = vpow2.f32 %v5613_v34  ;;  %v5615_v43 = vmul.f32 1.442695, %v5595_v36  ;;  %v5596_v59 = vsub.f32 %v10028_v57, %v5560_v6 }
 0xcf0   : > { %v5563_v53 = vpop.xlane.xlu0 %5562 }
 0xcf1   : > { %7964 = vpow2.f32 %v5615_v43  ;;  %v5617_v63 = vmul.f32 1.442695, %v5596_v59  ;;  %v5597_v3 = vsub.f32 %v10031_v7, %v5563_v53 }
 0xcf2   : > { %v5566_v58 = vpop.xlane.xlu1 %5565 }
 0xcf3   : > { %v10091_v15 = vpop.eup %7956  ;;  %7966 = vpow2.f32 %v5617_v63  ;;  %v5619_v12 = vmul.f32 1.442695, %v5597_v3  ;;  %v5598_v10 = vsub.f32 %v10036_v27, %v5566_v58 }
 0xcf4   : > { %v5569_v37 = vpop.xlane.xlu0 %5568  ;;  %v5639_v19 = vsel %vm1209_vm3, %v10091_v15, 0.0 }
 0xcf5   : > { %v10096_v18 = vpop.eup %7958  ;;  %7968 = vpow2.f32 %v5619_v12  ;;  %v5621_v57 = vmul.f32 1.442695, %v5598_v10  ;;  %v5599_v16 = vsub.f32 %v10043_v0, %v5569_v37  ;;  %5640 = vadd.xlane.f32.xlu0 %v5639_v19 }
 0xcf6   : > { %v5572_v20 = vpop.xlane.xlu1 %5571  ;;  %v5642_v7 = vsel %vm1209_vm3, %v10096_v18, 0.0 }
 0xcf7   : > { %v10101_v40 = vpop.eup %7960  ;;  %7970 = vpow2.f32 %v5621_v57  ;;  %v5623_v24 = vmul.f32 1.442695, %v5599_v16  ;;  %v5600_v27 = vsub.f32 %v10048_v56, %v5572_v20  ;;  %5643 = vadd.xlane.f32.xlu1 %v5642_v7 }
 0xcf8   : > { %v5575_v61 = vpop.xlane.xlu0 %5574  ;;  %v5645_v41 = vsel %vm1209_vm3, %v10101_v40, 0.0 }
 0xcf9   : > { %v10106_v49 = vpop.eup %7962  ;;  %7972 = vpow2.f32 %v5623_v24  ;;  %v5625_v0 = vmul.f32 1.442695, %v5600_v27  ;;  %v5601_v50 = vsub.f32 %v10051_v1, %v5575_v61  ;;  %5646 = vadd.xlane.f32.xlu0 %v5645_v41 }
 0xcfa   : > { %v5578_v47 = vpop.xlane.xlu1 %5577  ;;  %v5648_v21 = vsel %vm1209_vm3, %v10106_v49, 0.0 }
 0xcfb   : > { %v10111_v30 = vpop.eup %7964  ;;  %7974 = vpow2.f32 %v5625_v0  ;;  %v5627_v56 = vmul.f32 1.442695, %v5601_v50  ;;  %v5602_v51 = vsub.f32 %v10056_v26, %v5578_v47  ;;  %5649 = vadd.xlane.f32.xlu1 %v5648_v21 }
 0xcfc   : > { %v5581_v29 = vpop.xlane.xlu0 %5580  ;;  %v5651_v39 = vsel %vm1209_vm3, %v10111_v30, 0.0 }
 0xcfd   : > { %v10116_v54 = vpop.eup %7966  ;;  %7976 = vpow2.f32 %v5627_v56  ;;  %v5629_v1 = vmul.f32 1.442695, %v5602_v51  ;;  %v5603_v13 = vsub.f32 %v10063_v4, %v5581_v29  ;;  %5652 = vadd.xlane.f32.xlu0 %v5651_v39 }
 0xcfe   : > { %v5584_v32 = vpop.xlane.xlu1 %5583  ;;  %v5654_v45 = vsel %vm1209_vm3, %v10116_v54, 0.0 }
 0xcff   : > { %v10121_v60 = vpop.eup %7968  ;;  %7978 = vpow2.f32 %v5629_v1  ;;  %v5631_v26 = vmul.f32 1.442695, %v5603_v13  ;;  %v5604_v34 = vsub.f32 %v10068_v35, %v5584_v32  ;;  %5655 = vadd.xlane.f32.xlu1 %v5654_v45 }
 0xd00   : > { %v5587_v36 = vpop.xlane.xlu0 %5586  ;;  %v5657_v6 = vsel %vm1209_vm3, %v10121_v60, 0.0 }
 0xd01   : > { %v10126_v43 = vpop.eup %7970  ;;  %7980 = vpow2.f32 %v5631_v26  ;;  %v5633_v4 = vmul.f32 1.442695, %v5604_v34  ;;  %v5605_v59 = vsub.f32 %v10071_v48, %v5587_v36  ;;  %5658 = vadd.xlane.f32.xlu0 %v5657_v6 }
 0xd02   : > { %v5590_v53 = vpop.xlane.xlu1 %5589  ;;  %v5660_v63 = vsel %vm1209_vm3, %v10126_v43, 0.0 }
 0xd03   : > { %v10131_v3 = vpop.eup %7972  ;;  %7982 = vpow2.f32 %v5633_v4  ;;  %v5635_v35 = vmul.f32 1.442695, %v5605_v59  ;;  %v5606_v58 = vsub.f32 %v10076_v52, %v5590_v53  ;;  %5661 = vadd.xlane.f32.xlu1 %v5660_v63 }
 0xd04   : > { %v5663_v12 = vsel %vm1209_vm3, %v10131_v3, 0.0 }
 0xd05   : > { %v10136_v10 = vpop.eup %7974  ;;  %7984 = vpow2.f32 %v5635_v35  ;;  %v5637_v37 = vmul.f32 1.442695, %v5606_v58  ;;  %5664 = vadd.xlane.f32.xlu0 %v5663_v12 }
 0xd06   : > { %v5666_v48 = vsel %vm1209_vm3, %v10136_v10, 0.0 }
 0xd07   : > { %v10140_v19 = vpop.eup %7976  ;;  %7986 = vpow2.f32 %v5637_v37  ;;  %5667 = vadd.xlane.f32.xlu1 %v5666_v48 }
 0xd08   : > { %v5669_v57 = vsel %vm1209_vm3, %v10140_v19, 0.0 }
 0xd09   : > { %v10144_v52 = vpop.eup %7978  ;;  %5670 = vadd.xlane.f32.xlu0 %v5669_v57 }
 0xd0a   : > { %v5672_v16 = vsel %vm1209_vm3, %v10144_v52, 0.0 }
 0xd0b   : > { %v10148_v20 = vpop.eup %7980  ;;  %5673 = vadd.xlane.f32.xlu1 %v5672_v16 }
 0xd0c   : > { %v5675_v7 = vsel %vm1209_vm3, %v10148_v20, 0.0 }
 0xd0d   : > { %v10152_v24 = vpop.eup %7982  ;;  %5676 = vadd.xlane.f32.xlu0 %v5675_v7 }
 0xd0e   : > { %v5678_v27 = vsel %vm1209_vm3, %v10152_v24, 0.0 }
 0xd0f   : > { %v10156_v61 = vpop.eup %7984  ;;  %5679 = vadd.xlane.f32.xlu1 %v5678_v27 }
 0xd10   : > { %v5681_v41 = vsel %vm1209_vm3, %v10156_v61, 0.0 }
 0xd11   : > { %v10160_v0 = vpop.eup %7986  ;;  %5682 = vadd.xlane.f32.xlu0 %v5681_v41 }
 0xd12   : > { %v5684_v50 = vsel %vm1209_vm3, %v10160_v0, 0.0 }
 0xd13   : > { %5685 = vadd.xlane.f32.xlu1 %v5684_v50 }
 0xd82   : > { %v5641_v47 = vpop.xlane.xlu0 %5640 }
 0xd83   : > { %7988 = vrcp.f32 %v5641_v47 }
 0xd84   : > { %v5644_v21 = vpop.xlane.xlu1 %5643 }
 0xd85   : > { %7990 = vrcp.f32 %v5644_v21 }
 0xd86   : > { %v5647_v56 = vpop.xlane.xlu0 %5646 }
 0xd87   : > { %7992 = vrcp.f32 %v5647_v56 }
 0xd88   : > { %v5650_v51 = vpop.xlane.xlu1 %5649 }
 0xd89   : > { %7994 = vrcp.f32 %v5650_v51 }
 0xd8a   : > { %v5653_v29 = vpop.xlane.xlu0 %5652 }
 0xd8b   : > { %7996 = vrcp.f32 %v5653_v29 }
 0xd8c   : > { %v5656_v39 = vpop.xlane.xlu1 %5655 }
 0xd8d   : > { %v7989_v1 = vpop.eup %7988  ;;  %7998 = vrcp.f32 %v5656_v39 }
 0xd8e   : > { %v5659_v13 = vpop.xlane.xlu0 %5658  ;;  %v5703_v45 = vmul.f32 %v7989_v1, %v10091_v15 }
 0xd8f   : > { %v7991_v32 = vpop.eup %7990  ;;  %8000 = vrcp.f32 %v5659_v13 }
 0xd90   : > { %v5704_v26 = vmul.f32 %v7991_v32, %v10096_v18  ;;  %v5662_v34 = vpop.xlane.xlu1 %5661 }
 0xd91   : > { %v7993_v36 = vpop.eup %7992  ;;  %8002 = vrcp.f32 %v5662_v34 }
 0xd92   : > { %v5665_v6 = vpop.xlane.xlu0 %5664  ;;  %v5719_v4 = vpack.c.bf16 %v5704_v26, %v5703_v45  ;;  %v5705_v53 = vmul.f32 %v7993_v36, %v10101_v40 }
 0xd93   : > { %v7995_v59 = vpop.eup %7994  ;;  %8004 = vrcp.f32 %v5665_v6 }
 0xd94   : > { %v5706_v63 = vmul.f32 %v7995_v59, %v10106_v49  ;;  %7570 = vmatmul.mubr.msk.bf16.vlgmr.msra.gmra.mrb[192].mxu0 %vm1209_vm3, %v5719_v4  ;;  %v5668_v35 = vpop.xlane.xlu1 %5667 }
 0xd95   : > { %v7997_v58 = vpop.eup %7996  ;;  %7580 = vmatpush3.bf16.msra.mxu0 %v5158_v11  ;;  %8006 = vrcp.f32 %v5668_v35  ;;  %7581 = vmatprep.mubr.msk.bf16.mxu0 %vm8109_vm1, %v8108_v14 }
 0xd96   : > { %v5671_v15 = vpop.xlane.xlu0 %5670  ;;  %v5720_v18 = vpack.c.bf16 %v5706_v63, %v5705_v53  ;;  %7591 = vmatprep.subr.bf16.mxu0 %v8108_v14  ;;  %v5707_v40 = vmul.f32 %v7997_v58, %v10111_v30 }
 0xd97   : > { %v7999_v12 = vpop.eup %7998  ;;  %8008 = vrcp.f32 %v5671_v15 }
 0xd98   : > { %v5708_v49 = vmul.f32 %v7999_v12, %v10116_v54  ;;  %7576 = vmatmul.mubr.msk.bf16.vlgmr.msra.gmra.mrb[240].mxu1 %vm1209_vm3, %v5720_v18  ;;  %v5674_v37 = vpop.xlane.xlu1 %5673 }
 0xd99   : > { %v8001_v48 = vpop.eup %8000  ;;  %7586 = vmatpush3.bf16.msra.mxu1 %v5159_v55  ;;  %8010 = vrcp.f32 %v5674_v37  ;;  %7587 = vmatprep.mubr.msk.bf16.mxu1 %vm8109_vm1, %v8108_v14 }
 0xd9a   : > { %v5677_v25 = vpop.xlane.xlu0 %5676  ;;  %v5721_v9 = vpack.c.bf16 %v5708_v49, %v5707_v40  ;;  %7597 = vmatprep.subr.bf16.mxu1 %v8108_v14  ;;  %v5709_v30 = vmul.f32 %v8001_v48, %v10121_v60 }
 0xd9b   : > { %v8003_v11 = vpop.eup %8002  ;;  %8012 = vrcp.f32 %v5677_v25 }
 0xd9c   : > { %v5710_v54 = vmul.f32 %v8003_v11, %v10126_v43  ;;  %7582 = vmatmul.mubr.msk.bf16.vlgmr.msra.gmra.mrb[196].mxu0 %vm1209_vm3, %v5721_v9  ;;  %v5680_v57 = vpop.xlane.xlu1 %5679 }
 0xd9d   : > { %v8005_v16 = vpop.eup %8004  ;;  %7592 = vmatpush3.bf16.msra.mxu0 %v5160_v28  ;;  %8014 = vrcp.f32 %v5680_v57  ;;  %7593 = vmatprep.mubr.msk.bf16.mxu0 %vm8109_vm1, %v8108_v14 }
 0xd9e   : > { %v5683_v22 = vpop.xlane.xlu0 %5682  ;;  %v5722_v46 = vpack.c.bf16 %v5710_v54, %v5709_v30  ;;  %7603 = vmatprep.subr.bf16.mxu0 %v8108_v14  ;;  %v5711_v60 = vmul.f32 %v8005_v16, %v10131_v3 }
 0xd9f   : > { %v8007_v55 = vpop.eup %8006  ;;  %8016 = vrcp.f32 %v5683_v22  ;;  %v6643_v22 = vld [vmem:[%s10336_s9] ss:$0 sm:$0xff] }
 0xda0   : > { %v5712_v43 = vmul.f32 %v8007_v55, %v10136_v10  ;;  %7588 = vmatmul.mubr.msk.bf16.vlgmr.msra.gmra.mrb[244].mxu1 %vm1209_vm3, %v5722_v46  ;;  %v5686_v7 = vpop.xlane.xlu1 %5685 }
 0xda1   : > { %v8009_v27 = vpop.eup %8008  ;;  %7598 = vmatpush3.bf16.msra.mxu1 %v5161_v33  ;;  %8018 = vrcp.f32 %v5686_v7  ;;  %7599 = vmatprep.mubr.msk.bf16.mxu1 %vm8109_vm1, %v8108_v14 }
 0xda2   : > { %v5723_v2 = vpack.c.bf16 %v5712_v43, %v5711_v60  ;;  %7609 = vmatprep.subr.bf16.mxu1 %v8108_v14  ;;  %v5713_v28 = vmul.f32 %v8009_v27, %v10140_v19 }
 0xda3   : > { %v8011_v38 = vpop.eup %8010 }
 0xda4   : > { %v5714_v3 = vmul.f32 %v8011_v38, %v10144_v52  ;;  %7594 = vmatmul.mubr.msk.bf16.vlgmr.msra.gmra.mrb[200].mxu0 %vm1209_vm3, %v5723_v2 }
 0xda5   : > { %v8013_v10 = vpop.eup %8012  ;;  %7604 = vmatpush3.bf16.msra.mxu0 %v5162_v62  ;;  %7605 = vmatprep.mubr.msk.bf16.mxu0 %vm8109_vm1, %v8108_v14 }
 0xda6   : > { %v5724_v44 = vpack.c.bf16 %v5714_v3, %v5713_v28  ;;  %v5715_v33 = vmul.f32 %v8013_v10, %v10148_v20 }
 0xda7   : > { %v8015_v31 = vpop.eup %8014 }
 0xda8   : > { %v5716_v41 = vmul.f32 %v8015_v31, %v10152_v24  ;;  %7600 = vmatmul.mubr.msk.bf16.vlgmr.msra.gmra.mrb[248].mxu1 %vm1209_vm3, %v5724_v44  ;;  %v6634_v24 = vld [vmem:[%s10335_s8 + $0xc] sm:$0xf] }
 0xda9   : > { %v8017_v19 = vpop.eup %8016  ;;  %7610 = vmatpush3.bf16.msra.mxu1 %v5163_v5  ;;  %7611 = vmatprep.mubr.msk.bf16.mxu1 %vm8109_vm1, %v8108_v14  ;;  %v6114_v8 = vsel %vm3094_vm4, %v6634_v24, 0 }
 0xdaa   : > { %v5725_v17 = vpack.c.bf16 %v5716_v41, %v5715_v33  ;;  %v5717_v62 = vmul.f32 %v8017_v19, %v10156_v61  ;;  %7688 = vmatprep.subr.msk.bf16.mxu0 %vm3094_vm4, %v6634_v24 }
 0xdab   : > { %v8019_v23 = vpop.eup %8018 }
 0xdac   : > { %v5718_v52 = vmul.f32 %v8019_v23, %v10160_v0  ;;  %7606 = vmatmul.mubr.msk.bf16.vlgmr.msra.gmra.mrb[204].mxu0 %vm1209_vm3, %v5725_v17 }
 0xdad   : > { %7616 = vmatpush3.bf16.msra.mxu0 %v6114_v8 }
 0xdae   : > { %v5726_v20 = vpack.c.bf16 %v5718_v52, %v5717_v62 }
 0xdb0   : > { %7612 = vmatmul.mubr.msk.bf16.vlgmr.msra.gmra.mrb[252].mxu1 %vm1209_vm3, %v5726_v20 }
 0xe67   : > { %v5764_v14 = vpop.f32.mrb[192].mxu0 }
 0xe68   : > { %v7571_v42 = vpop.f32.mrb[193].mxu0 }
 0xe69   : > { %v5767_v5 = vpop.f32.mrb[194].mxu0 }
 0xe6a   : > { %v6079_v61 = vpack.c.bf16 %v5767_v5, %v5764_v14  ;;  %v7572_v50 = vpop.f32.mrb[195].mxu0 }
 0xe6b   : > { %v5808_v0 = vpop.f32.mrb[240].mxu1 }
 0xe6c   : > { %v7577_v47 = vpop.f32.mrb[241].mxu1  ;;  %7617 = vmatprep.mubr.msk.bf16.mxu0 %vm832_vm2, %v6079_v61 }
 0xe6d   : > { %v5811_v21 = vpop.f32.mrb[242].mxu1 }
 0xe6e   : > { %v6080_v56 = vpack.c.bf16 %v5811_v21, %v5808_v0  ;;  %v7578_v51 = vpop.f32.mrb[243].mxu1 }
 0xe6f   : > { %v5852_v29 = vpop.f32.mrb[196].mxu0 }
 0xe70   : > { %v7583_v39 = vpop.f32.mrb[197].mxu0  ;;  %7618 = vmatmul.mubr.msk.bf16.vlgmr.msra.gmra.mrb[104].mxu0 %vm832_vm2, %v6080_v56 }
 0xe71   : > { %v5855_v1 = vpop.f32.mrb[198].mxu0 }
 0xe72   : > { %v6081_v13 = vpack.c.bf16 %v5855_v1, %v5852_v29  ;;  %v7584_v32 = vpop.f32.mrb[199].mxu0 }
 0xe73   : > { %v5896_v45 = vpop.f32.mrb[244].mxu1 }
 0xe74   : > { %v7589_v26 = vpop.f32.mrb[245].mxu1  ;;  %7621 = vmatprep.mubr.msk.bf16.mxu0 %vm832_vm2, %v6081_v13 }
 0xe75   : > { %v5899_v34 = vpop.f32.mrb[246].mxu1 }
 0xe76   : > { %v6082_v36 = vpack.c.bf16 %v5899_v34, %v5896_v45  ;;  %v7590_v6 = vpop.f32.mrb[247].mxu1 }
 0xe77   : > { %v5940_v4 = vpop.f32.mrb[200].mxu0 }
 0xe78   : > { %v7595_v59 = vpop.f32.mrb[201].mxu0  ;;  %7622 = vmatmul.mubr.msk.bf16.gmra.mrb[108].mxu0 %vm832_vm2, %v6082_v36 }
 0xe79   : > { %v5943_v53 = vpop.f32.mrb[202].mxu0 }
 0xe7a   : > { %v6083_v63 = vpack.c.bf16 %v5943_v53, %v5940_v4  ;;  %v7596_v35 = vpop.f32.mrb[203].mxu0 }
 0xe7b   : > { %v5984_v58 = vpop.f32.mrb[248].mxu1 }
 0xe7c   : > { %v7601_v15 = vpop.f32.mrb[249].mxu1  ;;  %7625 = vmatprep.mubr.msk.bf16.mxu0 %vm832_vm2, %v6083_v63 }
 0xe7d   : > { %v5987_v18 = vpop.f32.mrb[250].mxu1 }
 0xe7e   : > { %v6084_v12 = vpack.c.bf16 %v5987_v18, %v5984_v58  ;;  %v7602_v40 = vpop.f32.mrb[251].mxu1 }
 0xe7f   : > { %v6028_v49 = vpop.f32.mrb[204].mxu0 }
 0xe80   : > { %v7607_v37 = vpop.f32.mrb[205].mxu0  ;;  %7626 = vmatmul.mubr.msk.bf16.gmra.mrb[112].mxu0 %vm832_vm2, %v6084_v12 }
 0xe81   : > { %v6031_v48 = vpop.f32.mrb[206].mxu0 }
 0xe82   : > { %v6085_v25 = vpack.c.bf16 %v6031_v48, %v6028_v49  ;;  %v7608_v9 = vpop.f32.mrb[207].mxu0 }
 0xe83   : > { %v6072_v11 = vpop.f32.mrb[252].mxu1 }
 0xe84   : > { %v7613_v30 = vpop.f32.mrb[253].mxu1  ;;  %7629 = vmatprep.mubr.msk.bf16.mxu0 %vm832_vm2, %v6085_v25 }
 0xe85   : > { %v6075_v54 = vpop.f32.mrb[254].mxu1 }
 0xe86   : > { %v6086_v57 = vpack.c.bf16 %v6075_v54, %v6072_v11  ;;  %v7614_v16 = vpop.f32.mrb[255].mxu1 }
 0xe88   : > { %7630 = vmatmul.mubr.msk.bf16.gmra.mrb[116].mxu0 %vm832_vm2, %v6086_v57 }
 0xf43   : > { %v7619_v46 = vpop.f32.mrb[104].mxu0 }
 0xf44   : > { %v6238_v55 = vadd.f32 %v7619_v46, %v6643_v22  ;;  %v6150_v60 = vpop.f32.mrb[105].mxu0 }
 0xf45   : > { %v6236_v43 = vadd.f32 %v6643_v22, %v6150_v60  ;;  %v7620_v7 = vpop.f32.mrb[106].mxu0 }
 0xf46   : > { %6254 = vst.msk [vmem:[%s10241_s27 + $0x10] sm:$0xff] %vm444_vm0, %v6238_v55  ;;  %v6239_v27 = vadd.f32 %v7620_v7, %v6643_v22  ;;  %v6153_v2 = vpop.f32.mrb[107].mxu0 }
 0xf47   : > { %6252 = vst.msk [vmem:[%s10241_s27] sm:$0xff] %vm444_vm0, %v6236_v43  ;;  %v6237_v38 = vadd.f32 %v6643_v22, %v6153_v2 }
 0xf48   : > { %6255 = vst.msk [vmem:[%s10241_s27 + $0x18] sm:$0xff] %vm444_vm0, %v6239_v27 }
 0xf49   : > { %6253 = vst.msk [vmem:[%s10241_s27 + $0x8] sm:$0xff] %vm444_vm0, %v6237_v38 }
 0xf4b   : > { %v7623_v28 = vpop.f32.mrb[108].mxu0 }
 0xf4c   : > { %v6242_v3 = vadd.f32 %v7623_v28, %v6643_v22  ;;  %v6166_v10 = vpop.f32.mrb[109].mxu0 }
 0xf4d   : > { %v6240_v44 = vadd.f32 %v6643_v22, %v6166_v10  ;;  %v7624_v31 = vpop.f32.mrb[110].mxu0 }
 0xf4e   : > { %6258 = vst.msk [vmem:[%s10241_s27 + $0x30] sm:$0xff] %vm444_vm0, %v6242_v3  ;;  %v6243_v33 = vadd.f32 %v7624_v31, %v6643_v22  ;;  %v6169_v41 = vpop.f32.mrb[111].mxu0 }
 0xf4f   : > { %6256 = vst.msk [vmem:[%s10241_s27 + $0x20] sm:$0xff] %vm444_vm0, %v6240_v44  ;;  %v6241_v19 = vadd.f32 %v6643_v22, %v6169_v41 }
 0xf50   : > { %6259 = vst.msk [vmem:[%s10241_s27 + $0x38] sm:$0xff] %vm444_vm0, %v6243_v33 }
 0xf51   : > { %6257 = vst.msk [vmem:[%s10241_s27 + $0x28] sm:$0xff] %vm444_vm0, %v6241_v19 }
 0xf53   : > { %v7627_v17 = vpop.f32.mrb[112].mxu0 }
 0xf54   : > { %v6246_v23 = vadd.f32 %v7627_v17, %v6643_v22  ;;  %v6182_v62 = vpop.f32.mrb[113].mxu0 }
 0xf55   : > { %v6244_v52 = vadd.f32 %v6643_v22, %v6182_v62  ;;  %v7628_v20 = vpop.f32.mrb[114].mxu0 }
 0xf56   : > { %6262 = vst.msk [vmem:[%s10241_s27 + $0x50] sm:$0xff] %vm444_vm0, %v6246_v23  ;;  %v6247_v24 = vadd.f32 %v7628_v20, %v6643_v22  ;;  %v6185_v8 = vpop.f32.mrb[115].mxu0 }
 0xf57   : > { %6260 = vst.msk [vmem:[%s10241_s27 + $0x40] sm:$0xff] %vm444_vm0, %v6244_v52  ;;  %v6245_v14 = vadd.f32 %v6643_v22, %v6185_v8 }
 0xf58   : > { %6263 = vst.msk [vmem:[%s10241_s27 + $0x58] sm:$0xff] %vm444_vm0, %v6247_v24 }
 0xf59   : > { %6261 = vst.msk [vmem:[%s10241_s27 + $0x48] sm:$0xff] %vm444_vm0, %v6245_v14 }
 0xf5b   : > { %v7631_v42 = vpop.f32.mrb[116].mxu0 }
 0xf5c   : > { %v6250_v5 = vadd.f32 %v7631_v42, %v6643_v22  ;;  %v6198_v61 = vpop.f32.mrb[117].mxu0 }
 0xf5d   : > { %v6248_v50 = vadd.f32 %v6643_v22, %v6198_v61  ;;  %v7632_v0 = vpop.f32.mrb[118].mxu0 }
 0xf5e   : > { %6266 = vst.msk [vmem:[%s10241_s27 + $0x70] sm:$0xff] %vm444_vm0, %v6250_v5  ;;  %v6251_v47 = vadd.f32 %v7632_v0, %v6643_v22  ;;  %v6201_v21 = vpop.f32.mrb[119].mxu0 }
 0xf5f   : > { %6264 = vst.msk [vmem:[%s10241_s27 + $0x60] sm:$0xff] %vm444_vm0, %v6248_v50  ;;  %v6249_v56 = vadd.f32 %v6643_v22, %v6201_v21 }
 0xf60   : > { %6267 = vst.msk [vmem:[%s10241_s27 + $0x78] sm:$0xff] %vm444_vm0, %v6251_v47 }
 0xf61   : > { %6265 = vst.msk [vmem:[%s10241_s27 + $0x68] sm:$0xff] %vm444_vm0, %v6249_v56 }
 0xf62   : > { %8057 = shalt.err (!%p8054_p3)
}
 0xf63   : > { %s8058_s18 = scalar_lea.hbm %s10274_s11, 2048  ;;  %s8062_s30 = scalar_lea.hbm %s10337_s10, 4096 }
 0xf64   : > { %p8059_p4 = scmp.ne.s32.totalorder %s10274_s11, %s8058_s18  ;;  %p8063_p9 = scmp.lt.u32.totalorder %s10274_s11, %s10337_s10 }
 0xf65   : > { %p8064_p10 = scmp.lt.u32.totalorder %s8062_s30, %s8058_s18  ;;  %p8066_p12 = scmp.lt.u32.totalorder %s8058_s18, %s10274_s11 }
 0xf66   : > { %p8060_p7 = pnand %p8059_p4, %p8206_p5 }
 0xf67   : > { %p8065_p11 = por %p8064_p10, %p8063_p9 }
 0xf68   : > { %p8061_p8 = pneg %p8060_p7 }
 0xf69   : > { %p8067_p13 = por %p8066_p12, %p8065_p11 }
 0xf6b   : > { %p8068_p0 = pnand %p8067_p13, %p8061_p8 }
 0xf6d   : > { %8071 = shalt.err (!%p8068_p0)
}
 0xf6e   : > { %s8111_s12 = smov 128   ;;  %s8112_s25 = smov 8  }
 0xf6f   : > { %7689 = dma.vmem_to_hbm [thread:$0]  (%p8206_p5), %s10276_s29, 2048, %s10274_s11, %s10286_s17, %s8111_s12, %s8111_s12, %s8112_s25  }
 0xf70 PF: > { %p7695_p1 = scmp.ge.s32.totalorder %s8106_s16, 2  ;;  %s6298_s26 = sand.u32 1, %s8094_s13  }
 0xf71   : > { %s6299_s18 = scalar_lea.sflag [#allocation3], %s6298_s26 }
 0xf72   : > { %p7692_p2 = pnand %p7695_p1, %p8210_p6 }
 0xf74   : > { %8089 = dma.done.wait (!%p7692_p2), %s6299_s18, 2048  }
 0xf75   : > { %8091 = vsyncadd (!%p7692_p2), %s6299_s18, 4294965248  ;;  %p20_p3 = scmp.ge.s32.totalorder %s8193_s19, 4   ;;  %s10349_s13 = smov %s8098_s14 }
 0xf76   : > { %s10350_s14 = smov %s8102_s15  ;;  %s10351_s15 = smov %s8204_s22 }
 0xf77   : > { %s10352_s16 = smov %s8193_s19  ;;  %22 = sbr.rel (!%p20_p3) target bundleno = 3 (0x3), region = 119 }
 0xf7e   :  { %6304 = vsyncpa [#allocation3], 1 }
 0xf7f   :  { %6306 = vsyncpa [#allocation3 + $0x1], 1 }

</bundles_post_ra>
